<compile_context>
chip_gen: v7x
topology: tpu7x:2x2x1
jax: 0.10.0
libtpu: 0.0.40
codegen_flags: <defaults>
</compile_context>

<pallas_src>
import numpy as np
import jax
import jax.numpy as jnp
from jax import lax
from jax.experimental import pallas as pl
from jax.experimental.pallas import tpu as pltpu

LEAKY_SLOPE = 0.01   # nn.LeakyReLU default
BN_EPS = 1e-5        # nn.BatchNorm2d default


def _round_up(x, m):
    return (x + m - 1) // m * m


# ----------------------------------------------------------------------------
# Conv3x3 + folded BN + LeakyReLU  (halo-row-tiled shift-and-matmul)
# ----------------------------------------------------------------------------
def _make_conv3x3_bn_act_kernel(KH, KW, TH, W_out, act):
    """grid = (batch, row_tile, cin_chunk); cin_chunk is the reduction axis."""

    def kernel(x_ref, w_ref, scale_ref, shift_ref, o_ref, acc_ref):
        k = pl.program_id(2)

        @pl.when(k == 0)
        def _init():
            acc_ref[...] = jnp.zeros_like(acc_ref)

        x = x_ref[0, 0]                       # (TH+KH-1, W_out+KW-1, TC) bf16
        acc = acc_ref[...]
        for ky in range(KH):                  # 9 shifted-window MXU matmuls
            for kx in range(KW):
                patch = x[ky:ky + TH, kx:kx + W_out, :]
                patch = patch.reshape(TH * W_out, patch.shape[-1])
                acc = acc + jnp.dot(patch, w_ref[ky, kx],
                                    preferred_element_type=jnp.float32)
        acc_ref[...] = acc

        @pl.when(k == pl.num_programs(2) - 1)
        def _finalize():
            # folded BN affine + activation, applied once (not per chunk)
            y = acc_ref[...] * scale_ref[...] + shift_ref[...]
            if act == "leaky":
                y = jnp.where(y > 0, y, LEAKY_SLOPE * y)
            o_ref[0, 0] = y.astype(o_ref.dtype)

    return kernel


def _choose_row_tile(H, W, c_tile, cout_p, budget_bytes=8 * 1024 * 1024):
    """Largest row tile dividing H whose double-buffered working set fits budget."""
    best = 1
    for th in range(1, H + 1):
        if H % th:
            continue
        in_tile = (th + 2) * (W + 2) * c_tile * 2       # bf16 halo tile
        out_tile = th * W * cout_p * 4                  # f32 output tile
        acc = th * W * cout_p * 4                       # f32 accumulator
        if 2 * (in_tile + out_tile) + acc <= budget_bytes:
            best = th
    return best


def conv3x3_bn_act_pallas(x_nhwc, w, scale, shift, *, act="leaky",
                          row_tile=None, c_tile=128):
    """3x3 stride-1 pad-1 Conv2d + folded BN affine + activation.  NHWC in/out."""
    N, H, W, Cin = x_nhwc.shape
    KH, KW, Cin_w, Cout = w.shape
    assert (KH, KW) == (3, 3) and Cin_w == Cin
    Cin_p = _round_up(Cin, c_tile)          # lane-aligned / chunkable channels
    Cout_p = _round_up(Cout, 128)           # lane-dense output stores
    TH = row_tile if row_tile is not None else _choose_row_tile(H, W, c_tile, Cout_p)
    assert H % TH == 0, (H, TH)
    nT = H // TH
    Wp = W + KW - 1
    n_kc = Cin_p // c_tile

    # Single HBM materialisation of the conv input: pad (spatial halo + channel
    # alignment), split into overlapping row tiles (2-row halo) and cast to bf16.
    # XLA fuses the upstream concat/pad/slice/cast into this one producer, so
    # there is no 9x im2col blow-up and no separate concat round trip.
    xp = jnp.pad(x_nhwc, ((0, 0), (1, 1), (1, 1), (0, Cin_p - Cin)))
    x_tiles = jnp.stack([xp[:, t * TH:t * TH + TH + KH - 1] for t in range(nT)],
                        axis=1).astype(jnp.bfloat16)    # (N, nT, TH+2, Wp, Cin_p)

    w_p = jnp.pad(w, ((0, 0), (0, 0), (0, Cin_p - Cin), (0, Cout_p - Cout))
                  ).astype(jnp.bfloat16)
    scale_p = jnp.pad(scale, (0, Cout_p - Cout)).reshape(1, Cout_p).astype(jnp.float32)
    shift_p = jnp.pad(shift, (0, Cout_p - Cout)).reshape(1, Cout_p).astype(jnp.float32)

    out = pl.pallas_call(
        _make_conv3x3_bn_act_kernel(KH, KW, TH, W, act),
        out_shape=jax.ShapeDtypeStruct((N, nT, TH * W, Cout_p), jnp.float32),
        grid=(N, nT, n_kc),
        in_specs=[
            pl.BlockSpec((1, 1, TH + KH - 1, Wp, c_tile),
                         lambda n, t, k: (n, t, 0, 0, k)),
            pl.BlockSpec((KH, KW, c_tile, Cout_p), lambda n, t, k: (0, 0, k, 0)),
            pl.BlockSpec((1, Cout_p), lambda n, t, k: (0, 0)),
            pl.BlockSpec((1, Cout_p), lambda n, t, k: (0, 0)),
        ],
        out_specs=pl.BlockSpec((1, 1, TH * W, Cout_p), lambda n, t, k: (n, t, 0, 0)),
        scratch_shapes=[pltpu.VMEM((TH * W, Cout_p), jnp.float32)],
        compiler_params=pltpu.CompilerParams(
            dimension_semantics=("parallel", "parallel", "arbitrary"),
            vmem_limit_bytes=32 * 1024 * 1024),
    )(x_tiles, w_p, scale_p, shift_p)

    return out.reshape(N, H, W, Cout_p)[..., :Cout]


# ----------------------------------------------------------------------------
# Separable bilinear upsampling (align_corners=True)
# ----------------------------------------------------------------------------
def _interp_matrix(n_in, n_out):
    """Row-interp matrix matching F.interpolate(mode='bilinear', align_corners=True)."""
    R = np.zeros((n_out, n_in), np.float32)
    for i in range(n_out):
        src = 0.0 if n_out == 1 else i * (n_in - 1) / (n_out - 1)
        i0 = min(int(np.floor(src)), n_in - 1)
        i1 = min(i0 + 1, n_in - 1)
        w1 = src - i0
        R[i, i0] += 1.0 - w1
        R[i, i1] += w1
    return R


def _row_interp_kernel(r_ref, x_ref, o_ref):
    o_ref[0] = jnp.dot(r_ref[...], x_ref[0], preferred_element_type=jnp.float32)


def _col_interp_kernel(r_ref, x_ref, o_ref):
    o_ref[0, 0] = jnp.dot(r_ref[...], x_ref[0, 0], preferred_element_type=jnp.float32)


def bilinear_upsample_pallas(x_nhwc, Hout, Wout):
    """Two small separable MXU matmuls instead of a dense Kronecker matrix."""
    N, Hin, Win, C = x_nhwc.shape
    Rh = jnp.asarray(_interp_matrix(Hin, Hout), jnp.float32)   # (Hout, Hin)
    Rw = jnp.asarray(_interp_matrix(Win, Wout), jnp.float32)   # (Wout, Win)

    # rows: (Hout, Hin) @ (Hin, Win*C) per batch (lane dim = Win*C, dense)
    xr = x_nhwc.reshape(N, Hin, Win * C).astype(jnp.float32)
    t = pl.pallas_call(
        _row_interp_kernel,
        out_shape=jax.ShapeDtypeStruct((N, Hout, Win * C), jnp.float32),
        grid=(N,),
        in_specs=[pl.BlockSpec((Hout, Hin), lambda n: (0, 0)),
                  pl.BlockSpec((1, Hin, Win * C), lambda n: (n, 0, 0))],
        out_specs=pl.BlockSpec((1, Hout, Win * C), lambda n: (n, 0, 0)),
        compiler_params=pltpu.CompilerParams(
            dimension_semantics=("parallel",),
            vmem_limit_bytes=32 * 1024 * 1024),
    )(Rh, xr)

    # cols: (Wout, Win) @ (Win, C) per (batch, output row)
    t = t.reshape(N, Hout, Win, C)
    out = pl.pallas_call(
        _col_interp_kernel,
        out_shape=jax.ShapeDtypeStruct((N, Hout, Wout, C), jnp.float32),
        grid=(N, Hout),
        in_specs=[pl.BlockSpec((Wout, Win), lambda n, h: (0, 0)),
                  pl.BlockSpec((1, 1, Win, C), lambda n, h: (n, h, 0, 0))],
        out_specs=pl.BlockSpec((1, 1, Wout, C), lambda n, h: (n, h, 0, 0)),
        compiler_params=pltpu.CompilerParams(
            dimension_semantics=("parallel", "parallel"),
            vmem_limit_bytes=32 * 1024 * 1024),
    )(Rw, t)
    return out


# ----------------------------------------------------------------------------
# UpSampleBN parameters (deterministic) and forward pass
# ----------------------------------------------------------------------------
def _conv_init(key, kh, kw, cin, cout):
    kw_, kb = jax.random.split(key)
    w = jax.random.normal(kw_, (kh, kw, cin, cout), jnp.float32) / np.sqrt(kh * kw * cin)
    b = 0.01 * jax.random.normal(kb, (cout,), jnp.float32)
    return w, b


def _bn_fold(key, cout, conv_bias):
    # Eval-mode fold of a fresh BatchNorm2d (running_mean=0, running_var=1).
    kg, kb2 = jax.random.split(key)
    gamma = 1.0 + 0.1 * jax.random.normal(kg, (cout,), jnp.float32)
    beta = 0.1 * jax.random.normal(kb2, (cout,), jnp.float32)
    running_mean = jnp.zeros((cout,), jnp.float32)
    running_var = jnp.ones((cout,), jnp.float32)
    s = gamma / jnp.sqrt(running_var + BN_EPS)
    shift = (conv_bias - running_mean) * s + beta
    return s, shift


def upsample_bn_init(key, skip_input, output_features):
    k1, k2, k3, k4 = jax.random.split(key, 4)
    w1, b1 = _conv_init(k1, 3, 3, skip_input, output_features)
    s1, sh1 = _bn_fold(k2, output_features, b1)
    w2, b2 = _conv_init(k3, 3, 3, output_features, output_features)
    s2, sh2 = _bn_fold(k4, output_features, b2)
    return dict(w1=w1, s1=s1, sh1=sh1, w2=w2, s2=s2, sh2=sh2)


def upsample_bn_forward(params, x_nchw, concat_nchw, *, row_tile=None):
    """UpSampleBN.forward; NCHW in / NCHW out (PyTorch convention)."""
    x = jnp.transpose(x_nchw, (0, 2, 3, 1)).astype(jnp.float32)
    skip = jnp.transpose(concat_nchw, (0, 2, 3, 1)).astype(jnp.float32)
    Hout, Wout = skip.shape[1], skip.shape[2]
    up_x = bilinear_upsample_pallas(x, Hout, Wout)
    # cat(dim=1 NCHW) == channel (last-dim) concat in NHWC; it fuses into the
    # conv input pad/tile/bf16-cast producer (no extra HBM round trip).
    f = jnp.concatenate([up_x, skip], axis=-1)
    h = conv3x3_bn_act_pallas(f, params["w1"], params["s1"], params["sh1"],
                              act="leaky", row_tile=row_tile)
    h = conv3x3_bn_act_pallas(h, params["w2"], params["s2"], params["sh2"],
                              act="leaky", row_tile=row_tile)
    return jnp.transpose(h, (0, 3, 1, 2))


# ----------------------------------------------------------------------------
# Pure-JAX reference (same bf16 operand quantization, f32 accumulation)
# ----------------------------------------------------------------------------
def upsample_bn_reference(params, x_nchw, concat_nchw):
    x = jnp.transpose(x_nchw, (0, 2, 3, 1)).astype(jnp.float32)
    skip = jnp.transpose(concat_nchw, (0, 2, 3, 1)).astype(jnp.float32)
    Hin, Win = x.shape[1], x.shape[2]
    Hout, Wout = skip.shape[1], skip.shape[2]
    Rh = jnp.asarray(_interp_matrix(Hin, Hout), jnp.float32)
    Rw = jnp.asarray(_interp_matrix(Win, Wout), jnp.float32)
    up = jnp.einsum("oh,pw,nhwc->nopc", Rh, Rw, x)
    f = jnp.concatenate([up, skip], axis=-1)

    def conv_bn_leaky(h, w, s, sh):
        y = lax.conv_general_dilated(
            h.astype(jnp.bfloat16), w.astype(jnp.bfloat16), (1, 1),
            ((1, 1), (1, 1)), dimension_numbers=("NHWC", "HWIO", "NHWC"),
            preferred_element_type=jnp.float32)
        y = y * s + sh
        return jnp.where(y > 0, y, LEAKY_SLOPE * y)

    h = conv_bn_leaky(f, params["w1"], params["s1"], params["sh1"])
    h = conv_bn_leaky(h, params["w2"], params["s2"], params["sh2"])
    return jnp.transpose(h, (0, 3, 1, 2))


# ----------------------------------------------------------------------------
if __name__ == "__main__":
    key = jax.random.PRNGKey(0)
    kp, kx, ks = jax.random.split(key, 3)

    # Small shapes consistent with the module: x upsamples 8x8 -> 16x16 onto the
    # skip connection; skip_input = 192 + 64 = 256 (two 128-channel chunks so the
    # K-axis accumulation path is exercised), output_features = 128 (lane dense).
    C_UP, C_SKIP, FEAT = 192, 64, 128
    params = upsample_bn_init(kp, skip_input=C_UP + C_SKIP, output_features=FEAT)
    x = jax.random.normal(kx, (2, C_UP, 8, 8), jnp.float32)          # NCHW
    concat_with = jax.random.normal(ks, (2, C_SKIP, 16, 16), jnp.float32)

    # row_tile=8 forces >=2 spatial tiles at this toy size so the halo-tiled
    # grid path (not just a single full-image block) is exercised.
    fwd = jax.jit(lambda a, b: upsample_bn_forward(params, a, b, row_tile=8))
    out = jax.block_until_ready(fwd(x, concat_with))
    assert out.shape == (2, FEAT, 16, 16), out.shape

    ref = jax.block_until_ready(jax.jit(
        lambda a, b: upsample_bn_reference(params, a, b))(x, concat_with))
    max_err = float(jnp.max(jnp.abs(out - ref)))
    mean_err = float(jnp.mean(jnp.abs(out - ref)))
    assert max_err < 0.1 and mean_err < 0.01, (max_err, mean_err)

    print("KERNEL_OK")
</pallas_src>

<mosaic_0001>
module attributes {stable_mosaic.version = 11 : i64} {
  func.func @_row_interp_kernel(%arg0: i32, %arg1: memref<16x8xf32, #tpu.memory_space<vmem>>, %arg2: memref<1x8x1536xf32, #tpu.memory_space<vmem>>, %arg3: memref<1x16x1536xf32, #tpu.memory_space<vmem>>) attributes {dimension_semantics = [#tpu.dimension_semantics<parallel>], iteration_bounds = array<i64: 2>, scalar_prefetch = 0 : i64, scratch_operands = 0 : i64, tpu.core_type = #tpu.core_type<tc>, window_params = [{pipeline_mode = #tpu.pipeline_mode<synchronous>, transform_indices = @transform_0, window_bounds = array<i64: 16, 8>}, {transform_indices = @transform_1, window_bounds = array<i64: 1, 8, 1536>}, {transform_indices = @transform_2, window_bounds = array<i64: 1, 16, 1536>}]} {
    %c0 = arith.constant 0 : index
    %c0_0 = arith.constant 0 : index
    %0 = vector.load %arg1[%c0, %c0_0] : memref<16x8xf32, #tpu.memory_space<vmem>>, vector<16x8xf32>
    %c0_1 = arith.constant 0 : index
    %c0_2 = arith.constant 0 : index
    %c0_3 = arith.constant 0 : index
    %1 = vector.load %arg2[%c0_1, %c0_2, %c0_3] : memref<1x8x1536xf32, #tpu.memory_space<vmem>>, vector<1x8x1536xf32>
    %2 = vector.shape_cast %1 : vector<1x8x1536xf32> to vector<8x1536xf32>
    %cst = arith.constant dense<0.000000e+00> : vector<16x1536xf32>
    %3 = tpu.matmul %0, %2, %cst {dimension_numbers = #tpu.dot_dimension_numbers<[1], [0], [0], [1], [0, 0, 1, 1], [], []>} : vector<16x8xf32>, vector<8x1536xf32>, vector<16x1536xf32> -> vector<16x1536xf32>
    %c0_4 = arith.constant 0 : index
    %c0_5 = arith.constant 0 : index
    %c0_6 = arith.constant 0 : index
    %4 = vector.load %arg3[%c0_4, %c0_5, %c0_6] : memref<1x16x1536xf32, #tpu.memory_space<vmem>>, vector<1x16x1536xf32>
    %5 = vector.shape_cast %4 : vector<1x16x1536xf32> to vector<16x1536xf32>
    %6 = vector.shape_cast %3 : vector<16x1536xf32> to vector<1x16x1536xf32>
    tpu.vector_store %arg3[%c0_4, %c0_5, %c0_6], %6 {strides = array<i32>} : memref<1x16x1536xf32, #tpu.memory_space<vmem>>, vector<1x16x1536xf32>,
    return
  }
  func.func @transform_0(%arg0: i32) -> (i32, i32) {
    %c0_i32 = arith.constant 0 : i32
    %c0_i32_0 = arith.constant 0 : i32
    %c0_i32_1 = arith.constant 0 : i32
    return %c0_i32, %c0_i32_0 : i32, i32
  }
  func.func @transform_1(%arg0: i32) -> (i32, i32, i32) {
    %c0_i32 = arith.constant 0 : i32
    %c0_i32_0 = arith.constant 0 : i32
    %c0_i32_1 = arith.constant 0 : i32
    return %arg0, %c0_i32, %c0_i32_0 : i32, i32, i32
  }
  func.func @transform_2(%arg0: i32) -> (i32, i32, i32) {
    %c0_i32 = arith.constant 0 : i32
    %c0_i32_0 = arith.constant 0 : i32
    %c0_i32_1 = arith.constant 0 : i32
    return %arg0, %c0_i32, %c0_i32_0 : i32, i32, i32
  }
}

module attributes {stable_mosaic.version = 11 : i64} {
  func.func @_col_interp_kernel(%arg0: i32, %arg1: i32, %arg2: memref<16x8xf32, #tpu.memory_space<vmem>>, %arg3: memref<1x1x8x192xf32, #tpu.memory_space<vmem>>, %arg4: memref<1x1x16x192xf32, #tpu.memory_space<vmem>>) attributes {dimension_semantics = [#tpu.dimension_semantics<parallel>, #tpu.dimension_semantics<parallel>], iteration_bounds = array<i64: 2, 16>, scalar_prefetch = 0 : i64, scratch_operands = 0 : i64, tpu.core_type = #tpu.core_type<tc>, window_params = [{pipeline_mode = #tpu.pipeline_mode<synchronous>, transform_indices = @transform_0, window_bounds = array<i64: 16, 8>}, {transform_indices = @transform_1, window_bounds = array<i64: 1, 1, 8, 192>}, {transform_indices = @transform_2, window_bounds = array<i64: 1, 1, 16, 192>}]} {
    %c0 = arith.constant 0 : index
    %c0_0 = arith.constant 0 : index
    %0 = vector.load %arg2[%c0, %c0_0] : memref<16x8xf32, #tpu.memory_space<vmem>>, vector<16x8xf32>
    %c0_1 = arith.constant 0 : index
    %c0_2 = arith.constant 0 : index
    %c0_3 = arith.constant 0 : index
    %c0_4 = arith.constant 0 : index
    %1 = vector.load %arg3[%c0_1, %c0_2, %c0_3, %c0_4] : memref<1x1x8x192xf32, #tpu.memory_space<vmem>>, vector<1x1x8x192xf32>
    %2 = vector.shape_cast %1 : vector<1x1x8x192xf32> to vector<8x192xf32>
    %cst = arith.constant dense<0.000000e+00> : vector<16x192xf32>
    %3 = tpu.matmul %0, %2, %cst {dimension_numbers = #tpu.dot_dimension_numbers<[1], [0], [0], [1], [0, 0, 1, 1], [], []>} : vector<16x8xf32>, vector<8x192xf32>, vector<16x192xf32> -> vector<16x192xf32>
    %c0_5 = arith.constant 0 : index
    %c0_6 = arith.constant 0 : index
    %c0_7 = arith.constant 0 : index
    %c0_8 = arith.constant 0 : index
    %4 = vector.load %arg4[%c0_5, %c0_6, %c0_7, %c0_8] : memref<1x1x16x192xf32, #tpu.memory_space<vmem>>, vector<1x1x16x192xf32>
    %5 = vector.shape_cast %4 : vector<1x1x16x192xf32> to vector<16x192xf32>
    %6 = vector.shape_cast %3 : vector<16x192xf32> to vector<1x1x16x192xf32>
    tpu.vector_store %arg4[%c0_5, %c0_6, %c0_7, %c0_8], %6 {strides = array<i32>} : memref<1x1x16x192xf32, #tpu.memory_space<vmem>>, vector<1x1x16x192xf32>,
    return
  }
  func.func @transform_0(%arg0: i32, %arg1: i32) -> (i32, i32) {
    %c0_i32 = arith.constant 0 : i32
    %c0_i32_0 = arith.constant 0 : i32
    %c0_i32_1 = arith.constant 0 : i32
    return %c0_i32, %c0_i32_0 : i32, i32
  }
  func.func @transform_1(%arg0: i32, %arg1: i32) -> (i32, i32, i32, i32) {
    %c0_i32 = arith.constant 0 : i32
    %c0_i32_0 = arith.constant 0 : i32
    %c0_i32_1 = arith.constant 0 : i32
    return %arg0, %arg1, %c0_i32, %c0_i32_0 : i32, i32, i32, i32
  }
  func.func @transform_2(%arg0: i32, %arg1: i32) -> (i32, i32, i32, i32) {
    %c0_i32 = arith.constant 0 : i32
    %c0_i32_0 = arith.constant 0 : i32
    %c0_i32_1 = arith.constant 0 : i32
    return %arg0, %arg1, %c0_i32, %c0_i32_0 : i32, i32, i32, i32
  }
}

module attributes {stable_mosaic.version = 11 : i64} {
  func.func @kernel(%arg0: i32, %arg1: i32, %arg2: i32, %arg3: memref<1x1x10x18x128xbf16, #tpu.memory_space<vmem>>, %arg4: memref<3x3x128x128xbf16, #tpu.memory_space<vmem>>, %arg5: memref<1x128xf32, #tpu.memory_space<vmem>>, %arg6: memref<1x128xf32, #tpu.memory_space<vmem>>, %arg7: memref<1x1x128x128xf32, #tpu.memory_space<vmem>>, %arg8: memref<128x128xf32, #tpu.memory_space<vmem>>) attributes {dimension_semantics = [#tpu.dimension_semantics<parallel>, #tpu.dimension_semantics<parallel>, #tpu.dimension_semantics<arbitrary>], iteration_bounds = array<i64: 2, 2, 2>, scalar_prefetch = 0 : i64, scratch_operands = 1 : i64, tpu.core_type = #tpu.core_type<tc>, window_params = [{transform_indices = @transform_0, window_bounds = array<i64: 1, 1, 10, 18, 128>}, {transform_indices = @transform_1, window_bounds = array<i64: 3, 3, 128, 128>}, {pipeline_mode = #tpu.pipeline_mode<synchronous>, transform_indices = @transform_2, window_bounds = array<i64: 1, 128>}, {pipeline_mode = #tpu.pipeline_mode<synchronous>, transform_indices = @transform_3, window_bounds = array<i64: 1, 128>}, {transform_indices = @transform_4, window_bounds = array<i64: 1, 1, 128, 128>}]} {
    %c0_i32 = arith.constant 0 : i32
    %0 = arith.cmpi eq, %arg2, %c0_i32 : i32
    %1 = arith.extui %0 : i1 to i32
    %c0_i32_0 = arith.constant 0 : i32
    %2 = arith.cmpi ne, %1, %c0_i32_0 : i32
    scf.if %2 {
      %cst_52 = arith.constant 0.000000e+00 : f32
      %64 = vector.broadcast %cst_52 : f32 to vector<128x128xf32>
      %c0_53 = arith.constant 0 : index
      %c0_54 = arith.constant 0 : index
      %65 = vector.load %arg8[%c0_53, %c0_54] : memref<128x128xf32, #tpu.memory_space<vmem>>, vector<128x128xf32>
      tpu.vector_store %arg8[%c0_53, %c0_54], %64 {strides = array<i32>} : memref<128x128xf32, #tpu.memory_space<vmem>>, vector<128x128xf32>,
    } else {
    }
    %c0 = arith.constant 0 : index
    %c0_1 = arith.constant 0 : index
    %c0_2 = arith.constant 0 : index
    %c0_3 = arith.constant 0 : index
    %c0_4 = arith.constant 0 : index
    %3 = vector.load %arg3[%c0, %c0_1, %c0_2, %c0_3, %c0_4] : memref<1x1x10x18x128xbf16, #tpu.memory_space<vmem>>, vector<1x1x10x18x128xbf16>
    %4 = vector.shape_cast %3 : vector<1x1x10x18x128xbf16> to vector<10x18x128xbf16>
    %c0_5 = arith.constant 0 : index
    %c0_6 = arith.constant 0 : index
    %5 = vector.load %arg8[%c0_5, %c0_6] : memref<128x128xf32, #tpu.memory_space<vmem>>, vector<128x128xf32>
    %6 = vector.extract_strided_slice %4 {offsets = [0, 0, 0], sizes = [8, 16, 128], strides = [1, 1, 1]} : vector<10x18x128xbf16> to vector<8x16x128xbf16>
    %7 = vector.shape_cast %6 : vector<8x16x128xbf16> to vector<128x128xbf16>
    %c0_7 = arith.constant 0 : index
    %c0_8 = arith.constant 0 : index
    %c0_9 = arith.constant 0 : index
    %c0_10 = arith.constant 0 : index
    %8 = vector.load %arg4[%c0_7, %c0_8, %c0_9, %c0_10] : memref<3x3x128x128xbf16, #tpu.memory_space<vmem>>, vector<1x1x128x128xbf16>
    %9 = vector.shape_cast %8 : vector<1x1x128x128xbf16> to vector<128x128xbf16>
    %cst = arith.constant dense<0.000000e+00> : vector<128x128xf32>
    %10 = tpu.matmul %7, %9, %cst {dimension_numbers = #tpu.dot_dimension_numbers<[1], [0], [0], [1], [0, 0, 1, 1], [], []>} : vector<128x128xbf16>, vector<128x128xbf16>, vector<128x128xf32> -> vector<128x128xf32>
    %11 = arith.addf %5, %10 : vector<128x128xf32>
    %12 = vector.extract_strided_slice %4 {offsets = [0, 1, 0], sizes = [8, 16, 128], strides = [1, 1, 1]} : vector<10x18x128xbf16> to vector<8x16x128xbf16>
    %13 = vector.shape_cast %12 : vector<8x16x128xbf16> to vector<128x128xbf16>
    %c0_11 = arith.constant 0 : index
    %c1 = arith.constant 1 : index
    %c0_12 = arith.constant 0 : index
    %c0_13 = arith.constant 0 : index
    %14 = vector.load %arg4[%c0_11, %c1, %c0_12, %c0_13] : memref<3x3x128x128xbf16, #tpu.memory_space<vmem>>, vector<1x1x128x128xbf16>
    %15 = vector.shape_cast %14 : vector<1x1x128x128xbf16> to vector<128x128xbf16>
    %cst_14 = arith.constant dense<0.000000e+00> : vector<128x128xf32>
    %16 = tpu.matmul %13, %15, %cst_14 {dimension_numbers = #tpu.dot_dimension_numbers<[1], [0], [0], [1], [0, 0, 1, 1], [], []>} : vector<128x128xbf16>, vector<128x128xbf16>, vector<128x128xf32> -> vector<128x128xf32>
    %17 = arith.addf %11, %16 : vector<128x128xf32>
    %18 = vector.extract_strided_slice %4 {offsets = [0, 2, 0], sizes = [8, 16, 128], strides = [1, 1, 1]} : vector<10x18x128xbf16> to vector<8x16x128xbf16>
    %19 = vector.shape_cast %18 : vector<8x16x128xbf16> to vector<128x128xbf16>
    %c0_15 = arith.constant 0 : index
    %c2 = arith.constant 2 : index
    %c0_16 = arith.constant 0 : index
    %c0_17 = arith.constant 0 : index
    %20 = vector.load %arg4[%c0_15, %c2, %c0_16, %c0_17] : memref<3x3x128x128xbf16, #tpu.memory_space<vmem>>, vector<1x1x128x128xbf16>
    %21 = vector.shape_cast %20 : vector<1x1x128x128xbf16> to vector<128x128xbf16>
    %cst_18 = arith.constant dense<0.000000e+00> : vector<128x128xf32>
    %22 = tpu.matmul %19, %21, %cst_18 {dimension_numbers = #tpu.dot_dimension_numbers<[1], [0], [0], [1], [0, 0, 1, 1], [], []>} : vector<128x128xbf16>, vector<128x128xbf16>, vector<128x128xf32> -> vector<128x128xf32>
    %23 = arith.addf %17, %22 : vector<128x128xf32>
    %24 = vector.extract_strided_slice %4 {offsets = [1, 0, 0], sizes = [8, 16, 128], strides = [1, 1, 1]} : vector<10x18x128xbf16> to vector<8x16x128xbf16>
    %25 = vector.shape_cast %24 : vector<8x16x128xbf16> to vector<128x128xbf16>
    %c1_19 = arith.constant 1 : index
    %c0_20 = arith.constant 0 : index
    %c0_21 = arith.constant 0 : index
    %c0_22 = arith.constant 0 : index
    %26 = vector.load %arg4[%c1_19, %c0_20, %c0_21, %c0_22] : memref<3x3x128x128xbf16, #tpu.memory_space<vmem>>, vector<1x1x128x128xbf16>
    %27 = vector.shape_cast %26 : vector<1x1x128x128xbf16> to vector<128x128xbf16>
    %cst_23 = arith.constant dense<0.000000e+00> : vector<128x128xf32>
    %28 = tpu.matmul %25, %27, %cst_23 {dimension_numbers = #tpu.dot_dimension_numbers<[1], [0], [0], [1], [0, 0, 1, 1], [], []>} : vector<128x128xbf16>, vector<128x128xbf16>, vector<128x128xf32> -> vector<128x128xf32>
    %29 = arith.addf %23, %28 : vector<128x128xf32>
    %30 = vector.extract_strided_slice %4 {offsets = [1, 1, 0], sizes = [8, 16, 128], strides = [1, 1, 1]} : vector<10x18x128xbf16> to vector<8x16x128xbf16>
    %31 = vector.shape_cast %30 : vector<8x16x128xbf16> to vector<128x128xbf16>
    %c1_24 = arith.constant 1 : index
    %c1_25 = arith.constant 1 : index
    %c0_26 = arith.constant 0 : index
    %c0_27 = arith.constant 0 : index
    %32 = vector.load %arg4[%c1_24, %c1_25, %c0_26, %c0_27] : memref<3x3x128x128xbf16, #tpu.memory_space<vmem>>, vector<1x1x128x128xbf16>
    %33 = vector.shape_cast %32 : vector<1x1x128x128xbf16> to vector<128x128xbf16>
    %cst_28 = arith.constant dense<0.000000e+00> : vector<128x128xf32>
    %34 = tpu.matmul %31, %33, %cst_28 {dimension_numbers = #tpu.dot_dimension_numbers<[1], [0], [0], [1], [0, 0, 1, 1], [], []>} : vector<128x128xbf16>, vector<128x128xbf16>, vector<128x128xf32> -> vector<128x128xf32>
    %35 = arith.addf %29, %34 : vector<128x128xf32>
    %36 = vector.extract_strided_slice %4 {offsets = [1, 2, 0], sizes = [8, 16, 128], strides = [1, 1, 1]} : vector<10x18x128xbf16> to vector<8x16x128xbf16>
    %37 = vector.shape_cast %36 : vector<8x16x128xbf16> to vector<128x128xbf16>
    %c1_29 = arith.constant 1 : index
    %c2_30 = arith.constant 2 : index
    %c0_31 = arith.constant 0 : index
    %c0_32 = arith.constant 0 : index
    %38 = vector.load %arg4[%c1_29, %c2_30, %c0_31, %c0_32] : memref<3x3x128x128xbf16, #tpu.memory_space<vmem>>, vector<1x1x128x128xbf16>
    %39 = vector.shape_cast %38 : vector<1x1x128x128xbf16> to vector<128x128xbf16>
    %cst_33 = arith.constant dense<0.000000e+00> : vector<128x128xf32>
    %40 = tpu.matmul %37, %39, %cst_33 {dimension_numbers = #tpu.dot_dimension_numbers<[1], [0], [0], [1], [0, 0, 1, 1], [], []>} : vector<128x128xbf16>, vector<128x128xbf16>, vector<128x128xf32> -> vector<128x128xf32>
    %41 = arith.addf %35, %40 : vector<128x128xf32>
    %42 = vector.extract_strided_slice %4 {offsets = [2, 0, 0], sizes = [8, 16, 128], strides = [1, 1, 1]} : vector<10x18x128xbf16> to vector<8x16x128xbf16>
    %43 = vector.shape_cast %42 : vector<8x16x128xbf16> to vector<128x128xbf16>
    %c2_34 = arith.constant 2 : index
    %c0_35 = arith.constant 0 : index
    %c0_36 = arith.constant 0 : index
    %c0_37 = arith.constant 0 : index
    %44 = vector.load %arg4[%c2_34, %c0_35, %c0_36, %c0_37] : memref<3x3x128x128xbf16, #tpu.memory_space<vmem>>, vector<1x1x128x128xbf16>
    %45 = vector.shape_cast %44 : vector<1x1x128x128xbf16> to vector<128x128xbf16>
    %cst_38 = arith.constant dense<0.000000e+00> : vector<128x128xf32>
    %46 = tpu.matmul %43, %45, %cst_38 {dimension_numbers = #tpu.dot_dimension_numbers<[1], [0], [0], [1], [0, 0, 1, 1], [], []>} : vector<128x128xbf16>, vector<128x128xbf16>, vector<128x128xf32> -> vector<128x128xf32>
    %47 = arith.addf %41, %46 : vector<128x128xf32>
    %48 = vector.extract_strided_slice %4 {offsets = [2, 1, 0], sizes = [8, 16, 128], strides = [1, 1, 1]} : vector<10x18x128xbf16> to vector<8x16x128xbf16>
    %49 = vector.shape_cast %48 : vector<8x16x128xbf16> to vector<128x128xbf16>
    %c2_39 = arith.constant 2 : index
    %c1_40 = arith.constant 1 : index
    %c0_41 = arith.constant 0 : index
    %c0_42 = arith.constant 0 : index
    %50 = vector.load %arg4[%c2_39, %c1_40, %c0_41, %c0_42] : memref<3x3x128x128xbf16, #tpu.memory_space<vmem>>, vector<1x1x128x128xbf16>
    %51 = vector.shape_cast %50 : vector<1x1x128x128xbf16> to vector<128x128xbf16>
    %cst_43 = arith.constant dense<0.000000e+00> : vector<128x128xf32>
    %52 = tpu.matmul %49, %51, %cst_43 {dimension_numbers = #tpu.dot_dimension_numbers<[1], [0], [0], [1], [0, 0, 1, 1], [], []>} : vector<128x128xbf16>, vector<128x128xbf16>, vector<128x128xf32> -> vector<128x128xf32>
    %53 = arith.addf %47, %52 : vector<128x128xf32>
    %54 = vector.extract_strided_slice %4 {offsets = [2, 2, 0], sizes = [8, 16, 128], strides = [1, 1, 1]} : vector<10x18x128xbf16> to vector<8x16x128xbf16>
    %55 = vector.shape_cast %54 : vector<8x16x128xbf16> to vector<128x128xbf16>
    %c2_44 = arith.constant 2 : index
    %c2_45 = arith.constant 2 : index
    %c0_46 = arith.constant 0 : index
    %c0_47 = arith.constant 0 : index
    %56 = vector.load %arg4[%c2_44, %c2_45, %c0_46, %c0_47] : memref<3x3x128x128xbf16, #tpu.memory_space<vmem>>, vector<1x1x128x128xbf16>
    %57 = vector.shape_cast %56 : vector<1x1x128x128xbf16> to vector<128x128xbf16>
    %cst_48 = arith.constant dense<0.000000e+00> : vector<128x128xf32>
    %58 = tpu.matmul %55, %57, %cst_48 {dimension_numbers = #tpu.dot_dimension_numbers<[1], [0], [0], [1], [0, 0, 1, 1], [], []>} : vector<128x128xbf16>, vector<128x128xbf16>, vector<128x128xf32> -> vector<128x128xf32>
    %59 = arith.addf %53, %58 : vector<128x128xf32>
    %c0_49 = arith.constant 0 : index
    %c0_50 = arith.constant 0 : index
    %60 = vector.load %arg8[%c0_49, %c0_50] : memref<128x128xf32, #tpu.memory_space<vmem>>, vector<128x128xf32>
    tpu.vector_store %arg8[%c0_49, %c0_50], %59 {strides = array<i32>} : memref<128x128xf32, #tpu.memory_space<vmem>>, vector<128x128xf32>,
    %c1_i32 = arith.constant 1 : i32
    %61 = arith.cmpi eq, %arg2, %c1_i32 : i32
    %62 = arith.extui %61 : i1 to i32
    %c0_i32_51 = arith.constant 0 : i32
    %63 = arith.cmpi ne, %62, %c0_i32_51 : i32
    scf.if %63 {
      %c0_52 = arith.constant 0 : index
      %c0_53 = arith.constant 0 : index
      %64 = vector.load %arg8[%c0_52, %c0_53] : memref<128x128xf32, #tpu.memory_space<vmem>>, vector<128x128xf32>
      %c0_54 = arith.constant 0 : index
      %c0_55 = arith.constant 0 : index
      %65 = vector.load %arg5[%c0_54, %c0_55] : memref<1x128xf32, #tpu.memory_space<vmem>>, vector<1x128xf32>
      %66 = vector.broadcast %65 : vector<1x128xf32> to vector<128x128xf32>
      %67 = arith.mulf %64, %66 : vector<128x128xf32>
      %c0_56 = arith.constant 0 : index
      %c0_57 = arith.constant 0 : index
      %68 = vector.load %arg6[%c0_56, %c0_57] : memref<1x128xf32, #tpu.memory_space<vmem>>, vector<1x128xf32>
      %69 = vector.broadcast %68 : vector<1x128xf32> to vector<128x128xf32>
      %70 = arith.addf %67, %69 : vector<128x128xf32>
      %cst_58 = arith.constant 0.000000e+00 : f32
      %71 = vector.broadcast %cst_58 : f32 to vector<128x128xf32>
      %72 = arith.cmpf ogt, %70, %71 : vector<128x128xf32>
      %cst_59 = arith.constant 0.00999999977 : f32
      %73 = vector.broadcast %cst_59 : f32 to vector<128x128xf32>
      %74 = arith.mulf %73, %70 : vector<128x128xf32>
      %75 = arith.select %72, %70, %74 : vector<128x128xi1>, vector<128x128xf32>
      %c0_60 = arith.constant 0 : index
      %c0_61 = arith.constant 0 : index
      %c0_62 = arith.constant 0 : index
      %c0_63 = arith.constant 0 : index
      %76 = vector.load %arg7[%c0_60, %c0_61, %c0_62, %c0_63] : memref<1x1x128x128xf32, #tpu.memory_space<vmem>>, vector<1x1x128x128xf32>
      %77 = vector.shape_cast %76 : vector<1x1x128x128xf32> to vector<128x128xf32>
      %78 = vector.shape_cast %75 : vector<128x128xf32> to vector<1x1x128x128xf32>
      tpu.vector_store %arg7[%c0_60, %c0_61, %c0_62, %c0_63], %78 {strides = array<i32>} : memref<1x1x128x128xf32, #tpu.memory_space<vmem>>, vector<1x1x128x128xf32>,
    } else {
    }
    return
  }
  func.func @transform_0(%arg0: i32, %arg1: i32, %arg2: i32) -> (i32, i32, i32, i32, i32) {
    %c0_i32 = arith.constant 0 : i32
    %c0_i32_0 = arith.constant 0 : i32
    %c0_i32_1 = arith.constant 0 : i32
    return %arg0, %arg1, %c0_i32, %c0_i32_0, %arg2 : i32, i32, i32, i32, i32
  }
  func.func @transform_1(%arg0: i32, %arg1: i32, %arg2: i32) -> (i32, i32, i32, i32) {
    %c0_i32 = arith.constant 0 : i32
    %c0_i32_0 = arith.constant 0 : i32
    %c0_i32_1 = arith.constant 0 : i32
    %c0_i32_2 = arith.constant 0 : i32
    return %c0_i32, %c0_i32_0, %arg2, %c0_i32_1 : i32, i32, i32, i32
  }
  func.func @transform_2(%arg0: i32, %arg1: i32, %arg2: i32) -> (i32, i32) {
    %c0_i32 = arith.constant 0 : i32
    %c0_i32_0 = arith.constant 0 : i32
    %c0_i32_1 = arith.constant 0 : i32
    return %c0_i32, %c0_i32_0 : i32, i32
  }
  func.func @transform_3(%arg0: i32, %arg1: i32, %arg2: i32) -> (i32, i32) {
    %c0_i32 = arith.constant 0 : i32
    %c0_i32_0 = arith.constant 0 : i32
    %c0_i32_1 = arith.constant 0 : i32
    return %c0_i32, %c0_i32_0 : i32, i32
  }
  func.func @transform_4(%arg0: i32, %arg1: i32, %arg2: i32) -> (i32, i32, i32, i32) {
    %c0_i32 = arith.constant 0 : i32
    %c0_i32_0 = arith.constant 0 : i32
    %c0_i32_1 = arith.constant 0 : i32
    return %arg0, %arg1, %c0_i32, %c0_i32_0 : i32, i32, i32, i32
  }
}

module attributes {stable_mosaic.version = 11 : i64} {
  func.func @kernel(%arg0: i32, %arg1: i32, %arg2: i32, %arg3: memref<1x1x10x18x128xbf16, #tpu.memory_space<vmem>>, %arg4: memref<3x3x128x128xbf16, #tpu.memory_space<vmem>>, %arg5: memref<1x128xf32, #tpu.memory_space<vmem>>, %arg6: memref<1x128xf32, #tpu.memory_space<vmem>>, %arg7: memref<1x1x128x128xf32, #tpu.memory_space<vmem>>, %arg8: memref<128x128xf32, #tpu.memory_space<vmem>>) attributes {dimension_semantics = [#tpu.dimension_semantics<parallel>, #tpu.dimension_semantics<parallel>, #tpu.dimension_semantics<arbitrary>], iteration_bounds = array<i64: 2, 2, 1>, scalar_prefetch = 0 : i64, scratch_operands = 1 : i64, tpu.core_type = #tpu.core_type<tc>, window_params = [{transform_indices = @transform_0, window_bounds = array<i64: 1, 1, 10, 18, 128>}, {transform_indices = @transform_1, window_bounds = array<i64: 3, 3, 128, 128>}, {pipeline_mode = #tpu.pipeline_mode<synchronous>, transform_indices = @transform_2, window_bounds = array<i64: 1, 128>}, {pipeline_mode = #tpu.pipeline_mode<synchronous>, transform_indices = @transform_3, window_bounds = array<i64: 1, 128>}, {transform_indices = @transform_4, window_bounds = array<i64: 1, 1, 128, 128>}]} {
    %c0_i32 = arith.constant 0 : i32
    %0 = arith.cmpi eq, %arg2, %c0_i32 : i32
    %1 = arith.extui %0 : i1 to i32
    %c0_i32_0 = arith.constant 0 : i32
    %2 = arith.cmpi ne, %1, %c0_i32_0 : i32
    scf.if %2 {
      %cst_53 = arith.constant 0.000000e+00 : f32
      %64 = vector.broadcast %cst_53 : f32 to vector<128x128xf32>
      %c0_54 = arith.constant 0 : index
      %c0_55 = arith.constant 0 : index
      %65 = vector.load %arg8[%c0_54, %c0_55] : memref<128x128xf32, #tpu.memory_space<vmem>>, vector<128x128xf32>
      tpu.vector_store %arg8[%c0_54, %c0_55], %64 {strides = array<i32>} : memref<128x128xf32, #tpu.memory_space<vmem>>, vector<128x128xf32>,
    } else {
    }
    %c0 = arith.constant 0 : index
    %c0_1 = arith.constant 0 : index
    %c0_2 = arith.constant 0 : index
    %c0_3 = arith.constant 0 : index
    %c0_4 = arith.constant 0 : index
    %3 = vector.load %arg3[%c0, %c0_1, %c0_2, %c0_3, %c0_4] : memref<1x1x10x18x128xbf16, #tpu.memory_space<vmem>>, vector<1x1x10x18x128xbf16>
    %4 = vector.shape_cast %3 : vector<1x1x10x18x128xbf16> to vector<10x18x128xbf16>
    %c0_5 = arith.constant 0 : index
    %c0_6 = arith.constant 0 : index
    %5 = vector.load %arg8[%c0_5, %c0_6] : memref<128x128xf32, #tpu.memory_space<vmem>>, vector<128x128xf32>
    %6 = vector.extract_strided_slice %4 {offsets = [0, 0, 0], sizes = [8, 16, 128], strides = [1, 1, 1]} : vector<10x18x128xbf16> to vector<8x16x128xbf16>
    %7 = vector.shape_cast %6 : vector<8x16x128xbf16> to vector<128x128xbf16>
    %c0_7 = arith.constant 0 : index
    %c0_8 = arith.constant 0 : index
    %c0_9 = arith.constant 0 : index
    %c0_10 = arith.constant 0 : index
    %8 = vector.load %arg4[%c0_7, %c0_8, %c0_9, %c0_10] : memref<3x3x128x128xbf16, #tpu.memory_space<vmem>>, vector<1x1x128x128xbf16>
    %9 = vector.shape_cast %8 : vector<1x1x128x128xbf16> to vector<128x128xbf16>
    %cst = arith.constant dense<0.000000e+00> : vector<128x128xf32>
    %10 = tpu.matmul %7, %9, %cst {dimension_numbers = #tpu.dot_dimension_numbers<[1], [0], [0], [1], [0, 0, 1, 1], [], []>} : vector<128x128xbf16>, vector<128x128xbf16>, vector<128x128xf32> -> vector<128x128xf32>
    %11 = arith.addf %5, %10 : vector<128x128xf32>
    %12 = vector.extract_strided_slice %4 {offsets = [0, 1, 0], sizes = [8, 16, 128], strides = [1, 1, 1]} : vector<10x18x128xbf16> to vector<8x16x128xbf16>
    %13 = vector.shape_cast %12 : vector<8x16x128xbf16> to vector<128x128xbf16>
    %c0_11 = arith.constant 0 : index
    %c1 = arith.constant 1 : index
    %c0_12 = arith.constant 0 : index
    %c0_13 = arith.constant 0 : index
    %14 = vector.load %arg4[%c0_11, %c1, %c0_12, %c0_13] : memref<3x3x128x128xbf16, #tpu.memory_space<vmem>>, vector<1x1x128x128xbf16>
    %15 = vector.shape_cast %14 : vector<1x1x128x128xbf16> to vector<128x128xbf16>
    %cst_14 = arith.constant dense<0.000000e+00> : vector<128x128xf32>
    %16 = tpu.matmul %13, %15, %cst_14 {dimension_numbers = #tpu.dot_dimension_numbers<[1], [0], [0], [1], [0, 0, 1, 1], [], []>} : vector<128x128xbf16>, vector<128x128xbf16>, vector<128x128xf32> -> vector<128x128xf32>
    %17 = arith.addf %11, %16 : vector<128x128xf32>
    %18 = vector.extract_strided_slice %4 {offsets = [0, 2, 0], sizes = [8, 16, 128], strides = [1, 1, 1]} : vector<10x18x128xbf16> to vector<8x16x128xbf16>
    %19 = vector.shape_cast %18 : vector<8x16x128xbf16> to vector<128x128xbf16>
    %c0_15 = arith.constant 0 : index
    %c2 = arith.constant 2 : index
    %c0_16 = arith.constant 0 : index
    %c0_17 = arith.constant 0 : index
    %20 = vector.load %arg4[%c0_15, %c2, %c0_16, %c0_17] : memref<3x3x128x128xbf16, #tpu.memory_space<vmem>>, vector<1x1x128x128xbf16>
    %21 = vector.shape_cast %20 : vector<1x1x128x128xbf16> to vector<128x128xbf16>
    %cst_18 = arith.constant dense<0.000000e+00> : vector<128x128xf32>
    %22 = tpu.matmul %19, %21, %cst_18 {dimension_numbers = #tpu.dot_dimension_numbers<[1], [0], [0], [1], [0, 0, 1, 1], [], []>} : vector<128x128xbf16>, vector<128x128xbf16>, vector<128x128xf32> -> vector<128x128xf32>
    %23 = arith.addf %17, %22 : vector<128x128xf32>
    %24 = vector.extract_strided_slice %4 {offsets = [1, 0, 0], sizes = [8, 16, 128], strides = [1, 1, 1]} : vector<10x18x128xbf16> to vector<8x16x128xbf16>
    %25 = vector.shape_cast %24 : vector<8x16x128xbf16> to vector<128x128xbf16>
    %c1_19 = arith.constant 1 : index
    %c0_20 = arith.constant 0 : index
    %c0_21 = arith.constant 0 : index
    %c0_22 = arith.constant 0 : index
    %26 = vector.load %arg4[%c1_19, %c0_20, %c0_21, %c0_22] : memref<3x3x128x128xbf16, #tpu.memory_space<vmem>>, vector<1x1x128x128xbf16>
    %27 = vector.shape_cast %26 : vector<1x1x128x128xbf16> to vector<128x128xbf16>
    %cst_23 = arith.constant dense<0.000000e+00> : vector<128x128xf32>
    %28 = tpu.matmul %25, %27, %cst_23 {dimension_numbers = #tpu.dot_dimension_numbers<[1], [0], [0], [1], [0, 0, 1, 1], [], []>} : vector<128x128xbf16>, vector<128x128xbf16>, vector<128x128xf32> -> vector<128x128xf32>
    %29 = arith.addf %23, %28 : vector<128x128xf32>
    %30 = vector.extract_strided_slice %4 {offsets = [1, 1, 0], sizes = [8, 16, 128], strides = [1, 1, 1]} : vector<10x18x128xbf16> to vector<8x16x128xbf16>
    %31 = vector.shape_cast %30 : vector<8x16x128xbf16> to vector<128x128xbf16>
    %c1_24 = arith.constant 1 : index
    %c1_25 = arith.constant 1 : index
    %c0_26 = arith.constant 0 : index
    %c0_27 = arith.constant 0 : index
    %32 = vector.load %arg4[%c1_24, %c1_25, %c0_26, %c0_27] : memref<3x3x128x128xbf16, #tpu.memory_space<vmem>>, vector<1x1x128x128xbf16>
    %33 = vector.shape_cast %32 : vector<1x1x128x128xbf16> to vector<128x128xbf16>
    %cst_28 = arith.constant dense<0.000000e+00> : vector<128x128xf32>
    %34 = tpu.matmul %31, %33, %cst_28 {dimension_numbers = #tpu.dot_dimension_numbers<[1], [0], [0], [1], [0, 0, 1, 1], [], []>} : vector<128x128xbf16>, vector<128x128xbf16>, vector<128x128xf32> -> vector<128x128xf32>
    %35 = arith.addf %29, %34 : vector<128x128xf32>
    %36 = vector.extract_strided_slice %4 {offsets = [1, 2, 0], sizes = [8, 16, 128], strides = [1, 1, 1]} : vector<10x18x128xbf16> to vector<8x16x128xbf16>
    %37 = vector.shape_cast %36 : vector<8x16x128xbf16> to vector<128x128xbf16>
    %c1_29 = arith.constant 1 : index
    %c2_30 = arith.constant 2 : index
    %c0_31 = arith.constant 0 : index
    %c0_32 = arith.constant 0 : index
    %38 = vector.load %arg4[%c1_29, %c2_30, %c0_31, %c0_32] : memref<3x3x128x128xbf16, #tpu.memory_space<vmem>>, vector<1x1x128x128xbf16>
    %39 = vector.shape_cast %38 : vector<1x1x128x128xbf16> to vector<128x128xbf16>
    %cst_33 = arith.constant dense<0.000000e+00> : vector<128x128xf32>
    %40 = tpu.matmul %37, %39, %cst_33 {dimension_numbers = #tpu.dot_dimension_numbers<[1], [0], [0], [1], [0, 0, 1, 1], [], []>} : vector<128x128xbf16>, vector<128x128xbf16>, vector<128x128xf32> -> vector<128x128xf32>
    %41 = arith.addf %35, %40 : vector<128x128xf32>
    %42 = vector.extract_strided_slice %4 {offsets = [2, 0, 0], sizes = [8, 16, 128], strides = [1, 1, 1]} : vector<10x18x128xbf16> to vector<8x16x128xbf16>
    %43 = vector.shape_cast %42 : vector<8x16x128xbf16> to vector<128x128xbf16>
    %c2_34 = arith.constant 2 : index
    %c0_35 = arith.constant 0 : index
    %c0_36 = arith.constant 0 : index
    %c0_37 = arith.constant 0 : index
    %44 = vector.load %arg4[%c2_34, %c0_35, %c0_36, %c0_37] : memref<3x3x128x128xbf16, #tpu.memory_space<vmem>>, vector<1x1x128x128xbf16>
    %45 = vector.shape_cast %44 : vector<1x1x128x128xbf16> to vector<128x128xbf16>
    %cst_38 = arith.constant dense<0.000000e+00> : vector<128x128xf32>
    %46 = tpu.matmul %43, %45, %cst_38 {dimension_numbers = #tpu.dot_dimension_numbers<[1], [0], [0], [1], [0, 0, 1, 1], [], []>} : vector<128x128xbf16>, vector<128x128xbf16>, vector<128x128xf32> -> vector<128x128xf32>
    %47 = arith.addf %41, %46 : vector<128x128xf32>
    %48 = vector.extract_strided_slice %4 {offsets = [2, 1, 0], sizes = [8, 16, 128], strides = [1, 1, 1]} : vector<10x18x128xbf16> to vector<8x16x128xbf16>
    %49 = vector.shape_cast %48 : vector<8x16x128xbf16> to vector<128x128xbf16>
    %c2_39 = arith.constant 2 : index
    %c1_40 = arith.constant 1 : index
    %c0_41 = arith.constant 0 : index
    %c0_42 = arith.constant 0 : index
    %50 = vector.load %arg4[%c2_39, %c1_40, %c0_41, %c0_42] : memref<3x3x128x128xbf16, #tpu.memory_space<vmem>>, vector<1x1x128x128xbf16>
    %51 = vector.shape_cast %50 : vector<1x1x128x128xbf16> to vector<128x128xbf16>
    %cst_43 = arith.constant dense<0.000000e+00> : vector<128x128xf32>
    %52 = tpu.matmul %49, %51, %cst_43 {dimension_numbers = #tpu.dot_dimension_numbers<[1], [0], [0], [1], [0, 0, 1, 1], [], []>} : vector<128x128xbf16>, vector<128x128xbf16>, vector<128x128xf32> -> vector<128x128xf32>
    %53 = arith.addf %47, %52 : vector<128x128xf32>
    %54 = vector.extract_strided_slice %4 {offsets = [2, 2, 0], sizes = [8, 16, 128], strides = [1, 1, 1]} : vector<10x18x128xbf16> to vector<8x16x128xbf16>
    %55 = vector.shape_cast %54 : vector<8x16x128xbf16> to vector<128x128xbf16>
    %c2_44 = arith.constant 2 : index
    %c2_45 = arith.constant 2 : index
    %c0_46 = arith.constant 0 : index
    %c0_47 = arith.constant 0 : index
    %56 = vector.load %arg4[%c2_44, %c2_45, %c0_46, %c0_47] : memref<3x3x128x128xbf16, #tpu.memory_space<vmem>>, vector<1x1x128x128xbf16>
    %57 = vector.shape_cast %56 : vector<1x1x128x128xbf16> to vector<128x128xbf16>
    %cst_48 = arith.constant dense<0.000000e+00> : vector<128x128xf32>
    %58 = tpu.matmul %55, %57, %cst_48 {dimension_numbers = #tpu.dot_dimension_numbers<[1], [0], [0], [1], [0, 0, 1, 1], [], []>} : vector<128x128xbf16>, vector<128x128xbf16>, vector<128x128xf32> -> vector<128x128xf32>
    %59 = arith.addf %53, %58 : vector<128x128xf32>
    %c0_49 = arith.constant 0 : index
    %c0_50 = arith.constant 0 : index
    %60 = vector.load %arg8[%c0_49, %c0_50] : memref<128x128xf32, #tpu.memory_space<vmem>>, vector<128x128xf32>
    tpu.vector_store %arg8[%c0_49, %c0_50], %59 {strides = array<i32>} : memref<128x128xf32, #tpu.memory_space<vmem>>, vector<128x128xf32>,
    %c0_i32_51 = arith.constant 0 : i32
    %61 = arith.cmpi eq, %arg2, %c0_i32_51 : i32
    %62 = arith.extui %61 : i1 to i32
    %c0_i32_52 = arith.constant 0 : i32
    %63 = arith.cmpi ne, %62, %c0_i32_52 : i32
    scf.if %63 {
      %c0_53 = arith.constant 0 : index
      %c0_54 = arith.constant 0 : index
      %64 = vector.load %arg8[%c0_53, %c0_54] : memref<128x128xf32, #tpu.memory_space<vmem>>, vector<128x128xf32>
      %c0_55 = arith.constant 0 : index
      %c0_56 = arith.constant 0 : index
      %65 = vector.load %arg5[%c0_55, %c0_56] : memref<1x128xf32, #tpu.memory_space<vmem>>, vector<1x128xf32>
      %66 = vector.broadcast %65 : vector<1x128xf32> to vector<128x128xf32>
      %67 = arith.mulf %64, %66 : vector<128x128xf32>
      %c0_57 = arith.constant 0 : index
      %c0_58 = arith.constant 0 : index
      %68 = vector.load %arg6[%c0_57, %c0_58] : memref<1x128xf32, #tpu.memory_space<vmem>>, vector<1x128xf32>
      %69 = vector.broadcast %68 : vector<1x128xf32> to vector<128x128xf32>
      %70 = arith.addf %67, %69 : vector<128x128xf32>
      %cst_59 = arith.constant 0.000000e+00 : f32
      %71 = vector.broadcast %cst_59 : f32 to vector<128x128xf32>
      %72 = arith.cmpf ogt, %70, %71 : vector<128x128xf32>
      %cst_60 = arith.constant 0.00999999977 : f32
      %73 = vector.broadcast %cst_60 : f32 to vector<128x128xf32>
      %74 = arith.mulf %73, %70 : vector<128x128xf32>
      %75 = arith.select %72, %70, %74 : vector<128x128xi1>, vector<128x128xf32>
      %c0_61 = arith.constant 0 : index
      %c0_62 = arith.constant 0 : index
      %c0_63 = arith.constant 0 : index
      %c0_64 = arith.constant 0 : index
      %76 = vector.load %arg7[%c0_61, %c0_62, %c0_63, %c0_64] : memref<1x1x128x128xf32, #tpu.memory_space<vmem>>, vector<1x1x128x128xf32>
      %77 = vector.shape_cast %76 : vector<1x1x128x128xf32> to vector<128x128xf32>
      %78 = vector.shape_cast %75 : vector<128x128xf32> to vector<1x1x128x128xf32>
      tpu.vector_store %arg7[%c0_61, %c0_62, %c0_63, %c0_64], %78 {strides = array<i32>} : memref<1x1x128x128xf32, #tpu.memory_space<vmem>>, vector<1x1x128x128xf32>,
    } else {
    }
    return
  }
  func.func @transform_0(%arg0: i32, %arg1: i32, %arg2: i32) -> (i32, i32, i32, i32, i32) {
    %c0_i32 = arith.constant 0 : i32
    %c0_i32_0 = arith.constant 0 : i32
    %c0_i32_1 = arith.constant 0 : i32
    return %arg0, %arg1, %c0_i32, %c0_i32_0, %arg2 : i32, i32, i32, i32, i32
  }
  func.func @transform_1(%arg0: i32, %arg1: i32, %arg2: i32) -> (i32, i32, i32, i32) {
    %c0_i32 = arith.constant 0 : i32
    %c0_i32_0 = arith.constant 0 : i32
    %c0_i32_1 = arith.constant 0 : i32
    %c0_i32_2 = arith.constant 0 : i32
    return %c0_i32, %c0_i32_0, %arg2, %c0_i32_1 : i32, i32, i32, i32
  }
  func.func @transform_2(%arg0: i32, %arg1: i32, %arg2: i32) -> (i32, i32) {
    %c0_i32 = arith.constant 0 : i32
    %c0_i32_0 = arith.constant 0 : i32
    %c0_i32_1 = arith.constant 0 : i32
    return %c0_i32, %c0_i32_0 : i32, i32
  }
  func.func @transform_3(%arg0: i32, %arg1: i32, %arg2: i32) -> (i32, i32) {
    %c0_i32 = arith.constant 0 : i32
    %c0_i32_0 = arith.constant 0 : i32
    %c0_i32_1 = arith.constant 0 : i32
    return %c0_i32, %c0_i32_0 : i32, i32
  }
  func.func @transform_4(%arg0: i32, %arg1: i32, %arg2: i32) -> (i32, i32, i32, i32) {
    %c0_i32 = arith.constant 0 : i32
    %c0_i32_0 = arith.constant 0 : i32
    %c0_i32_1 = arith.constant 0 : i32
    return %arg0, %arg1, %c0_i32, %c0_i32_0 : i32, i32, i32, i32
  }
}

</mosaic_0001>

<bundles_post_ra>
// kernel: _lambda_.5
= control target key start
LH: loop header
LB: loop body
LE: loop exit
PB: predicated region body
PF: predicated region fallthrough
CT: control target
= control target key end

     0   :  { %s482_s9 = smov 0   ;;  %s484_s10 = smov 0   ;;  %s539_s0 = inlined_call_operand.vmem [shape: f32[16,8], index: 0, kind: input, shape index: {}]   ;;  %s540_s1 = inlined_call_operand.vmem [shape: f32[2,16,8,192], index: 1, kind: input, shape index: {}]   ;;  %s541_s2 = inlined_call_operand.vmem [shape: f32[2,16,16,192], index: 2, kind: output, shape index: {}]  }
   0x1   :  { %s486_s11 = smov 0   ;;  %s488_s12 = smov 0  }
   0x2   :  { %s490_s13 = smov 0  }
   0x3 LB: > { %s21_s14 = sadd.s32 1, %s456_s11  ;;  %s24_s15 = sadd.s32 1, %s460_s12  ;;  %s464_s13 = sphi %s490_s13, %s12_s13   ;;  %s460_s12 = sphi %s488_s12, %s545_s12   ;;  %s456_s11 = sphi %s486_s11, %s544_s11   ;;  %s452_s10 = sphi %s484_s10, %s543_s10   ;;  %s448_s9 = sphi %s482_s9, %s542_s9  }
   0x4   : > { %p22_p0 = scmp.ge.s32.totalorder %s21_s14, 16  ;;  %p372_p1 = scmp.ge.s32.totalorder %s464_s13, 1 }
   0x5   : > { %p132_p2 = scmp.lt.s32.totalorder %s464_s13, 33 }
   0x6   : > { %s547_s14 = smov (%p22_p0, %s21_s14), 0  ;;  %s549_s15 = smov (!%p22_p0, %s24_s15), %s460_s12 }
   0x7   : > { %p133_p3 = pnand %p372_p1, %p132_p2  ;;  %p26_p4 = scmp.ge.s32.totalorder %s549_s15, 2 }
   0x8   : > { %p162_p5 = scmp.lt.s32.totalorder (!%p133_p3), %s452_s10, 1  ;;  %p164_p6 = scmp.lt.s32.totalorder (!%p133_p3), %s448_s9, 15  ;;  %v466_v0 = vmov (!%p133_p3), 0.0   ;;  %v180_v1 = vld [vmem:[%s539_s0] sm:$0xff] (!%p133_p3)  ;;  %vm184_vm0 = vcmask (!%p133_p3), 64512   ;;  %v181_v4 = vld [vmem:[%s539_s0 + $0x8] sm:$0xff] (!%p133_p3) }
   0x9   : > { %s551_s15 = smov (%p26_p4, %s549_s15), 0  ;;  %136 = sbr.rel (%p133_p3) target bundleno = 239 (0xef), region = 28 }
   0xa   : > { %255 = vmatprep.mubr.f32.mxu0 (!%p133_p3), %v466_v0  ;;  %261 = vmatprep.mubr.f32.mxu1 (!%p133_p3), %v466_v0  ;;  %vm269_vm1 = vcmask (!%p133_p3), 523264  }
  0x10   : > { %s553_s10 = smov (!%p162_p5, %s452_s10), 1  ;;  %s555_s9 = smov (!%p164_p6, %s448_s9), 15 }
  0x11   : > { %s374_s16 = sshll.u32 %s553_s10, 5  ;;  %s377_s17 = sshll.u32 %s553_s10, 6 }
  0x12   : > { %s373_s18 = sshll.u32 %s555_s9, 1  ;;  %s376_s19 = sshll.u32 %s555_s9, 2 }
  0x13   : > { %s168_s20 = sadd.s32 %s374_s16, %s373_s18  ;;  %s177_s21 = sadd.s32 %s377_s17, %s376_s19 }
  0x14   : > { %s375_s22 = sshll.u32 %s168_s20, 3  ;;  %s378_s30 = sshll.u32 %s177_s21, 3 }
  0x15   : > { %s170_s25 = scalar_lea.vmem %s540_s1, %s375_s22  ;;  %s179_s5 = scalar_lea.vmem %s541_s2, %s378_s30 }
  0x16   : > { %v183_v2 = vld [vmem:[%s170_s25 + $0x8] sm:$0xff]  ;;  %v182_v3 = vld [vmem:[%s170_s25] sm:$0xff] }
  0x17   : > { %191 = vmatprep.subr.mxu0 %v183_v2  ;;  %383 = vmatprep.subr.mxu1 %v183_v2 }
  0x18   : > { %192 = vmatpush1.msra.mxu0 %v182_v3  ;;  %384 = vmatpush1.msra.mxu1 %v182_v3 }
  0x19   : > { %379 = vmatmul.mubr.msk.f32.vlgmr.msra.gmra.mrb[0].mxu0 %vm184_vm0, %v180_v1  ;;  %380 = vmatmul.mubr.msk.f32.vlgmr.msra.gmra.mrb[0].mxu1 %vm184_vm0, %v181_v4 }
  0xec   : > { %v257_v5 = vpop.f32.mrb[0].mxu0  ;;  %v263_v6 = vpop.f32.mrb[0].mxu1 }
  0xed   : > { %268 = vst [vmem:[%s179_s5] sm:$0xff] %v257_v5  ;;  %271 = vst [vmem:[%s179_s5 + $0x10] sm:$0xff] %v263_v6  ;;  %v259_v7 = vpop.f32.mrb[1].mxu0  ;;  %v265_v8 = vpop.f32.mrb[1].mxu1 }
  0xee   : > { %270 = vst.msk [vmem:[%s179_s5 + $0x8] sm:$0xff] %vm269_vm1, %v259_v7  ;;  %272 = vst.msk [vmem:[%s179_s5 + $0x18] sm:$0xff] %vm269_vm1, %v265_v8 }
  0xef PF: > { %s12_s13 = sadd.s32 1, %s464_s13   ;;  %s542_s9 = smov %s456_s11 }
  0xf0   : > { %p9_p7 = scmp.ge.s32.totalorder %s12_s13, 34   ;;  %s543_s10 = smov %s460_s12 }
  0xf1   : > { %s544_s11 = smov %s547_s14  ;;  %s545_s12 = smov %s551_s15 }
  0xf2   :  { %11 = sbr.rel (!%p9_p7) target bundleno = 3 (0x3), region = 58 }

// kernel: _lambda_.4
= control target key start
LH: loop header
LB: loop body
LE: loop exit
PB: predicated region body
PF: predicated region fallthrough
CT: control target
= control target key end

     0   :  { %s762_s9 = smov 0   ;;  %s841_s0 = inlined_call_operand.vmem [shape: f32[16,8], index: 0, kind: input, shape index: {}]   ;;  %s842_s1 = inlined_call_operand.vmem [shape: f32[2,8,1536], index: 1, kind: input, shape index: {}]   ;;  %s843_s2 = inlined_call_operand.vmem [shape: f32[2,16,1536], index: 2, kind: output, shape index: {}]  }
   0x1 LB: > { %s706_s10 = sadd.s32 4294967295, %s744_s9   ;;  %p710_p0 = scmp.ge.s32.totalorder %s744_s9, 1  ;;  %s744_s9 = sphi %s762_s9, %s12_s9  }
   0x2   : > { %p112_p1 = scmp.lt.s32.totalorder %s744_s9, 3 }
   0x4   : > { %p113_p2 = pnand %p710_p0, %p112_p1 }
   0x5   : > { %p134_p3 = scmp.lt.s32.totalorder (!%p113_p2), %s706_s10, 1  ;;  %v746_v0 = vmov (!%p113_p2), 0.0   ;;  %v144_v1 = vld [vmem:[%s841_s0] sm:$0xff] (!%p113_p2)  ;;  %vm158_vm0 = vcmask (!%p113_p2), 64512   ;;  %v145_v10 = vld [vmem:[%s841_s0 + $0x8] sm:$0xff] (!%p113_p2) }
   0x6   : > { %116 = sbr.rel (%p113_p2) target bundleno = 254 (0xfe), region = 28  ;;  %229 = vmatprep.mubr.f32.mxu0 (!%p113_p2), %v746_v0  ;;  %306 = vmatprep.mubr.f32.mxu1 (!%p113_p2), %v746_v0 }
   0xd   : > { %s845_s10 = smov (!%p134_p3, %s706_s10), 1 }
   0xe   : > { %s727_s11 = smul.u32 96, %s845_s10 }
   0xf   : > { %s728_s19 = smul.u32 192, %s845_s10 }
  0x10   : > { %s776_s14 = scalar_lea.vmem %s842_s1, %s727_s11 }
  0x11   : > { %v147_v2 = vld [vmem:[%s776_s14 + $0x8] sm:$0xff]  ;;  %v149_v3 = vld [vmem:[%s776_s14 + $0x18] sm:$0xff]  ;;  %v146_v4 = vld [vmem:[%s776_s14] sm:$0xff]  ;;  %s812_s22 = scalar_lea.vmem %s843_s2, %s728_s19 }
  0x12   : > { %165 = vmatprep.subr.mxu0 %v147_v2  ;;  %242 = vmatprep.subr.mxu1 %v149_v3  ;;  %v148_v5 = vld [vmem:[%s776_s14 + $0x10] sm:$0xff]  ;;  %v151_v6 = vld [vmem:[%s776_s14 + $0x28] sm:$0xff]  ;;  %v153_v7 = vld [vmem:[%s776_s14 + $0x38] sm:$0xff] }
  0x13   : > { %166 = vmatpush1.msra.mxu0 %v146_v4  ;;  %243 = vmatpush1.msra.mxu1 %v148_v5  ;;  %v150_v8 = vld [vmem:[%s776_s14 + $0x20] sm:$0xff]  ;;  %v152_v9 = vld [vmem:[%s776_s14 + $0x30] sm:$0xff]  ;;  %v155_v11 = vld [vmem:[%s776_s14 + $0x48] sm:$0xff] }
  0x14   : > { %713 = vmatmul.mubr.msk.f32.vlgmr.msra.gmra.mrb[0].mxu0 %vm158_vm0, %v144_v1  ;;  %715 = vmatmul.mubr.msk.f32.vlgmr.msra.gmra.mrb[0].mxu1 %vm158_vm0, %v144_v1  ;;  %v157_v12 = vld [vmem:[%s776_s14 + $0x58] sm:$0xff]  ;;  %v154_v13 = vld [vmem:[%s776_s14 + $0x40] sm:$0xff]  ;;  %v156_v14 = vld [vmem:[%s776_s14 + $0x50] sm:$0xff] }
  0x15   : > { %319 = vmatprep.subr.mxu0 %v151_v6  ;;  %396 = vmatprep.subr.mxu1 %v153_v7 }
  0x16   : > { %320 = vmatpush1.msra.mxu0 %v150_v8  ;;  %397 = vmatpush1.msra.mxu1 %v152_v9 }
  0x17   : > { %235 = vmatprep.mubr.f32.mxu0 %v746_v0  ;;  %312 = vmatprep.mubr.f32.mxu1 %v746_v0 }
  0x18   : > { %714 = vmatmul.mubr.msk.f32.gmra.mrb[2].mxu0 %vm158_vm0, %v145_v10  ;;  %716 = vmatmul.mubr.msk.f32.gmra.mrb[2].mxu1 %vm158_vm0, %v145_v10 }
  0x19   : > { %383 = vmatprep.mubr.f32.mxu0 %v746_v0  ;;  %460 = vmatprep.mubr.f32.mxu1 %v746_v0 }
  0x1a   : > { %473 = vmatprep.subr.mxu0 %v155_v11  ;;  %550 = vmatprep.subr.mxu1 %v157_v12 }
  0x1c   : > { %717 = vmatmul.mubr.msk.f32.vlgmr.msra.gmra.mrb[4].mxu0 %vm158_vm0, %v144_v1  ;;  %719 = vmatmul.mubr.msk.f32.vlgmr.msra.gmra.mrb[4].mxu1 %vm158_vm0, %v144_v1 }
  0x1d   : > { %474 = vmatpush1.msra.mxu0 %v154_v13  ;;  %551 = vmatpush1.msra.mxu1 %v156_v14 }
  0x1e   : > { %389 = vmatprep.mubr.f32.mxu0 %v746_v0  ;;  %466 = vmatprep.mubr.f32.mxu1 %v746_v0 }
  0x20   : > { %718 = vmatmul.mubr.msk.f32.gmra.mrb[6].mxu0 %vm158_vm0, %v145_v10  ;;  %720 = vmatmul.mubr.msk.f32.gmra.mrb[6].mxu1 %vm158_vm0, %v145_v10 }
  0x21   : > { %537 = vmatprep.mubr.f32.mxu0 %v746_v0  ;;  %614 = vmatprep.mubr.f32.mxu1 %v746_v0 }
  0x24   : > { %721 = vmatmul.mubr.msk.f32.vlgmr.msra.gmra.mrb[8].mxu0 %vm158_vm0, %v144_v1  ;;  %723 = vmatmul.mubr.msk.f32.vlgmr.msra.gmra.mrb[8].mxu1 %vm158_vm0, %v144_v1 }
  0x25   : > { %543 = vmatprep.mubr.f32.mxu0 %v746_v0  ;;  %620 = vmatprep.mubr.f32.mxu1 %v746_v0 }
  0x28   : > { %722 = vmatmul.mubr.msk.f32.gmra.mrb[10].mxu0 %vm158_vm0, %v145_v10  ;;  %724 = vmatmul.mubr.msk.f32.gmra.mrb[10].mxu1 %vm158_vm0, %v145_v10 }
  0xe7   : > { %v231_v15 = vpop.f32.mrb[0].mxu0  ;;  %v308_v16 = vpop.f32.mrb[0].mxu1 }
  0xe8   : > { %627 = vst [vmem:[%s812_s22] sm:$0xff] %v231_v15  ;;  %629 = vst [vmem:[%s812_s22 + $0x10] sm:$0xff] %v308_v16  ;;  %v233_v17 = vpop.f32.mrb[1].mxu0  ;;  %v310_v18 = vpop.f32.mrb[1].mxu1 }
  0xe9   : > { %628 = vst [vmem:[%s812_s22 + $0x8] sm:$0xff] %v233_v17  ;;  %630 = vst [vmem:[%s812_s22 + $0x18] sm:$0xff] %v310_v18 }
  0xeb   : > { %v237_v19 = vpop.f32.mrb[2].mxu0  ;;  %v314_v20 = vpop.f32.mrb[2].mxu1 }
  0xec   : > { %639 = vst [vmem:[%s812_s22 + $0x60] sm:$0xff] %v237_v19  ;;  %641 = vst [vmem:[%s812_s22 + $0x70] sm:$0xff] %v314_v20  ;;  %v239_v21 = vpop.f32.mrb[3].mxu0  ;;  %v316_v22 = vpop.f32.mrb[3].mxu1 }
  0xed   : > { %640 = vst [vmem:[%s812_s22 + $0x68] sm:$0xff] %v239_v21  ;;  %642 = vst [vmem:[%s812_s22 + $0x78] sm:$0xff] %v316_v22 }
  0xef   : > { %v385_v23 = vpop.f32.mrb[4].mxu0  ;;  %v462_v24 = vpop.f32.mrb[4].mxu1 }
  0xf0   : > { %631 = vst [vmem:[%s812_s22 + $0x20] sm:$0xff] %v385_v23  ;;  %633 = vst [vmem:[%s812_s22 + $0x30] sm:$0xff] %v462_v24  ;;  %v387_v25 = vpop.f32.mrb[5].mxu0  ;;  %v464_v26 = vpop.f32.mrb[5].mxu1 }
  0xf1   : > { %632 = vst [vmem:[%s812_s22 + $0x28] sm:$0xff] %v387_v25  ;;  %634 = vst [vmem:[%s812_s22 + $0x38] sm:$0xff] %v464_v26 }
  0xf3   : > { %v391_v27 = vpop.f32.mrb[6].mxu0  ;;  %v468_v28 = vpop.f32.mrb[6].mxu1 }
  0xf4   : > { %643 = vst [vmem:[%s812_s22 + $0x80] sm:$0xff] %v391_v27  ;;  %645 = vst [vmem:[%s812_s22 + $0x90] sm:$0xff] %v468_v28  ;;  %v393_v29 = vpop.f32.mrb[7].mxu0  ;;  %v470_v30 = vpop.f32.mrb[7].mxu1 }
  0xf5   : > { %644 = vst [vmem:[%s812_s22 + $0x88] sm:$0xff] %v393_v29  ;;  %646 = vst [vmem:[%s812_s22 + $0x98] sm:$0xff] %v470_v30 }
  0xf7   : > { %v539_v31 = vpop.f32.mrb[8].mxu0  ;;  %v616_v32 = vpop.f32.mrb[8].mxu1 }
  0xf8   : > { %635 = vst [vmem:[%s812_s22 + $0x40] sm:$0xff] %v539_v31  ;;  %637 = vst [vmem:[%s812_s22 + $0x50] sm:$0xff] %v616_v32  ;;  %v541_v33 = vpop.f32.mrb[9].mxu0  ;;  %v618_v34 = vpop.f32.mrb[9].mxu1 }
  0xf9   : > { %636 = vst [vmem:[%s812_s22 + $0x48] sm:$0xff] %v541_v33  ;;  %638 = vst [vmem:[%s812_s22 + $0x58] sm:$0xff] %v618_v34 }
  0xfb   : > { %v545_v35 = vpop.f32.mrb[10].mxu0  ;;  %v622_v36 = vpop.f32.mrb[10].mxu1 }
  0xfc   : > { %647 = vst [vmem:[%s812_s22 + $0xa0] sm:$0xff] %v545_v35  ;;  %649 = vst [vmem:[%s812_s22 + $0xb0] sm:$0xff] %v622_v36  ;;  %v547_v37 = vpop.f32.mrb[11].mxu0  ;;  %v624_v38 = vpop.f32.mrb[11].mxu1 }
  0xfd   : > { %648 = vst [vmem:[%s812_s22 + $0xa8] sm:$0xff] %v547_v37  ;;  %650 = vst [vmem:[%s812_s22 + $0xb8] sm:$0xff] %v624_v38 }
  0xfe PF: > { %s12_s9 = sadd.s32 1, %s744_s9  }
  0xff   : > { %p9_p4 = scmp.ge.s32.totalorder %s12_s9, 4  }
 0x101   :  { %11 = sbr.rel (!%p9_p4) target bundleno = 1 (0x1), region = 58 }

// kernel: _lambda_.6
= control target key start
LH: loop header
LB: loop body
LE: loop exit
PB: predicated region body
PF: predicated region fallthrough
CT: control target
= control target key end

     0   :  { %s5508_s0 = inlined_call_operand.vmem [shape: bf16[2,2,10,18,256], index: 0, kind: input, shape index: {}]   ;;  %s5509_s1 = inlined_call_operand.vmem [shape: bf16[3,3,256,128], index: 1, kind: input, shape index: {}]   ;;  %s5510_s2 = inlined_call_operand.vmem [shape: f32[1,128], index: 2, kind: input, shape index: {}]   ;;  %s5511_s3 = inlined_call_operand.vmem [shape: f32[1,128], index: 3, kind: input, shape index: {}]   ;;  %s5512_s4 = inlined_call_operand.vmem [shape: f32[2,2,128,128], index: 4, kind: output, shape index: {}]  }
   0x1   :  { %5525 = sst [smem:[#allocation12_spill]] %s5508_s0 }
   0x2   :  { %s4568_s15 = smov 0   ;;  %s4570_s16 = smov 0  }
   0x3   :  { %s4572_s17 = smov 0   ;;  %s4574_s18 = smov 0  }
   0x4   :  { %s4576_s19 = smov 0   ;;  %s4578_s20 = smov 0  }
   0x5   :  { %s4580_s21 = smov 0   ;;  %s4582_s22 = smov 0  }
   0x6   :  { %s4584_s23 = smov 0   ;;  %s4586_s24 = smov 0  }
   0x7   :  { %s4588_s25 = smov 0  }
   0x8 LB: > { %s26_s26 = sadd.s32 1, %s4528_s22  ;;  %s29_s27 = sadd.s32 1, %s4532_s23  ;;  %s4540_s25 = sphi %s4588_s25, %s14_s25   ;;  %s4536_s24 = sphi %s4586_s24, %s5560_s24   ;;  %s4532_s23 = sphi %s4584_s23, %s5559_s23   ;;  %s4528_s22 = sphi %s4582_s22, %s5558_s22   ;;  %s4524_s21 = sphi %s4580_s21, %s5557_s21   ;;  %s4520_s20 = sphi %s4578_s20, %s5556_s20   ;;  %s4516_s19 = sphi %s4576_s19, %s5555_s19   ;;  %s4512_s18 = sphi %s4574_s18, %s5554_s18   ;;  %s4508_s17 = sphi %s4572_s17, %s5553_s17   ;;  %s4504_s16 = sphi %s4570_s16, %s5552_s16   ;;  %s4500_s15 = sphi %s4568_s15, %s5551_s15  }
   0x9   : > { %p27_p0 = scmp.ge.s32.totalorder %s26_s26, 2  ;;  %s33_s28 = sadd.s32 1, %s4536_s24 }
   0xa   : > { %p51_p1 = scmp.ne.s32.totalorder %s4512_s18, %s4508_s17  ;;  %p52_p2 = scmp.eq.s32.totalorder %s4540_s25, 0 }
   0xb   : > { %s5562_s26 = smov (%p27_p0, %s26_s26), 0  ;;  %s5564_s27 = smov (!%p27_p0, %s29_s27), %s4532_s23 }
   0xc   : > { %s40_s29 = ssub.s32 %s4528_s22, %s5562_s26  ;;  %p31_p3 = scmp.ge.s32.totalorder %s5564_s27, 2 }
   0xd   : > { %p68_p4 = scmp.eq.s32.totalorder %s40_s29, 0  ;;  %p4634_p5 = por %p52_p2, %p51_p1 }
   0xe   : > { %s70_s5 = sadd.s32 1, %s4504_s16  ;;  %s5566_s27 = smov (%p31_p3, %s5564_s27), 0 }
   0xf   : > { %5527 = sst [smem:[#allocation5_spill]] %s5566_s27  ;;  %s5568_s28 = smov (!%p31_p3, %s33_s28), %s4536_s24 }
  0x10   : > { %p77_p6 = scmp.ne.s32.totalorder %s4504_s16, %s4500_s15  ;;  %p35_p7 = scmp.ge.s32.totalorder %s5568_s28, 2 }
  0x11   : > { %s38_s6 = ssub.s32 %s4532_s23, %s5566_s27  ;;  %s44_s12 = sadd.s32 1, %s4512_s18 }
  0x12   : > { %s4647_s7 = scalar_select %p68_p4, %s4504_s16, %s70_s5  }
  0x13   : > { %s5570_s28 = smov (%p35_p7, %s5568_s28), 0  ;;  %p4651_p8 = por %p77_p6, %p52_p2 }
  0x14   : > { %5528 = sst [smem:[#allocation6_spill]] %s5570_s28  ;;  %s37_s9 = ssub.s32 %s4536_s24, %s5570_s28 }
  0x15   : > { %s39_s10 = sor.u32 %s38_s6, %s37_s9  ;;  %p3430_p10 = scmp.ge.s32.totalorder %s4540_s25, 8 }
  0x16   : > { %s41_s11 = sor.u32 %s40_s29, %s39_s10 }
  0x17   : > { %p42_p9 = scmp.eq.s32.totalorder %s41_s11, 0  ;;  %179 = sbr.rel (%p3430_p10) target bundleno = 100 (0x64), region = 24 }
  0x19   : > { %s4659_s13 = scalar_select %p42_p9, %s4512_s18, %s44_s12  }
  0x1e   : > { %182 = sbr.rel (!%p4634_p5) target bundleno = 59 (0x3b), region = 28  ;;  %s184_s14 = sand.u32 (%p4634_p5), 1, %s4512_s18  }
  0x1f   : > { %s4278_s5 = smul.u32 (%p4634_p5), 60, %s4532_s23  ;;  %s5530_s0 = sld [smem:[#allocation12_spill]] (%p4634_p5) }
  0x20   : > { %s4277_s27 = smul.u32 (%p4634_p5), 120, %s184_s14 }
  0x21   : > { %s188_s28 = sadd.s32 (%p4634_p5), %s4528_s22, %s4278_s5  ;;  %s4279_s6 = smul.u32 (%p4634_p5), 120, %s4536_s24 }
  0x22   : > { %s4676_s30 = scalar_lea.vmem (%p4634_p5), [#allocation3], %s4277_s27 }
  0x23   : > { %s190_s29 = sadd.s32 (%p4634_p5), %s4279_s6, %s188_s28 }
  0x24   : > { %s3431_s9 = sshll.u32 (%p4634_p5), %s190_s29, 2 }
  0x25   : > { %s4671_s12 = scalar_lea.vmem %s5530_s0, %s3431_s9 }
  0x26   : > { %v208_v0 = vld [vmem:[%s4671_s12] sm:$0xf]  ;;  %v210_v1 = vld [vmem:[%s4671_s12 + $0x8] sm:$0xf]  ;;  %v212_v2 = vld [vmem:[%s4671_s12 + $0x10] sm:$0xf] }
  0x27   : > { %209 = vst [vmem:[%s4676_s30] sm:$0xf] %v208_v0  ;;  %211 = vst [vmem:[%s4676_s30 + $0x4] sm:$0xf] %v210_v1  ;;  %v214_v3 = vld [vmem:[%s4671_s12 + $0x18] sm:$0xf] }
  0x28   : > { %213 = vst [vmem:[%s4676_s30 + $0x8] sm:$0xf] %v212_v2  ;;  %v216_v4 = vld [vmem:[%s4671_s12 + $0x20] sm:$0xf]  ;;  %v218_v5 = vld [vmem:[%s4671_s12 + $0x28] sm:$0xf] }
  0x29   : > { %215 = vst [vmem:[%s4676_s30 + $0xc] sm:$0xf] %v214_v3  ;;  %217 = vst [vmem:[%s4676_s30 + $0x10] sm:$0xf] %v216_v4  ;;  %v220_v6 = vld [vmem:[%s4671_s12 + $0x30] sm:$0xf] }
  0x2a   : > { %219 = vst [vmem:[%s4676_s30 + $0x14] sm:$0xf] %v218_v5  ;;  %v222_v7 = vld [vmem:[%s4671_s12 + $0x38] sm:$0xf]  ;;  %v224_v8 = vld [vmem:[%s4671_s12 + $0x40] sm:$0xf] }
  0x2b   : > { %221 = vst [vmem:[%s4676_s30 + $0x18] sm:$0xf] %v220_v6  ;;  %223 = vst [vmem:[%s4676_s30 + $0x1c] sm:$0xf] %v222_v7  ;;  %v226_v9 = vld [vmem:[%s4671_s12 + $0x48] sm:$0xf] }
  0x2c   : > { %225 = vst [vmem:[%s4676_s30 + $0x20] sm:$0xf] %v224_v8  ;;  %v228_v10 = vld [vmem:[%s4671_s12 + $0x50] sm:$0xf]  ;;  %v230_v11 = vld [vmem:[%s4671_s12 + $0x58] sm:$0xf] }
  0x2d   : > { %227 = vst [vmem:[%s4676_s30 + $0x24] sm:$0xf] %v226_v9  ;;  %229 = vst [vmem:[%s4676_s30 + $0x28] sm:$0xf] %v228_v10  ;;  %v232_v12 = vld [vmem:[%s4671_s12 + $0x60] sm:$0xf] }
  0x2e   : > { %231 = vst [vmem:[%s4676_s30 + $0x2c] sm:$0xf] %v230_v11  ;;  %v234_v13 = vld [vmem:[%s4671_s12 + $0x68] sm:$0xf]  ;;  %v236_v14 = vld [vmem:[%s4671_s12 + $0x70] sm:$0xf] }
  0x2f   : > { %233 = vst [vmem:[%s4676_s30 + $0x30] sm:$0xf] %v232_v12  ;;  %235 = vst [vmem:[%s4676_s30 + $0x34] sm:$0xf] %v234_v13  ;;  %v238_v15 = vld [vmem:[%s4671_s12 + $0x78] sm:$0xf] }
  0x30   : > { %237 = vst [vmem:[%s4676_s30 + $0x38] sm:$0xf] %v236_v14  ;;  %v240_v16 = vld [vmem:[%s4671_s12 + $0x80] sm:$0xf]  ;;  %v242_v17 = vld [vmem:[%s4671_s12 + $0x88] sm:$0xf] }
  0x31   : > { %239 = vst [vmem:[%s4676_s30 + $0x3c] sm:$0xf] %v238_v15  ;;  %241 = vst [vmem:[%s4676_s30 + $0x40] sm:$0xf] %v240_v16  ;;  %v244_v18 = vld [vmem:[%s4671_s12 + $0x90] sm:$0xf] }
  0x32   : > { %243 = vst [vmem:[%s4676_s30 + $0x44] sm:$0xf] %v242_v17  ;;  %v246_v19 = vld [vmem:[%s4671_s12 + $0x98] sm:$0xf]  ;;  %v248_v20 = vld [vmem:[%s4671_s12 + $0xa0] sm:$0xf] }
  0x33   : > { %245 = vst [vmem:[%s4676_s30 + $0x48] sm:$0xf] %v244_v18  ;;  %247 = vst [vmem:[%s4676_s30 + $0x4c] sm:$0xf] %v246_v19  ;;  %v250_v21 = vld [vmem:[%s4671_s12 + $0xa8] sm:$0xf] }
  0x34   : > { %249 = vst [vmem:[%s4676_s30 + $0x50] sm:$0xf] %v248_v20  ;;  %v252_v22 = vld [vmem:[%s4671_s12 + $0xb0] sm:$0xf]  ;;  %v254_v23 = vld [vmem:[%s4671_s12 + $0xb8] sm:$0xf] }
  0x35   : > { %251 = vst [vmem:[%s4676_s30 + $0x54] sm:$0xf] %v250_v21  ;;  %253 = vst [vmem:[%s4676_s30 + $0x58] sm:$0xf] %v252_v22  ;;  %v256_v24 = vld [vmem:[%s4671_s12 + $0xc0] sm:$0xf] }
  0x36   : > { %255 = vst [vmem:[%s4676_s30 + $0x5c] sm:$0xf] %v254_v23  ;;  %v258_v25 = vld [vmem:[%s4671_s12 + $0xc8] sm:$0xf]  ;;  %v260_v26 = vld [vmem:[%s4671_s12 + $0xd0] sm:$0xf] }
  0x37   : > { %257 = vst [vmem:[%s4676_s30 + $0x60] sm:$0xf] %v256_v24  ;;  %259 = vst [vmem:[%s4676_s30 + $0x64] sm:$0xf] %v258_v25  ;;  %v262_v27 = vld [vmem:[%s4671_s12 + $0xd8] sm:$0xf] }
  0x38   : > { %261 = vst [vmem:[%s4676_s30 + $0x68] sm:$0xf] %v260_v26  ;;  %v264_v28 = vld [vmem:[%s4671_s12 + $0xe0] sm:$0xf]  ;;  %v266_v29 = vld [vmem:[%s4671_s12 + $0xe8] sm:$0xf] }
  0x39   : > { %263 = vst [vmem:[%s4676_s30 + $0x6c] sm:$0xf] %v262_v27  ;;  %265 = vst [vmem:[%s4676_s30 + $0x70] sm:$0xf] %v264_v28 }
  0x3a   : > { %267 = vst [vmem:[%s4676_s30 + $0x74] sm:$0xf] %v266_v29 }
  0x3b PF: > { %350 = sbr.rel (!%p4651_p8) target bundleno = 100 (0x64), region = 69  ;;  %s352_s27 = sand.u32 (%p4651_p8), 1, %s4504_s16  }
  0x3c   : > { %s3684_s28 = sshll.u32 (%p4651_p8), %s4528_s22, 6  ;;  %s4280_s14 = smul.u32 (%p4651_p8), 576, %s352_s27 }
  0x3d   : > { %s4742_s29 = scalar_lea.vmem (%p4651_p8), %s5509_s1, %s3684_s28 }
  0x3e   : > { %v373_v30 = vld [vmem:[%s4742_s29] sm:$0xff] (%p4651_p8)   ;;  %v377_v31 = vld [vmem:[%s4742_s29 + $0x8] sm:$0xff] (%p4651_p8)   ;;  %v381_v32 = vld [vmem:[%s4742_s29 + $0x10] sm:$0xff] (%p4651_p8)   ;;  %s4750_s8 = scalar_lea.vmem (%p4651_p8), [#allocation4], %s4280_s14 }
  0x3f   : > { %v385_v33 = vld [vmem:[%s4742_s29 + $0x18] sm:$0xff] (%p4651_p8)   ;;  %v389_v34 = vld [vmem:[%s4742_s29 + $0x20] sm:$0xff] (%p4651_p8)   ;;  %v393_v35 = vld [vmem:[%s4742_s29 + $0x28] sm:$0xff] (%p4651_p8)   ;;  %374 = vst [vmem:[%s4750_s8] sm:$0xff] (%p4651_p8), %v373_v30  }
  0x40   : > { %378 = vst [vmem:[%s4750_s8 + $0x8] sm:$0xff] (%p4651_p8), %v377_v31   ;;  %382 = vst [vmem:[%s4750_s8 + $0x10] sm:$0xff] (%p4651_p8), %v381_v32   ;;  %v397_v36 = vld [vmem:[%s4742_s29 + $0x30] sm:$0xff] (%p4651_p8)   ;;  %v401_v37 = vld [vmem:[%s4742_s29 + $0x38] sm:$0xff] (%p4651_p8)  }
  0x41   : > { %386 = vst [vmem:[%s4750_s8 + $0x18] sm:$0xff] (%p4651_p8), %v385_v33   ;;  %390 = vst [vmem:[%s4750_s8 + $0x20] sm:$0xff] (%p4651_p8), %v389_v34   ;;  %v405_v38 = vld [vmem:[%s4742_s29 + $0x80] sm:$0xff] (%p4651_p8)   ;;  %v409_v39 = vld [vmem:[%s4742_s29 + $0x88] sm:$0xff] (%p4651_p8)  }
  0x42   : > { %394 = vst [vmem:[%s4750_s8 + $0x28] sm:$0xff] %v393_v35   ;;  %398 = vst [vmem:[%s4750_s8 + $0x30] sm:$0xff] %v397_v36   ;;  %v413_v40 = vld [vmem:[%s4742_s29 + $0x90] sm:$0xff]   ;;  %v417_v41 = vld [vmem:[%s4742_s29 + $0x98] sm:$0xff]  }
  0x43   : > { %402 = vst [vmem:[%s4750_s8 + $0x38] sm:$0xff] %v401_v37   ;;  %406 = vst [vmem:[%s4750_s8 + $0x40] sm:$0xff] %v405_v38   ;;  %v421_v42 = vld [vmem:[%s4742_s29 + $0xa0] sm:$0xff]   ;;  %v425_v43 = vld [vmem:[%s4742_s29 + $0xa8] sm:$0xff]  }
  0x44   : > { %410 = vst [vmem:[%s4750_s8 + $0x48] sm:$0xff] %v409_v39   ;;  %414 = vst [vmem:[%s4750_s8 + $0x50] sm:$0xff] %v413_v40   ;;  %v429_v44 = vld [vmem:[%s4742_s29 + $0xb0] sm:$0xff]   ;;  %v433_v45 = vld [vmem:[%s4742_s29 + $0xb8] sm:$0xff]  }
  0x45   : > { %418 = vst [vmem:[%s4750_s8 + $0x58] sm:$0xff] %v417_v41   ;;  %422 = vst [vmem:[%s4750_s8 + $0x60] sm:$0xff] %v421_v42   ;;  %v437_v46 = vld [vmem:[%s4742_s29 + $0x100] sm:$0xff]   ;;  %v441_v47 = vld [vmem:[%s4742_s29 + $0x108] sm:$0xff]  }
  0x46   : > { %426 = vst [vmem:[%s4750_s8 + $0x68] sm:$0xff] %v425_v43   ;;  %430 = vst [vmem:[%s4750_s8 + $0x70] sm:$0xff] %v429_v44   ;;  %v445_v48 = vld [vmem:[%s4742_s29 + $0x110] sm:$0xff]   ;;  %v449_v49 = vld [vmem:[%s4742_s29 + $0x118] sm:$0xff]  }
  0x47   : > { %434 = vst [vmem:[%s4750_s8 + $0x78] sm:$0xff] %v433_v45   ;;  %438 = vst [vmem:[%s4750_s8 + $0x80] sm:$0xff] %v437_v46   ;;  %v453_v50 = vld [vmem:[%s4742_s29 + $0x120] sm:$0xff]   ;;  %v457_v51 = vld [vmem:[%s4742_s29 + $0x128] sm:$0xff]  }
  0x48   : > { %442 = vst [vmem:[%s4750_s8 + $0x88] sm:$0xff] %v441_v47   ;;  %446 = vst [vmem:[%s4750_s8 + $0x90] sm:$0xff] %v445_v48   ;;  %v461_v52 = vld [vmem:[%s4742_s29 + $0x130] sm:$0xff]   ;;  %v465_v53 = vld [vmem:[%s4742_s29 + $0x138] sm:$0xff]  }
  0x49   : > { %450 = vst [vmem:[%s4750_s8 + $0x98] sm:$0xff] %v449_v49   ;;  %454 = vst [vmem:[%s4750_s8 + $0xa0] sm:$0xff] %v453_v50   ;;  %v469_v54 = vld [vmem:[%s4742_s29 + $0x180] sm:$0xff]   ;;  %v473_v55 = vld [vmem:[%s4742_s29 + $0x188] sm:$0xff]  }
  0x4a   : > { %458 = vst [vmem:[%s4750_s8 + $0xa8] sm:$0xff] %v457_v51   ;;  %462 = vst [vmem:[%s4750_s8 + $0xb0] sm:$0xff] %v461_v52   ;;  %v477_v56 = vld [vmem:[%s4742_s29 + $0x190] sm:$0xff]   ;;  %v481_v57 = vld [vmem:[%s4742_s29 + $0x198] sm:$0xff]  }
  0x4b   : > { %466 = vst [vmem:[%s4750_s8 + $0xb8] sm:$0xff] %v465_v53   ;;  %470 = vst [vmem:[%s4750_s8 + $0xc0] sm:$0xff] %v469_v54   ;;  %v485_v58 = vld [vmem:[%s4742_s29 + $0x1a0] sm:$0xff]   ;;  %v489_v59 = vld [vmem:[%s4742_s29 + $0x1a8] sm:$0xff]  }
  0x4c   : > { %474 = vst [vmem:[%s4750_s8 + $0xc8] sm:$0xff] %v473_v55   ;;  %478 = vst [vmem:[%s4750_s8 + $0xd0] sm:$0xff] %v477_v56   ;;  %v493_v60 = vld [vmem:[%s4742_s29 + $0x1b0] sm:$0xff]   ;;  %v497_v61 = vld [vmem:[%s4742_s29 + $0x1b8] sm:$0xff]  }
  0x4d   : > { %482 = vst [vmem:[%s4750_s8 + $0xd8] sm:$0xff] %v481_v57   ;;  %486 = vst [vmem:[%s4750_s8 + $0xe0] sm:$0xff] %v485_v58   ;;  %v501_v62 = vld [vmem:[%s4742_s29 + $0x200] sm:$0xff]   ;;  %v505_v63 = vld [vmem:[%s4742_s29 + $0x208] sm:$0xff]  }
  0x4e   : > { %490 = vst [vmem:[%s4750_s8 + $0xe8] sm:$0xff] %v489_v59   ;;  %494 = vst [vmem:[%s4750_s8 + $0xf0] sm:$0xff] %v493_v60   ;;  %v509_v0 = vld [vmem:[%s4742_s29 + $0x210] sm:$0xff]   ;;  %v513_v1 = vld [vmem:[%s4742_s29 + $0x218] sm:$0xff]  }
  0x4f   : > { %498 = vst [vmem:[%s4750_s8 + $0xf8] sm:$0xff] %v497_v61   ;;  %502 = vst [vmem:[%s4750_s8 + $0x100] sm:$0xff] %v501_v62   ;;  %v517_v2 = vld [vmem:[%s4742_s29 + $0x220] sm:$0xff]   ;;  %v521_v3 = vld [vmem:[%s4742_s29 + $0x228] sm:$0xff]  }
  0x50   : > { %506 = vst [vmem:[%s4750_s8 + $0x108] sm:$0xff] %v505_v63   ;;  %510 = vst [vmem:[%s4750_s8 + $0x110] sm:$0xff] %v509_v0   ;;  %v525_v4 = vld [vmem:[%s4742_s29 + $0x230] sm:$0xff]   ;;  %v529_v5 = vld [vmem:[%s4742_s29 + $0x238] sm:$0xff]  }
  0x51   : > { %514 = vst [vmem:[%s4750_s8 + $0x118] sm:$0xff] %v513_v1   ;;  %518 = vst [vmem:[%s4750_s8 + $0x120] sm:$0xff] %v517_v2   ;;  %v533_v6 = vld [vmem:[%s4742_s29 + $0x280] sm:$0xff]   ;;  %v537_v7 = vld [vmem:[%s4742_s29 + $0x288] sm:$0xff]  }
  0x52   : > { %522 = vst [vmem:[%s4750_s8 + $0x128] sm:$0xff] %v521_v3   ;;  %526 = vst [vmem:[%s4750_s8 + $0x130] sm:$0xff] %v525_v4   ;;  %v541_v8 = vld [vmem:[%s4742_s29 + $0x290] sm:$0xff]   ;;  %v545_v9 = vld [vmem:[%s4742_s29 + $0x298] sm:$0xff]  }
  0x53   : > { %530 = vst [vmem:[%s4750_s8 + $0x138] sm:$0xff] %v529_v5   ;;  %534 = vst [vmem:[%s4750_s8 + $0x140] sm:$0xff] %v533_v6   ;;  %v549_v10 = vld [vmem:[%s4742_s29 + $0x2a0] sm:$0xff]   ;;  %v553_v11 = vld [vmem:[%s4742_s29 + $0x2a8] sm:$0xff]  }
  0x54   : > { %538 = vst [vmem:[%s4750_s8 + $0x148] sm:$0xff] %v537_v7   ;;  %542 = vst [vmem:[%s4750_s8 + $0x150] sm:$0xff] %v541_v8   ;;  %v557_v12 = vld [vmem:[%s4742_s29 + $0x2b0] sm:$0xff]   ;;  %v561_v13 = vld [vmem:[%s4742_s29 + $0x2b8] sm:$0xff]  }
  0x55   : > { %546 = vst [vmem:[%s4750_s8 + $0x158] sm:$0xff] %v545_v9   ;;  %550 = vst [vmem:[%s4750_s8 + $0x160] sm:$0xff] %v549_v10   ;;  %v565_v14 = vld [vmem:[%s4742_s29 + $0x300] sm:$0xff]   ;;  %v569_v15 = vld [vmem:[%s4742_s29 + $0x308] sm:$0xff]  }
  0x56   : > { %554 = vst [vmem:[%s4750_s8 + $0x168] sm:$0xff] %v553_v11   ;;  %558 = vst [vmem:[%s4750_s8 + $0x170] sm:$0xff] %v557_v12   ;;  %v573_v16 = vld [vmem:[%s4742_s29 + $0x310] sm:$0xff]   ;;  %v577_v17 = vld [vmem:[%s4742_s29 + $0x318] sm:$0xff]  }
  0x57   : > { %562 = vst [vmem:[%s4750_s8 + $0x178] sm:$0xff] %v561_v13   ;;  %566 = vst [vmem:[%s4750_s8 + $0x180] sm:$0xff] %v565_v14   ;;  %v581_v18 = vld [vmem:[%s4742_s29 + $0x320] sm:$0xff]   ;;  %v585_v19 = vld [vmem:[%s4742_s29 + $0x328] sm:$0xff]  }
  0x58   : > { %570 = vst [vmem:[%s4750_s8 + $0x188] sm:$0xff] %v569_v15   ;;  %574 = vst [vmem:[%s4750_s8 + $0x190] sm:$0xff] %v573_v16   ;;  %v589_v20 = vld [vmem:[%s4742_s29 + $0x330] sm:$0xff]   ;;  %v593_v21 = vld [vmem:[%s4742_s29 + $0x338] sm:$0xff]  }
  0x59   : > { %578 = vst [vmem:[%s4750_s8 + $0x198] sm:$0xff] %v577_v17   ;;  %582 = vst [vmem:[%s4750_s8 + $0x1a0] sm:$0xff] %v581_v18   ;;  %v597_v22 = vld [vmem:[%s4742_s29 + $0x380] sm:$0xff]   ;;  %v601_v23 = vld [vmem:[%s4742_s29 + $0x388] sm:$0xff]  }
  0x5a   : > { %586 = vst [vmem:[%s4750_s8 + $0x1a8] sm:$0xff] %v585_v19   ;;  %590 = vst [vmem:[%s4750_s8 + $0x1b0] sm:$0xff] %v589_v20   ;;  %v605_v24 = vld [vmem:[%s4742_s29 + $0x390] sm:$0xff]   ;;  %v609_v25 = vld [vmem:[%s4742_s29 + $0x398] sm:$0xff]  }
  0x5b   : > { %594 = vst [vmem:[%s4750_s8 + $0x1b8] sm:$0xff] %v593_v21   ;;  %598 = vst [vmem:[%s4750_s8 + $0x1c0] sm:$0xff] %v597_v22   ;;  %v613_v26 = vld [vmem:[%s4742_s29 + $0x3a0] sm:$0xff]   ;;  %v617_v27 = vld [vmem:[%s4742_s29 + $0x3a8] sm:$0xff]  }
  0x5c   : > { %602 = vst [vmem:[%s4750_s8 + $0x1c8] sm:$0xff] %v601_v23   ;;  %606 = vst [vmem:[%s4750_s8 + $0x1d0] sm:$0xff] %v605_v24   ;;  %v621_v28 = vld [vmem:[%s4742_s29 + $0x3b0] sm:$0xff]   ;;  %v625_v29 = vld [vmem:[%s4742_s29 + $0x3b8] sm:$0xff]  }
  0x5d   : > { %610 = vst [vmem:[%s4750_s8 + $0x1d8] sm:$0xff] %v609_v25   ;;  %614 = vst [vmem:[%s4750_s8 + $0x1e0] sm:$0xff] %v613_v26   ;;  %v629_v30 = vld [vmem:[%s4742_s29 + $0x400] sm:$0xff]   ;;  %v633_v31 = vld [vmem:[%s4742_s29 + $0x408] sm:$0xff]  }
  0x5e   : > { %618 = vst [vmem:[%s4750_s8 + $0x1e8] sm:$0xff] %v617_v27   ;;  %622 = vst [vmem:[%s4750_s8 + $0x1f0] sm:$0xff] %v621_v28   ;;  %v637_v32 = vld [vmem:[%s4742_s29 + $0x410] sm:$0xff]   ;;  %v641_v33 = vld [vmem:[%s4742_s29 + $0x418] sm:$0xff]  }
  0x5f   : > { %626 = vst [vmem:[%s4750_s8 + $0x1f8] sm:$0xff] %v625_v29   ;;  %630 = vst [vmem:[%s4750_s8 + $0x200] sm:$0xff] %v629_v30   ;;  %v645_v34 = vld [vmem:[%s4742_s29 + $0x420] sm:$0xff]   ;;  %v649_v35 = vld [vmem:[%s4742_s29 + $0x428] sm:$0xff]  }
  0x60   : > { %634 = vst [vmem:[%s4750_s8 + $0x208] sm:$0xff] %v633_v31   ;;  %638 = vst [vmem:[%s4750_s8 + $0x210] sm:$0xff] %v637_v32   ;;  %v653_v36 = vld [vmem:[%s4742_s29 + $0x430] sm:$0xff]   ;;  %v657_v37 = vld [vmem:[%s4742_s29 + $0x438] sm:$0xff]  }
  0x61   : > { %642 = vst [vmem:[%s4750_s8 + $0x218] sm:$0xff] %v641_v33   ;;  %646 = vst [vmem:[%s4750_s8 + $0x220] sm:$0xff] %v645_v34  }
  0x62   : > { %650 = vst [vmem:[%s4750_s8 + $0x228] sm:$0xff] %v649_v35   ;;  %654 = vst [vmem:[%s4750_s8 + $0x230] sm:$0xff] %v653_v36  }
  0x63   : > { %658 = vst [vmem:[%s4750_s8 + $0x238] sm:$0xff] %v657_v37  }
  0x64 PF: > { %p3434_p11 = scmp.ge.s32.totalorder %s4540_s25, 1  ;;  %p970_p12 = scmp.lt.s32.totalorder %s4540_s25, 9 }
  0x66   : > { %p971_p13 = pnand %p3434_p11, %p970_p12 }
  0x68   : > { %974 = sbr.rel (%p971_p13) target bundleno = 539 (0x21b), region = 110 }
  0x6f   : > { %s977_s9 = sand.u32 1, %s4508_s17   ;;  %s984_s10 = sand.u32 1, %s4500_s15  }
  0x70   : > { %s4281_s11 = smul.u32 120, %s977_s9  ;;  %p1018_p0 = scmp.lt.s32.totalorder %s4524_s21, 1 }
  0x71   : > { %s4282_s12 = smul.u32 576, %s984_s10  ;;  %p1020_p1 = scmp.lt.s32.totalorder %s4520_s20, 1 }
  0x72   : > { %s5572_s21 = smov (!%p1018_p0, %s4524_s21), 1  ;;  %s4903_s8 = scalar_lea.vmem [#allocation3], %s4281_s11 }
  0x73   : > { %s5574_s20 = smov (!%p1020_p1, %s4520_s20), 1  ;;  %s3436_s30 = sshll.u32 %s5572_s21, 5 }
  0x74   : > { %s3435_s27 = sshll.u32 %s5574_s20, 4  ;;  %s4905_s0 = scalar_lea.vmem [#allocation4], %s4282_s12 }
  0x75   : > { %s1024_s28 = sadd.s32 %s3436_s30, %s3435_s27  ;;  %p3438_p2 = scmp.ne.s32.totalorder %s4516_s19, 0 }
  0x76   : > { %s3437_s14 = sshll.u32 %s1024_s28, 3  ;;  %v4542_v38 = vmov (!%p3438_p2), 0.0  }
  0x77   : > { %s4901_s29 = scalar_lea.vmem %s5512_s4, %s3437_s14  ;;  %1031 = sbr.rel (%p3438_p2) target bundleno = 127 (0x7f), region = 122  ;;  %1032 = vst [vmem:[#allocation2] sm:$0xff] (!%p3438_p2), %v4542_v38  ;;  %1033 = vst [vmem:[#allocation2 + $0x8] sm:$0xff] (!%p3438_p2), %v4542_v38 }
  0x78   : > { %1034 = vst [vmem:[#allocation2 + $0x10] sm:$0xff] (!%p3438_p2), %v4542_v38  ;;  %1035 = vst [vmem:[#allocation2 + $0x18] sm:$0xff] (!%p3438_p2), %v4542_v38 }
  0x79   : > { %1036 = vst [vmem:[#allocation2 + $0x20] sm:$0xff] (!%p3438_p2), %v4542_v38  ;;  %1037 = vst [vmem:[#allocation2 + $0x28] sm:$0xff] (!%p3438_p2), %v4542_v38 }
  0x7a   : > { %1038 = vst [vmem:[#allocation2 + $0x30] sm:$0xff] (!%p3438_p2), %v4542_v38  ;;  %1039 = vst [vmem:[#allocation2 + $0x38] sm:$0xff] (!%p3438_p2), %v4542_v38 }
  0x7b   : > { %1040 = vst [vmem:[#allocation2 + $0x40] sm:$0xff] (!%p3438_p2), %v4542_v38  ;;  %1041 = vst [vmem:[#allocation2 + $0x48] sm:$0xff] (!%p3438_p2), %v4542_v38 }
  0x7c   : > { %1042 = vst [vmem:[#allocation2 + $0x50] sm:$0xff] (!%p3438_p2), %v4542_v38  ;;  %1043 = vst [vmem:[#allocation2 + $0x58] sm:$0xff] (!%p3438_p2), %v4542_v38 }
  0x7d   : > { %1044 = vst [vmem:[#allocation2 + $0x60] sm:$0xff] (!%p3438_p2), %v4542_v38  ;;  %1045 = vst [vmem:[#allocation2 + $0x68] sm:$0xff] (!%p3438_p2), %v4542_v38 }
  0x7e   : > { %1046 = vst [vmem:[#allocation2 + $0x70] sm:$0xff] %v4542_v38  ;;  %1047 = vst [vmem:[#allocation2 + $0x78] sm:$0xff] %v4542_v38 }
  0x7f PF: > { %v4372_v39 = vld [vmem:[%s4905_s0] sm:$0xff]   ;;  %v4374_v41 = vld [vmem:[%s4905_s0 + $0x8] sm:$0xff]   ;;  %v4376_v43 = vld [vmem:[%s4905_s0 + $0x10] sm:$0xff]   ;;  %vm1732_vm0 = vcmask 1042432   ;;  %vm1733_vm1 = vcmask 1046532   ;;  %p3679_p3 = scmp.ne.s32.totalorder %s4516_s19, 1 }
  0x80   : > { %v4373_v40 = vld [vmem:[%s4905_s0 + $0x100] sm:$0xff]   ;;  %3829 = vmatprep.subr.bf16.mxu1 %v4372_v39  ;;  %v4375_v42 = vld [vmem:[%s4905_s0 + $0x108] sm:$0xff]   ;;  %v4377_v44 = vld [vmem:[%s4905_s0 + $0x110] sm:$0xff]   ;;  %vm1319_vm2 = vsmask.f32 3328 }
  0x81   : > { %3957 = vmatprep.subr.bf16.mxu0 %v4373_v40  ;;  %3830 = vmatpush3.bf16.msra.mxu1 %v4372_v39  ;;  %v4378_v45 = vld [vmem:[%s4905_s0 + $0x18] sm:$0xff]   ;;  %v4380_v47 = vld [vmem:[%s4905_s0 + $0x20] sm:$0xff]   ;;  %v4382_v49 = vld [vmem:[%s4905_s0 + $0x28] sm:$0xff]   ;;  %vm1320_vm3 = vsmask.f32 7440 }
  0x82   : > { %3958 = vmatpush3.bf16.msra.mxu0 %v4373_v40  ;;  %3831 = vmatprep.subr.bf16.mxu1 %v4374_v41  ;;  %v4379_v46 = vld [vmem:[%s4905_s0 + $0x118] sm:$0xff]   ;;  %v4381_v48 = vld [vmem:[%s4905_s0 + $0x120] sm:$0xff]   ;;  %v1048_v50 = vld [vmem:[%s4903_s8] sm:$0xf] }
  0x83   : > { %3959 = vmatprep.subr.bf16.mxu0 %v4375_v42  ;;  %v4921_v51 = vld [vmem:[%s4903_s8 + $0x4] sm:$0xf]  ;;  %v4924_v52 = vld [vmem:[%s4903_s8 + $0xc] sm:$0xf]  ;;  %v1323_v55 = vshrl.u32 %v1048_v50, 16  ;;  %v1326_v56 = vshll.u32 %v1048_v50, 16  ;;  %vm4952_vm4 = vmor %vm1732_vm0, %vm1733_vm1 }
  0x84   : > { %v4383_v53 = vld [vmem:[%s4905_s0 + $0x128] sm:$0xff]   ;;  %v3439_v54 = vcombine.low %v1048_v50, %v4921_v51  ;;  %v1332_v57 = vshll.u32 %v4921_v51, 16  ;;  %v4930_v58 = vld [vmem:[%s4903_s8 + $0x10] sm:$0xf]  ;;  %v1336_v59 = vshrl.u32 %v4921_v51, 16  ;;  %v3487_v60 = vrot.slane %v1048_v50, 9  ;;  %vm4981_vm5 = vmor %vm1319_vm2, %vm1320_vm3 }
  0x85   : > { %3832 = vmatpush3.bf16.msra.mxu1 %v4374_v41  ;;  %v4934_v61 = vld [vmem:[%s4903_s8 + $0x14] sm:$0x1]  ;;  %v1347_v62 = vshrl.u32 %v4924_v52, 16  ;;  %v4384_v63 = vld [vmem:[%s4905_s0 + $0x30] sm:$0xff]   ;;  %v4939_v1 = vrot.slane %v1323_v55, 4  ;;  %v4941_v2 = vrot.slane %v1326_v56, 5 }
  0x86   : > { %3960 = vmatpush3.bf16.msra.mxu0 %v4375_v42  ;;  %3833 = vmatprep.subr.bf16.mxu1 %v4376_v43  ;;  %v4385_v0 = vld [vmem:[%s4905_s0 + $0x130] sm:$0xff]   ;;  %v5515_v3 = vrot.slane %v4921_v51, 5  ;;  %v1350_v5 = vshll.u32 %v4924_v52, 16  ;;  %v4945_v6 = vrot.slane %v1332_v57, 5  ;;  %v1356_v7 = vshll.u32 %v4930_v58, 16  ;;  %v4386_v20 = vld [vmem:[%s4905_s0 + $0x38] sm:$0xff]  }
  0x87   : > { %3961 = vmatprep.subr.bf16.mxu0 %v4377_v44  ;;  %3845 = vmatprep.mubr.bf16.mxu1 %v3439_v54  ;;  %v1349_v4 = vrot.slane %v1347_v62, 4  ;;  %v1360_v8 = vshrl.u32 %v4930_v58, 16  ;;  %v1366_v9 = vshll.u32 %v4934_v61, 16  ;;  %v4956_v11 = vrot.slane %v1336_v59, 4  ;;  %v4959_v13 = vld [vmem:[%s4903_s8 + $0x18] sm:$0xf] }
  0x88   : > { %v1352_v12 = vrot.slane %v1350_v5, 5  ;;  %v4965_v14 = vsel %vm4952_vm4, %v3487_v60, %v5515_v3  ;;  %v1358_v15 = vrot.slane %v1356_v7, 5  ;;  %v4968_v18 = vld [vmem:[%s4903_s8 + $0x1c] sm:$0xf]  ;;  %v1371_v19 = vshrl.u32 %v4959_v13, 16  ;;  %v4387_v26 = vld [vmem:[%s4905_s0 + $0x138] sm:$0xff]  }
  0x89   : > { %3834 = vmatpush3.bf16.msra.mxu1 %v4376_v43  ;;  %v1362_v16 = vrot.slane %v1360_v8, 4  ;;  %v1368_v17 = vrot.slane %v1366_v9, 5  ;;  %v4973_v22 = vld [vmem:[%s4903_s8 + $0x20] sm:$0x1]  ;;  %v1374_v23 = vshll.u32 %v4959_v13, 16  ;;  %v1380_v24 = vshll.u32 %v4968_v18, 16 }
  0x8a   : > { %3962 = vmatpush3.bf16.msra.mxu0 %v4377_v44  ;;  %3835 = vmatprep.subr.bf16.mxu1 %v4378_v45  ;;  %v1353_v21 = vor.u32 %v1352_v12, %v1349_v4  ;;  %v1384_v25 = vshrl.u32 %v4968_v18, 16  ;;  %v1373_v29 = vrot.slane %v1371_v19, 4  ;;  %v1390_v30 = vshll.u32 %v4973_v22, 16  ;;  %v4390_v37 = vld [vmem:[%s4905_s0 + $0x40] sm:$0xff]   ;;  %v4992_v43 = vld [vmem:[%s4903_s8 + $0x24] sm:$0xf] }
  0x8b   : > { %3963 = vmatprep.subr.bf16.mxu0 %v4379_v46  ;;  %v1363_v28 = vor.u32 %v1362_v16, %v1358_v15  ;;  %v1376_v33 = vrot.slane %v1374_v23, 5  ;;  %v1382_v34 = vrot.slane %v1380_v24, 5  ;;  %v4391_v39 = vld [vmem:[%s4905_s0 + $0x140] sm:$0xff]   ;;  %v4392_v55 = vld [vmem:[%s4905_s0 + $0x48] sm:$0xff]   ;;  %v5022_v5 = vcombine.low %v4959_v13, %v4968_v18 }
  0x8c   : > { %v1354_v32 = vrot.slane %v1353_v21, 4  ;;  %v1386_v35 = vrot.slane %v1384_v25, 4  ;;  %v1392_v38 = vrot.slane %v1390_v30, 5  ;;  %v4393_v4 = vld [vmem:[%s4905_s0 + $0x148] sm:$0xff]   ;;  %v5025_v8 = vld [vmem:[%s4903_s8 + $0x30] sm:$0xf] }
  0x8d   : > { %3836 = vmatpush3.bf16.msra.mxu1 %v4378_v45  ;;  %v1364_v36 = vrot.slane %v1363_v28, 4  ;;  %v1377_v41 = vor.u32 %v1376_v33, %v1373_v29  ;;  %v4998_v45 = vcombine.low %v4924_v52, %v4930_v58  ;;  %v5028_v9 = vld [vmem:[%s4903_s8 + $0x34] sm:$0xf]  ;;  %v5033_v19 = vld [vmem:[%s4903_s8 + $0x38] sm:$0x1]  ;;  %v1419_v21 = vshrl.u32 %v5025_v8, 16 }
  0x8e   : > { %3964 = vmatpush3.bf16.msra.mxu0 %v4379_v46  ;;  %3837 = vmatprep.subr.bf16.mxu1 %v4380_v47  ;;  %v1359_v40 = vsel %vm4981_vm5, %v1354_v32, %v1358_v15  ;;  %v1387_v42 = vor.u32 %v1386_v35, %v1382_v34  ;;  %v5001_v46 = vld [vmem:[%s4903_s8 + $0x28] sm:$0xf]  ;;  %v1422_v23 = vshll.u32 %v5025_v8, 16  ;;  %v1428_v24 = vshll.u32 %v5028_v9, 16 }
  0x8f   : > { %3965 = vmatprep.subr.bf16.mxu0 %v4381_v48  ;;  %v1369_v44 = vsel %vm4981_vm5, %v1364_v36, %v1368_v17  ;;  %5535 = vst [vmem:[#allocation7_spill] sm:$0xff] %v4998_v45  ;;  %v1404_v56 = vshll.u32 %v5001_v46, 16  ;;  %v1408_v60 = vshrl.u32 %v5001_v46, 16  ;;  %v1432_v25 = vshrl.u32 %v5028_v9, 16  ;;  %v4397_v32 = vld [vmem:[%s4905_s0 + $0x150] sm:$0xff]  }
  0x90   : > { %v5008_v50 = vcombine.low %v1359_v40, %v1369_v44  ;;  %v1388_v54 = vrot.slane %v1387_v42, 4  ;;  %v5044_v29 = vcombine.low %v4992_v43, %v5001_v46  ;;  %v1438_v30 = vshll.u32 %v5033_v19, 16  ;;  %v5056_v42 = vld [vmem:[%s4903_s8 + $0x3c] sm:$0xf] }
  0x91   : > { %3838 = vmatpush3.bf16.msra.mxu1 %v4380_v47  ;;  %v5004_v47 = vld [vmem:[%s4903_s8 + $0x2c] sm:$0x1]  ;;  %v1406_v7 = vrot.slane %v1404_v56, 5  ;;  %v1410_v16 = vrot.slane %v1408_v60, 4  ;;  %v1421_v33 = vrot.slane %v1419_v21, 4  ;;  %v1430_v35 = vrot.slane %v1428_v24, 5 }
  0x92   : > { %3966 = vmatpush3.bf16.msra.mxu0 %v4381_v48  ;;  %3839 = vmatprep.subr.bf16.mxu1 %v4382_v49  ;;  %v1395_v48 = vshrl.u32 %v4992_v43, 16  ;;  %v1414_v62 = vshll.u32 %v5004_v47, 16  ;;  %5536 = vst [vmem:[#allocation8_spill] sm:$0xff] %v5044_v29  ;;  %v1434_v36 = vrot.slane %v1432_v25, 4  ;;  %v1440_v40 = vrot.slane %v1438_v30, 5 }
  0x93   : > { %3967 = vmatprep.subr.bf16.mxu0 %v4383_v53  ;;  %3973 = vmatprep.mubr.bf16.mxu0 %v5008_v50  ;;  %v1411_v28 = vor.u32 %v1410_v16, %v1406_v7  ;;  %v5090_v30 = vld [vmem:[%s4903_s8 + $0x50] sm:$0x1] }
  0x94   : > { %v1397_v57 = vrot.slane %v1395_v48, 4  ;;  %v1416_v17 = vrot.slane %v1414_v62, 5  ;;  %v1435_v44 = vor.u32 %v1434_v36, %v1430_v35  ;;  %v5059_v48 = vld [vmem:[%s4903_s8 + $0x40] sm:$0xf] }
  0x95   : > { %3840 = vmatpush3.bf16.msra.mxu1 %v4382_v49  ;;  %v1398_v49 = vshll.u32 %v4992_v43, 16 }
  0x96   : > { %3968 = vmatpush3.bf16.msra.mxu0 %v4383_v53  ;;  %3841 = vmatprep.subr.bf16.mxu1 %v4384_v63  ;;  %v1378_v53 = vrot.slane %v1377_v41, 4  ;;  %v5053_v41 = vcombine.low %v5025_v8, %v5028_v9 }
  0x97   : > { %3969 = vmatprep.subr.bf16.mxu0 %v4385_v0  ;;  %v1400_v59 = vrot.slane %v1398_v49, 5  ;;  %v5062_v49 = vld [vmem:[%s4903_s8 + $0x44] sm:$0x1] }
  0x98   : > { %5537 = vst [vmem:[#allocation9_spill] sm:$0xff] %v5053_v41  ;;  %v1462_v60 = vshll.u32 %v5062_v49, 16 }
  0x99   : > { %3842 = vmatpush3.bf16.msra.mxu1 %v4384_v63  ;;  %v1383_v63 = vsel %vm4981_vm5, %v1378_v53, %v1382_v34  ;;  %v1401_v15 = vor.u32 %v1400_v59, %v1397_v57  ;;  %v1424_v34 = vrot.slane %v1422_v23, 5  ;;  %v1443_v53 = vshrl.u32 %v5056_v42, 16  ;;  %v5076_v23 = vld [vmem:[%s4903_s8 + $0x48] sm:$0xf] }
  0x9a   : > { %3970 = vmatpush3.bf16.msra.mxu0 %v4385_v0  ;;  %3843 = vmatprep.subr.bf16.mxu1 %v4386_v20  ;;  %v1393_v0 = vsel %vm4981_vm5, %v1388_v54, %v1392_v38  ;;  %v1412_v38 = vrot.slane %v1411_v28, 4  ;;  %v1446_v54 = vshll.u32 %v5056_v42, 16  ;;  %v1452_v57 = vshll.u32 %v5059_v48, 16  ;;  %v5087_v28 = vld [vmem:[%s4903_s8 + $0x4c] sm:$0xf] }
  0x9b   : > { %3971 = vmatprep.subr.bf16.mxu0 %v4387_v26  ;;  %v5030_v12 = vcombine.low %v1383_v63, %v1393_v0  ;;  %v1456_v59 = vshrl.u32 %v5059_v48, 16  ;;  %v1436_v0 = vrot.slane %v1435_v44, 4  ;;  %v1480_v44 = vshrl.u32 %v5087_v28, 16 }
  0x9c   : > { %v1417_v56 = vsel %vm4981_vm5, %v1412_v38, %v1416_v17  ;;  %v1448_v16 = vrot.slane %v1446_v54, 5  ;;  %v1454_v17 = vrot.slane %v1452_v57, 5  ;;  %v4402_v38 = vld [vmem:[%s4905_s0 + $0x60] sm:$0xff]  }
  0x9d   : > { %3844 = vmatpush3.bf16.msra.mxu1 %v4386_v20  ;;  %v4396_v20 = vld [vmem:[%s4905_s0 + $0x50] sm:$0xff]   ;;  %v1458_v21 = vrot.slane %v1456_v59, 4  ;;  %v1441_v25 = vsel %vm4981_vm5, %v1436_v0, %v1440_v40  ;;  %v4403_v57 = vld [vmem:[%s4905_s0 + $0x160] sm:$0xff]   ;;  %v5107_v59 = vcombine.low %v5056_v42, %v5059_v48 }
  0x9e   : > { %3972 = vmatpush3.bf16.msra.mxu0 %v4387_v26  ;;  %3861 = vmatprep.subr.bf16.mxu1 %v4390_v37  ;;  %v1402_v26 = vrot.slane %v1401_v15, 4  ;;  %v4399_v15 = vld [vmem:[%s4905_s0 + $0x158] sm:$0xff]  }
  0x9f   : > { %3989 = vmatprep.subr.bf16.mxu0 %v4391_v39  ;;  %5538 = vst [vmem:[#allocation10_spill] sm:$0xff] %v5107_v59 }
  0xa0   : > { %3846 = vmatmul.mubr.bf16.vlgmr.msra.gmra.mrb[0].mxu1 %v4998_v45  ;;  %v5155_v45 = vld [vmem:[%s4903_s8 + $0x68] sm:$0x1] }
  0xa1   : > { %3974 = vmatmul.mubr.bf16.vlgmr.msra.gmra.mrb[0].mxu0 %v5030_v12  ;;  %3862 = vmatpush3.bf16.msra.mxu1 %v4390_v37  ;;  %v1407_v37 = vsel %vm4981_vm5, %v1402_v26, %v1406_v7  ;;  %v4398_v7 = vld [vmem:[%s4905_s0 + $0x58] sm:$0xff]   ;;  %v1464_v26 = vrot.slane %v1462_v60, 5 }
  0xa2   : > { %3990 = vmatpush3.bf16.msra.mxu0 %v4391_v39  ;;  %3863 = vmatprep.subr.bf16.mxu1 %v4392_v55  ;;  %v1425_v39 = vor.u32 %v1424_v34, %v1421_v33  ;;  %v5071_v62 = vcombine.low %v1407_v37, %v1417_v56  ;;  %v1467_v33 = vshrl.u32 %v5076_v23, 16  ;;  %v1459_v37 = vor.u32 %v1458_v21, %v1454_v17 }
  0xa3   : > { %3991 = vmatprep.subr.bf16.mxu0 %v4393_v4  ;;  %3849 = vmatprep.mubr.bf16.mxu1 %v5022_v5 }
  0xa4   : > { %v1426_v63 = vrot.slane %v1425_v39, 4  ;;  %3977 = vmatprep.mubr.bf16.mxu0 %v5071_v62  ;;  %v1469_v40 = vrot.slane %v1467_v33, 4  ;;  %v1476_v39 = vshll.u32 %v5087_v28, 16  ;;  %v1460_v54 = vrot.slane %v1459_v37, 4  ;;  %v5123_v37 = vld [vmem:[%s4903_s8 + $0x58] sm:$0xf] }
  0xa5   : > { %3864 = vmatpush3.bf16.msra.mxu1 %v4392_v55  ;;  %v1445_v55 = vrot.slane %v1443_v53, 4  ;;  %v1486_v53 = vshll.u32 %v5090_v30, 16  ;;  %v5117_v33 = vcombine.low %v5076_v23, %v5087_v28 }
  0xa6   : > { %3992 = vmatpush3.bf16.msra.mxu0 %v4393_v4  ;;  %3865 = vmatprep.subr.bf16.mxu1 %v4396_v20  ;;  %v1431_v24 = vsel %vm4981_vm5, %v1426_v63, %v1430_v35  ;;  %v1470_v35 = vshll.u32 %v5076_v23, 16  ;;  %v1478_v60 = vrot.slane %v1476_v39, 5  ;;  %v1482_v63 = vrot.slane %v1480_v44, 4 }
  0xa7   : > { %3993 = vmatprep.subr.bf16.mxu0 %v4397_v32  ;;  %v5093_v34 = vcombine.low %v1431_v24, %v1441_v25  ;;  %v1449_v36 = vor.u32 %v1448_v16, %v1445_v55  ;;  %v1488_v0 = vrot.slane %v1486_v53, 5  ;;  %v4404_v55 = vld [vmem:[%s4905_s0 + $0x68] sm:$0xff]   ;;  %v1465_v21 = vsel %vm4981_vm5, %v1460_v54, %v1464_v26  ;;  %5539 = vst [vmem:[#allocation11_spill] sm:$0xff] %v5117_v33 }
  0xa8   : > { %3850 = vmatmul.mubr.bf16.gmra.mrb[4].mxu1 %v5044_v29  ;;  %v1472_v56 = vrot.slane %v1470_v35, 5  ;;  %v4405_v25 = vld [vmem:[%s4905_s0 + $0x168] sm:$0xff]   ;;  %v1500_v44 = vshll.u32 %v5123_v37, 16  ;;  %v1504_v53 = vshrl.u32 %v5123_v37, 16  ;;  %v5173_v29 = vld [vmem:[%s4903_s8 + $0x8] sm:$0x1] }
  0xa9   : > { %3866 = vmatpush3.bf16.msra.mxu1 %v4396_v20  ;;  %3853 = vmatprep.mubr.bf16.mxu1 %v5053_v41  ;;  %v1450_v20 = vrot.slane %v1449_v36, 4  ;;  %v5120_v36 = vld [vmem:[%s4903_s8 + $0x54] sm:$0xf] }
  0xaa   : > { %3994 = vmatpush3.bf16.msra.mxu0 %v4397_v32  ;;  %3867 = vmatprep.subr.bf16.mxu1 %v4398_v7  ;;  %v1473_v24 = vor.u32 %v1472_v56, %v1469_v40  ;;  %v1491_v26 = vshrl.u32 %v5120_v36, 16  ;;  %v1494_v40 = vshll.u32 %v5120_v36, 16  ;;  %v1502_v3 = vrot.slane %v1500_v44, 5  ;;  %v4411_v41 = vld [vmem:[%s4905_s0 + $0x178] sm:$0xff]  }
  0xab   : > { %3978 = vmatmul.mubr.bf16.gmra.mrb[4].mxu0 %v5093_v34  ;;  %3995 = vmatprep.subr.bf16.mxu0 %v4399_v15  ;;  %v1455_v16 = vsel %vm4981_vm5, %v1450_v20, %v1454_v17  ;;  %v5128_v17 = vld [vmem:[%s4903_s8 + $0x5c] sm:$0x1]  ;;  %v1506_v31 = vrot.slane %v1504_v53, 4 }
  0xac   : > { %v5125_v35 = vcombine.low %v1455_v16, %v1465_v21  ;;  %v1474_v39 = vrot.slane %v1473_v24, 4  ;;  %v1493_v54 = vrot.slane %v1491_v26, 4  ;;  %v1496_v56 = vrot.slane %v1494_v40, 5  ;;  %v4408_v16 = vld [vmem:[%s4905_s0 + $0x70] sm:$0xff]  }
  0xad   : > { %3868 = vmatpush3.bf16.msra.mxu1 %v4398_v7  ;;  %v1483_v7 = vor.u32 %v1482_v63, %v1478_v60  ;;  %v5139_v63 = vcombine.low %v5120_v36, %v5123_v37  ;;  %v5143_v21 = vld [vmem:[%s4903_s8 + $0x60] sm:$0xf] }
  0xae   : > { %3996 = vmatpush3.bf16.msra.mxu0 %v4399_v15  ;;  %3869 = vmatprep.subr.bf16.mxu1 %v4402_v38  ;;  %v1510_v15 = vshll.u32 %v5128_v17, 16  ;;  %v1479_v24 = vsel %vm4981_vm5, %v1474_v39, %v1478_v60  ;;  %v4409_v26 = vld [vmem:[%s4905_s0 + $0x170] sm:$0xff]   ;;  %v1497_v4 = vor.u32 %v1496_v56, %v1493_v54  ;;  %v1507_v39 = vor.u32 %v1506_v31, %v1502_v3 }
  0xaf   : > { %3997 = vmatprep.subr.bf16.mxu0 %v4403_v57  ;;  %3981 = vmatprep.mubr.bf16.mxu0 %v5125_v35  ;;  %v1484_v20 = vrot.slane %v1483_v7, 4  ;;  %v5149_v7 = vld [vmem:[%s4903_s8 + $0x64] sm:$0xf]  ;;  %v5540_v31 = vor.u32 %v4941_v2, %v4939_v1  ;;  %v1342_v2 = vshll.u32 %v5173_v29, 16 }
  0xb0   : > { %3854 = vmatmul.mubr.bf16.gmra.mrb[8].mxu1 %v5107_v59  ;;  %v1512_v32 = vrot.slane %v1510_v15, 5  ;;  %v2186_v59 = vshrl.u32 %v5143_v21, 16  ;;  %v2195_v44 = vshll.u32 %v5149_v7, 16  ;;  %v2199_v53 = vshrl.u32 %v5149_v7, 16 }
  0xb1   : > { %3870 = vmatpush3.bf16.msra.mxu1 %v4402_v38  ;;  %3857 = vmatprep.mubr.bf16.mxu1 %v5117_v33  ;;  %v1489_v40 = vsel %vm4981_vm5, %v1484_v20, %v1488_v0  ;;  %v2189_v38 = vshll.u32 %v5143_v21, 16  ;;  %v1498_v15 = vrot.slane %v1497_v4, 4  ;;  %v2205_v20 = vshll.u32 %v5155_v45, 16 }
  0xb2   : > { %3998 = vmatpush3.bf16.msra.mxu0 %v4403_v57  ;;  %3871 = vmatprep.subr.bf16.mxu1 %v4404_v55  ;;  %v5159_v60 = vcombine.low %v1479_v24, %v1489_v40  ;;  %v2188_v57 = vrot.slane %v2186_v59, 4  ;;  %v1508_v54 = vrot.slane %v1507_v39, 4  ;;  %v2197_v56 = vrot.slane %v2195_v44, 5  ;;  %v4410_v40 = vld [vmem:[%s4905_s0 + $0x78] sm:$0xff]  }
  0xb3   : > { %3999 = vmatprep.subr.bf16.mxu0 %v4405_v25  ;;  %v2191_v0 = vrot.slane %v2189_v38, 5  ;;  %v2201_v24 = vrot.slane %v2199_v53, 4  ;;  %v1330_v33 = vrot.slane %v5540_v31, 4  ;;  %v1503_v4 = vsel %vm4981_vm5, %v1498_v15, %v1502_v3 }
  0xb4   : > { %3982 = vmatmul.mubr.bf16.gmra.mrb[8].mxu0 %v5159_v60  ;;  %v2207_v38 = vrot.slane %v2205_v20, 5  ;;  %v5541_v44 = vor.u32 %v4956_v11, %v4945_v6  ;;  %v3488_v53 = vrot.slane %v4924_v52, 9  ;;  %v1744_v15 = vrot.slane %v4930_v58, 5 }
  0xb5   : > { %3872 = vmatpush3.bf16.msra.mxu1 %v4404_v55  ;;  %v2192_v59 = vor.u32 %v2191_v0, %v2188_v57  ;;  %v1513_v55 = vsel %vm4981_vm5, %v1508_v54, %v1512_v32  ;;  %v2202_v39 = vor.u32 %v2201_v24, %v2197_v56  ;;  %v1335_v32 = vsel %vm4981_vm5, %v1330_v33, %v4945_v6  ;;  %v4412_v24 = vld [vmem:[%s4905_s0 + $0x80] sm:$0xff]  }
  0xb6   : > { %4000 = vmatpush3.bf16.msra.mxu0 %v4405_v25  ;;  %3873 = vmatprep.subr.bf16.mxu1 %v4408_v16  ;;  %v1340_v1 = vrot.slane %v5541_v44, 4  ;;  %v5181_v25 = vcombine.low %v1503_v4, %v1513_v55  ;;  %v1344_v0 = vrot.slane %v1342_v2, 5  ;;  %v1747_v11 = vrot.slane %v4934_v61, 5 }
  0xb7   : > { %4001 = vmatprep.subr.bf16.mxu0 %v4409_v26  ;;  %v2193_v3 = vrot.slane %v2192_v59, 4  ;;  %v2203_v57 = vrot.slane %v2202_v39, 4  ;;  %v1745_v52 = vsel %vm4952_vm4, %v3488_v53, %v1744_v15  ;;  %v1746_v58 = vrot.slane %v1744_v15, 4  ;;  %v4414_v39 = vld [vmem:[%s4905_s0 + $0x88] sm:$0xff]  }
  0xb8   : > { %3858 = vmatmul.mubr.bf16.gmra.mrb[12].mxu1 %v5139_v63  ;;  %3985 = vmatprep.mubr.bf16.mxu0 %v5181_v25  ;;  %v1345_v61 = vsel %vm4981_vm5, %v1340_v1, %v1344_v0  ;;  %v3489_v33 = vrot.slane %v4959_v13, 9  ;;  %v3490_v31 = vrot.slane %v4992_v43, 9  ;;  %v1758_v13 = vrot.slane %v5001_v46, 5  ;;  %v4415_v15 = vld [vmem:[%s4905_s0 + $0x188] sm:$0xff]  }
  0xb9   : > { %3874 = vmatpush3.bf16.msra.mxu1 %v4408_v16  ;;  %v2198_v20 = vsel %vm4981_vm5, %v2193_v3, %v2197_v56  ;;  %v1751_v16 = vrot.slane %v4968_v18, 5  ;;  %v2208_v6 = vsel %vm4981_vm5, %v2203_v57, %v2207_v38  ;;  %v3471_v56 = vcombine.low %v1335_v32, %v1345_v61  ;;  %v4413_v38 = vld [vmem:[%s4905_s0 + $0x180] sm:$0xff]  }
  0xba   : > { %4002 = vmatpush3.bf16.msra.mxu0 %v4409_v26  ;;  %3875 = vmatprep.subr.bf16.mxu1 %v4410_v40  ;;  %v5203_v26 = vcombine.low %v5143_v21, %v5149_v7  ;;  %v5205_v54 = vcombine.low %v2198_v20, %v2208_v6  ;;  %v1748_v18 = vsel %vm4952_vm4, %v1746_v58, %v1747_v11  ;;  %v1761_v55 = vrot.slane %v5004_v47, 5  ;;  %v4420_v58 = vld [vmem:[%s4905_s0 + $0xa0] sm:$0xff]  }
  0xbb   : > { %4003 = vmatprep.subr.bf16.mxu0 %v4411_v41  ;;  %v5211_v4 = vcombine.low %v1745_v52, %v1748_v18  ;;  %v1753_v59 = vrot.slane %v1751_v16, 4  ;;  %3877 = vmatprep.mubr.bf16.mxu1 %v3471_v56  ;;  %v1765_v44 = vrot.slane %v5028_v9, 5  ;;  %v1752_v43 = vsel %vm4952_vm4, %v3489_v33, %v1751_v16  ;;  %v4419_v33 = vld [vmem:[%s4905_s0 + $0x198] sm:$0xff]  }
  0xbc   : > { %3986 = vmatmul.mubr.bf16.gmra.mrb[12].mxu0 %v5205_v54  ;;  %v1760_v47 = vrot.slane %v1758_v13, 4  ;;  %v1759_v9 = vsel %vm4952_vm4, %v3490_v31, %v1758_v13  ;;  %v1772_v1 = vrot.slane %v5059_v48, 5  ;;  %v1768_v53 = vrot.slane %v5033_v19, 5  ;;  %v4418_v19 = vld [vmem:[%s4905_s0 + $0x98] sm:$0xff]  }
  0xbd   : > { %3876 = vmatpush3.bf16.msra.mxu1 %v4410_v40  ;;  %4005 = vmatprep.mubr.bf16.mxu0 %v5211_v4  ;;  %v5542_v40 = vrot.slane %v4973_v22, 5  ;;  %v4416_v22 = vld [vmem:[%s4905_s0 + $0x90] sm:$0xff]   ;;  %v1767_v3 = vrot.slane %v1765_v44, 4  ;;  %v3492_v32 = vrot.slane %v5056_v42, 9  ;;  %v1775_v48 = vrot.slane %v5062_v49, 5 }
  0xbe   : > { %4004 = vmatpush3.bf16.msra.mxu0 %v4411_v41  ;;  %3893 = vmatprep.subr.bf16.mxu1 %v4412_v24  ;;  %v1762_v41 = vsel %vm4952_vm4, %v1760_v47, %v1761_v55  ;;  %v1774_v0 = vrot.slane %v1772_v1, 4  ;;  %v1779_v20 = vrot.slane %v5087_v28, 5  ;;  %v4417_v42 = vld [vmem:[%s4905_s0 + $0x190] sm:$0xff]   ;;  %v1786_v16 = vrot.slane %v5123_v37, 5 }
  0xbf   : > { %v1755_v46 = vsel %vm4952_vm4, %v1753_v59, %v5542_v40  ;;  %4021 = vmatprep.subr.bf16.mxu0 %v4413_v38  ;;  %v5239_v57 = vcombine.low %v1759_v9, %v1762_v41  ;;  %v1769_v11 = vsel %vm4952_vm4, %v1767_v3, %v1768_v53  ;;  %v1773_v49 = vsel %vm4952_vm4, %v3492_v32, %v1772_v1  ;;  %v4423_v9 = vld [vmem:[%s4905_s0 + $0x1a8] sm:$0xff]   ;;  %v4426_v41 = vld [vmem:[%s4905_s0 + $0xb8] sm:$0xff]   ;;  %v4432_v32 = vld [vmem:[%s4905_s0 + $0xd0] sm:$0xff]  }
  0xc0   : > { %3878 = vmatmul.mubr.bf16.vlgmr.msra.gmra.mrb[0].mxu1 %v5008_v50  ;;  %v5232_v2 = vcombine.low %v1752_v43, %v1755_v46  ;;  %v3491_v50 = vrot.slane %v5025_v8, 9  ;;  %v1776_v52 = vsel %vm4952_vm4, %v1774_v0, %v1775_v48  ;;  %v3493_v28 = vrot.slane %v5076_v23, 9  ;;  %v4424_v43 = vld [vmem:[%s4905_s0 + $0xb0] sm:$0xff]   ;;  %v4427_v3 = vld [vmem:[%s4905_s0 + $0x1b8] sm:$0xff]   ;;  %v4430_v53 = vld [vmem:[%s4905_s0 + $0xc8] sm:$0xff]  }
  0xc1   : > { %3894 = vmatpush3.bf16.msra.mxu1 %v4412_v24  ;;  %3881 = vmatprep.mubr.bf16.mxu1 %v5030_v12  ;;  %v1782_v61 = vrot.slane %v5090_v30, 5  ;;  %v1781_v56 = vrot.slane %v1779_v20, 4  ;;  %v3494_v18 = vrot.slane %v5120_v36, 9  ;;  %v5543_v24 = vrot.slane %v4921_v51, 5  ;;  %v4422_v51 = vld [vmem:[%s4905_s0 + $0xa8] sm:$0xff]  }
  0xc2   : > { %3895 = vmatprep.subr.bf16.mxu1 %v4414_v39  ;;  %v1766_v8 = vsel %vm4952_vm4, %v3491_v50, %v1765_v44  ;;  %v1740_v37 = vrot.slane %v5173_v29, 5  ;;  %v5269_v59 = vcombine.low %v1773_v49, %v1776_v52  ;;  %v1789_v23 = vrot.slane %v5128_v17, 5  ;;  %v4428_v50 = vld [vmem:[%s4905_s0 + $0xc0] sm:$0xff]   ;;  %v4431_v0 = vld [vmem:[%s4905_s0 + $0x1c8] sm:$0xff]  }
  0xc3   : > { %v5259_v6 = vcombine.low %v1766_v8, %v1769_v11  ;;  %v1739_v31 = vrot.slane %v5543_v24, 4  ;;  %v1780_v29 = vsel %vm4952_vm4, %v3493_v28, %v1779_v20  ;;  %v1783_v36 = vsel %vm4952_vm4, %v1781_v56, %v1782_v61  ;;  %v5544_v48 = vld [vmem:[#allocation8_spill] sm:$0xff]  ;;  %v4434_v8 = vld [vmem:[%s4905_s0 + $0xd8] sm:$0xff]   ;;  %v4433_v11 = vld [vmem:[%s4905_s0 + $0x1d0] sm:$0xff]  }
  0xc4   : > { %4006 = vmatmul.mubr.bf16.vlgmr.msra.gmra.mrb[0].mxu0 %v5232_v2  ;;  %v2394_v17 = vrot.slane %v5149_v7, 5  ;;  %v1787_v55 = vsel %vm4952_vm4, %v3494_v18, %v1786_v16  ;;  %v5290_v44 = vcombine.low %v1780_v29, %v1783_v36  ;;  %v3577_v7 = vrot.slane %v5143_v21, 9  ;;  %v4435_v20 = vld [vmem:[%s4905_s0 + $0x1d8] sm:$0xff]   ;;  %v4438_v49 = vld [vmem:[%s4905_s0 + $0xe8] sm:$0xff]   ;;  %v5547_v52 = vld [vmem:[#allocation11_spill] sm:$0xff] }
  0xc5   : > { %3896 = vmatpush3.bf16.msra.mxu1 %v4414_v39  ;;  %4022 = vmatpush3.bf16.msra.mxu0 %v4413_v38  ;;  %v1788_v38 = vrot.slane %v1786_v16, 4  ;;  %v1741_v30 = vsel %vm4952_vm4, %v1739_v31, %v1740_v37  ;;  %v2397_v47 = vrot.slane %v5155_v45, 5  ;;  %v4425_v45 = vld [vmem:[%s4905_s0 + $0x1b0] sm:$0xff]   ;;  %v4439_v28 = vld [vmem:[%s4905_s0 + $0x1e8] sm:$0xff]   ;;  %v4444_v61 = vld [vmem:[%s4905_s0 + $0xf8] sm:$0xff]  }
  0xc6   : > { %3897 = vmatprep.subr.bf16.mxu1 %v4416_v22  ;;  %4009 = vmatprep.mubr.bf16.mxu0 %v5239_v57  ;;  %v3511_v13 = vcombine.low %v4965_v14, %v1741_v30  ;;  %v4421_v14 = vld [vmem:[%s4905_s0 + $0x1a0] sm:$0xff]   ;;  %v2396_v46 = vrot.slane %v2394_v17, 4  ;;  %v2395_v21 = vsel %vm4952_vm4, %v3577_v7, %v2394_v17  ;;  %v4441_v16 = vld [vmem:[%s4905_s0 + $0xf0] sm:$0xff]  }
  0xc7   : > { %4023 = vmatprep.subr.bf16.mxu0 %v4415_v15  ;;  %v1790_v39 = vsel %vm4952_vm4, %v1788_v38, %v1789_v23  ;;  %v5342_v56 = vld [vmem:[%s4903_s8 + $0x70] sm:$0xf]  ;;  %v4443_v18 = vld [vmem:[%s4905_s0 + $0x1f0] sm:$0xff]   ;;  %v4447_v23 = vld [vmem:[%s4905_s0 + $0x208] sm:$0xff]  }
  0xc8   : > { %3882 = vmatmul.mubr.bf16.gmra.mrb[4].mxu1 %v5071_v62  ;;  %v5294_v40 = vcombine.low %v1787_v55, %v1790_v39  ;;  %v2398_v1 = vsel %vm4952_vm4, %v2396_v46, %v2397_v47  ;;  %v5548_v24 = vld [vmem:[#allocation7_spill] sm:$0xff]  ;;  %v4445_v38 = vld [vmem:[%s4905_s0 + $0x1f8] sm:$0xff]   ;;  %v4448_v30 = vld [vmem:[%s4905_s0 + $0x210] sm:$0xff]   ;;  %v2779_v29 = vshrl.u32 %v5342_v56, 16 }
  0xc9   : > { %3898 = vmatpush3.bf16.msra.mxu1 %v4416_v22  ;;  %3885 = vmatprep.mubr.bf16.mxu1 %v5093_v34  ;;  %v5307_v22 = vcombine.low %v2395_v21, %v2398_v1  ;;  %v4446_v37 = vld [vmem:[%s4905_s0 + $0x200] sm:$0xff]   ;;  %v4452_v47 = vld [vmem:[%s4905_s0 + $0x230] sm:$0xff]   ;;  %v2974_v1 = vrot.slane %v5342_v56, 5 }
  0xca   : > { %3899 = vmatprep.subr.bf16.mxu1 %v4418_v19  ;;  %4024 = vmatpush3.bf16.msra.mxu0 %v4415_v15  ;;  %v4429_v15 = vld [vmem:[%s4905_s0 + $0x1c0] sm:$0xff]   ;;  %v2781_v55 = vrot.slane %v2779_v29, 4 }
  0xcb   : > { %4025 = vmatprep.subr.bf16.mxu0 %v4417_v42  ;;  %v1077_v39 = vld [vmem:[%s4903_s8 + $0x74] sm:$0x1] }
  0xcc   : > { %4010 = vmatmul.mubr.bf16.gmra.mrb[4].mxu0 %v5259_v6  ;;  %v2785_v46 = vshll.u32 %v1077_v39, 16 }
  0xcd   : > { %3900 = vmatpush3.bf16.msra.mxu1 %v4418_v19  ;;  %4013 = vmatprep.mubr.bf16.mxu0 %v5269_v59  ;;  %v4436_v19 = vld [vmem:[%s4905_s0 + $0xe0] sm:$0xff]  }
  0xce   : > { %3901 = vmatprep.subr.bf16.mxu1 %v4420_v58  ;;  %4026 = vmatpush3.bf16.msra.mxu0 %v4417_v42  ;;  %v5546_v42 = vld [vmem:[#allocation10_spill] sm:$0xff] }
  0xcf   : > { %4027 = vmatprep.subr.bf16.mxu0 %v4419_v33 }
  0xd0   : > { %3886 = vmatmul.mubr.bf16.gmra.mrb[8].mxu1 %v5125_v35 }
  0xd1   : > { %3902 = vmatpush3.bf16.msra.mxu1 %v4420_v58  ;;  %3889 = vmatprep.mubr.bf16.mxu1 %v5159_v60  ;;  %v4437_v58 = vld [vmem:[%s4905_s0 + $0x1e0] sm:$0xff]  }
  0xd2   : > { %3903 = vmatprep.subr.bf16.mxu1 %v4422_v51  ;;  %4028 = vmatpush3.bf16.msra.mxu0 %v4419_v33  ;;  %v5339_v33 = vld [vmem:[%s4903_s8 + $0x6c] sm:$0xf] }
  0xd3   : > { %4029 = vmatprep.subr.bf16.mxu0 %v4421_v14  ;;  %v3619_v31 = vcombine.low %v5339_v33, %v5342_v56 }
  0xd4   : > { %4014 = vmatmul.mubr.bf16.gmra.mrb[8].mxu0 %v5290_v44 }
  0xd5   : > { %3904 = vmatpush3.bf16.msra.mxu1 %v4422_v51  ;;  %4017 = vmatprep.mubr.bf16.mxu0 %v5294_v40  ;;  %v2766_v51 = vshrl.u32 %v5339_v33, 16 }
  0xd6   : > { %3905 = vmatprep.subr.bf16.mxu1 %v4424_v43  ;;  %4030 = vmatpush3.bf16.msra.mxu0 %v4421_v14 }
  0xd7   : > { %4031 = vmatprep.subr.bf16.mxu0 %v4423_v9  ;;  %v2768_v36 = vrot.slane %v2766_v51, 4  ;;  %v1091_v51 = vld [vmem:[#allocation2 + $0x68] sm:$0xff] }
  0xd8   : > { %3890 = vmatmul.mubr.bf16.gmra.mrb[12].mxu1 %v5181_v25 }
  0xd9   : > { %3906 = vmatpush3.bf16.msra.mxu1 %v4424_v43  ;;  %3909 = vmatprep.mubr.bf16.mxu1 %v3511_v13  ;;  %v4449_v13 = vld [vmem:[%s4905_s0 + $0x218] sm:$0xff]  }
  0xda   : > { %3907 = vmatprep.subr.bf16.mxu1 %v4426_v41  ;;  %4032 = vmatpush3.bf16.msra.mxu0 %v4423_v9 }
  0xdb   : > { %4033 = vmatprep.subr.bf16.mxu0 %v4425_v45 }
  0xdc   : > { %4018 = vmatmul.mubr.bf16.gmra.mrb[12].mxu0 %v5307_v22 }
  0xdd   : > { %3908 = vmatpush3.bf16.msra.mxu1 %v4426_v41  ;;  %4037 = vmatprep.mubr.bf16.mxu0 %v5022_v5  ;;  %v2787_v41 = vrot.slane %v2785_v46, 5 }
  0xde   : > { %3925 = vmatprep.subr.bf16.mxu1 %v4428_v50  ;;  %4034 = vmatpush3.bf16.msra.mxu0 %v4425_v45  ;;  %v2976_v45 = vrot.slane %v2974_v1, 4 }
  0xdf   : > { %4035 = vmatprep.subr.bf16.mxu0 %v4427_v3 }
  0xe0   : > { %3910 = vmatmul.mubr.bf16.vlgmr.msra.gmra.mrb[0].mxu1 %v5211_v4  ;;  %v5545_v4 = vld [vmem:[#allocation9_spill] sm:$0xff] }
  0xe1   : > { %3926 = vmatpush3.bf16.msra.mxu1 %v4428_v50  ;;  %3913 = vmatprep.mubr.bf16.mxu1 %v5232_v2  ;;  %v2977_v50 = vrot.slane %v1077_v39, 5 }
  0xe2   : > { %3927 = vmatprep.subr.bf16.mxu1 %v4430_v53  ;;  %4036 = vmatpush3.bf16.msra.mxu0 %v4427_v3 }
  0xe3   : > { %4053 = vmatprep.subr.bf16.mxu0 %v4429_v15 }
  0xe5   : > { %3928 = vmatpush3.bf16.msra.mxu1 %v4430_v53  ;;  %4038 = vmatmul.mubr.bf16.vlgmr.msra.gmra.mrb[0].mxu0 %v5544_v48 }
  0xe6   : > { %3929 = vmatprep.subr.bf16.mxu1 %v4432_v32  ;;  %4054 = vmatpush3.bf16.msra.mxu0 %v4429_v15 }
  0xe7   : > { %4041 = vmatprep.mubr.bf16.mxu0 %v5545_v4  ;;  %4055 = vmatprep.subr.bf16.mxu0 %v4431_v0 }
  0xe8   : > { %3914 = vmatmul.mubr.bf16.gmra.mrb[4].mxu1 %v5239_v57 }
  0xe9   : > { %3930 = vmatpush3.bf16.msra.mxu1 %v4432_v32  ;;  %3917 = vmatprep.mubr.bf16.mxu1 %v5259_v6 }
  0xea   : > { %3931 = vmatprep.subr.bf16.mxu1 %v4434_v8  ;;  %4056 = vmatpush3.bf16.msra.mxu0 %v4431_v0  ;;  %v1086_v0 = vld [vmem:[#allocation2 + $0x40] sm:$0xff] }
  0xeb   : > { %4057 = vmatprep.subr.bf16.mxu0 %v4433_v11 }
  0xed   : > { %3932 = vmatpush3.bf16.msra.mxu1 %v4434_v8  ;;  %4042 = vmatmul.mubr.bf16.gmra.mrb[4].mxu0 %v5546_v42 }
  0xee   : > { %3933 = vmatprep.subr.bf16.mxu1 %v4436_v19  ;;  %4058 = vmatpush3.bf16.msra.mxu0 %v4433_v11  ;;  %v1087_v11 = vld [vmem:[#allocation2 + $0x48] sm:$0xff] }
  0xef   : > { %4045 = vmatprep.mubr.bf16.mxu0 %v5547_v52  ;;  %4059 = vmatprep.subr.bf16.mxu0 %v4435_v20 }
  0xf0   : > { %3918 = vmatmul.mubr.bf16.gmra.mrb[8].mxu1 %v5269_v59 }
  0xf1   : > { %3934 = vmatpush3.bf16.msra.mxu1 %v4436_v19  ;;  %3921 = vmatprep.mubr.bf16.mxu1 %v5290_v44 }
  0xf2   : > { %3935 = vmatprep.subr.bf16.mxu1 %v4438_v49  ;;  %4060 = vmatpush3.bf16.msra.mxu0 %v4435_v20 }
  0xf3   : > { %4061 = vmatprep.subr.bf16.mxu0 %v4437_v58 }
  0xf5   : > { %3936 = vmatpush3.bf16.msra.mxu1 %v4438_v49  ;;  %4046 = vmatmul.mubr.bf16.gmra.mrb[8].mxu0 %v5139_v63 }
  0xf6   : > { %3937 = vmatprep.subr.bf16.mxu1 %v4441_v16  ;;  %4062 = vmatpush3.bf16.msra.mxu0 %v4437_v58 }
  0xf7   : > { %4049 = vmatprep.mubr.bf16.mxu0 %v5203_v26  ;;  %4063 = vmatprep.subr.bf16.mxu0 %v4439_v28 }
  0xf8   : > { %3922 = vmatmul.mubr.bf16.gmra.mrb[12].mxu1 %v5294_v40 }
  0xf9   : > { %3938 = vmatpush3.bf16.msra.mxu1 %v4441_v16  ;;  %3941 = vmatprep.mubr.bf16.mxu1 %v5548_v24 }
  0xfa   : > { %3939 = vmatprep.subr.bf16.mxu1 %v4444_v61  ;;  %4064 = vmatpush3.bf16.msra.mxu0 %v4439_v28 }
  0xfb   : > { %4065 = vmatprep.subr.bf16.mxu0 %v4443_v18 }
  0xfd   : > { %3940 = vmatpush3.bf16.msra.mxu1 %v4444_v61  ;;  %4050 = vmatmul.mubr.bf16.gmra.mrb[12].mxu0 %v3619_v31  ;;  %v1090_v31 = vld [vmem:[#allocation2 + $0x60] sm:$0xff] }
  0xfe   : > { %4117 = vmatprep.subr.bf16.mxu1 %v4446_v37  ;;  %4066 = vmatpush3.bf16.msra.mxu0 %v4443_v18 }
  0xff   : > { %4069 = vmatprep.mubr.bf16.mxu0 %v5030_v12  ;;  %4067 = vmatprep.subr.bf16.mxu0 %v4445_v38  ;;  %v2769_v12 = vshll.u32 %v5339_v33, 16 }
 0x100   : > { %3942 = vmatmul.mubr.bf16.vlgmr.msra.gmra.mrb[0].mxu1 %v5022_v5  ;;  %v2775_v5 = vshll.u32 %v5342_v56, 16 }
 0x101   : > { %4125 = vmatpush3.bf16.msra.mxu1 %v4446_v37  ;;  %3945 = vmatprep.mubr.bf16.mxu1 %v5544_v48  ;;  %v2771_v17 = vrot.slane %v2769_v12, 5 }
 0x102   : > { %4118 = vmatprep.subr.bf16.mxu1 %v4447_v23  ;;  %4068 = vmatpush3.bf16.msra.mxu0 %v4445_v38  ;;  %v2777_v14 = vrot.slane %v2775_v5, 5 }
 0x103   : > { %4085 = vmatprep.subr.bf16.mxu0 %v4446_v37  ;;  %v2772_v43 = vor.u32 %v2771_v17, %v2768_v36 }
 0x104   : > { %v2782_v7 = vor.u32 %v2781_v55, %v2777_v14 }
 0x105   : > { %4126 = vmatpush3.bf16.msra.mxu1 %v4447_v23  ;;  %4070 = vmatmul.mubr.bf16.vlgmr.msra.gmra.mrb[0].mxu0 %v5071_v62  ;;  %v4450_v62 = vld [vmem:[%s4905_s0 + $0x220] sm:$0xff]   ;;  %v2773_v9 = vrot.slane %v2772_v43, 4 }
 0x106   : > { %4119 = vmatprep.subr.bf16.mxu1 %v4448_v30  ;;  %4086 = vmatpush3.bf16.msra.mxu0 %v4446_v37 }
 0x107   : > { %4073 = vmatprep.mubr.bf16.mxu0 %v5093_v34  ;;  %4087 = vmatprep.subr.bf16.mxu0 %v4447_v23  ;;  %v4451_v34 = vld [vmem:[%s4905_s0 + $0x228] sm:$0xff]   ;;  %v2778_v21 = vsel %vm4981_vm5, %v2773_v9, %v2777_v14  ;;  %v1080_v9 = vld [vmem:[#allocation2 + $0x10] sm:$0xff] }
 0x108   : > { %3946 = vmatmul.mubr.bf16.gmra.mrb[4].mxu1 %v5545_v4 }
 0x109   : > { %4127 = vmatpush3.bf16.msra.mxu1 %v4448_v30  ;;  %3949 = vmatprep.mubr.bf16.mxu1 %v5546_v42 }
 0x10a   : > { %4120 = vmatprep.subr.bf16.mxu1 %v4449_v13  ;;  %4088 = vmatpush3.bf16.msra.mxu0 %v4447_v23  ;;  %v1093_v23 = vld [vmem:[#allocation2 + $0x78] sm:$0xff] }
 0x10b   : > { %4089 = vmatprep.subr.bf16.mxu0 %v4448_v30 }
 0x10d   : > { %4128 = vmatpush3.bf16.msra.mxu1 %v4449_v13  ;;  %4074 = vmatmul.mubr.bf16.gmra.mrb[4].mxu0 %v5125_v35  ;;  %v2783_v35 = vrot.slane %v2782_v7, 4 }
 0x10e   : > { %4121 = vmatprep.subr.bf16.mxu1 %v4450_v62  ;;  %4090 = vmatpush3.bf16.msra.mxu0 %v4448_v30 }
 0x10f   : > { %4077 = vmatprep.mubr.bf16.mxu0 %v5159_v60  ;;  %4091 = vmatprep.subr.bf16.mxu0 %v4449_v13  ;;  %v4453_v60 = vld [vmem:[%s4905_s0 + $0x238] sm:$0xff]  }
 0x110   : > { %3950 = vmatmul.mubr.bf16.gmra.mrb[8].mxu1 %v5547_v52 }
 0x111   : > { %4129 = vmatpush3.bf16.msra.mxu1 %v4450_v62  ;;  %3953 = vmatprep.mubr.bf16.mxu1 %v5139_v63  ;;  %v2788_v63 = vsel %vm4981_vm5, %v2783_v35, %v2787_v41 }
 0x112   : > { %4122 = vmatprep.subr.bf16.mxu1 %v4451_v34  ;;  %4092 = vmatpush3.bf16.msra.mxu0 %v4449_v13 }
 0x113   : > { %4093 = vmatprep.subr.bf16.mxu0 %v4450_v62 }
 0x115   : > { %4130 = vmatpush3.bf16.msra.mxu1 %v4451_v34  ;;  %4078 = vmatmul.mubr.bf16.gmra.mrb[8].mxu0 %v5181_v25  ;;  %v3644_v25 = vcombine.low %v2778_v21, %v2788_v63  ;;  %v1078_v21 = vld [vmem:[#allocation2] sm:$0xff] }
 0x116   : > { %4123 = vmatprep.subr.bf16.mxu1 %v4452_v47  ;;  %4094 = vmatpush3.bf16.msra.mxu0 %v4450_v62 }
 0x117   : > { %4081 = vmatprep.mubr.bf16.mxu0 %v5205_v54  ;;  %4095 = vmatprep.subr.bf16.mxu0 %v4451_v34  ;;  %v3653_v54 = vrot.slane %v5339_v33, 9  ;;  %v1092_v33 = vld [vmem:[#allocation2 + $0x70] sm:$0xff] }
 0x118   : > { %3954 = vmatmul.mubr.bf16.gmra.mrb[12].mxu1 %v5203_v26  ;;  %v2978_v26 = vsel %vm4952_vm4, %v2976_v45, %v2977_v50  ;;  %v1079_v50 = vld [vmem:[#allocation2 + $0x8] sm:$0xff] }
 0x119   : > { %4131 = vmatpush3.bf16.msra.mxu1 %v4452_v47  ;;  %4109 = vmatprep.mubr.bf16.mxu1 %v5290_v44  ;;  %v2975_v27 = vsel %vm4952_vm4, %v3653_v54, %v2974_v1 }
 0x11a   : > { %4124 = vmatprep.subr.bf16.mxu1 %v4453_v60  ;;  %4096 = vmatpush3.bf16.msra.mxu0 %v4451_v34  ;;  %v3670_v44 = vcombine.low %v2975_v27, %v2978_v26 }
 0x11b   : > { %4097 = vmatprep.subr.bf16.mxu0 %v4452_v47 }
 0x11d   : > { %4132 = vmatpush3.bf16.msra.mxu1 %v4453_v60  ;;  %4082 = vmatmul.mubr.bf16.gmra.mrb[12].mxu0 %v3644_v25  ;;  %v1081_v25 = vld [vmem:[#allocation2 + $0x18] sm:$0xff] }
 0x11e   : > { %4098 = vmatpush3.bf16.msra.mxu0 %v4452_v47  ;;  %4101 = vmatprep.mubr.bf16.mxu0 %v5232_v2 }
 0x11f   : > { %4099 = vmatprep.subr.bf16.mxu0 %v4453_v60 }
 0x120   : > { %4110 = vmatmul.mubr.bf16.vlgmr.msra.gmra.mrb[16].mxu1 %v5294_v40 }
 0x121   : > { %4113 = vmatprep.mubr.bf16.mxu1 %v5307_v22 }
 0x122   : > { %4100 = vmatpush3.bf16.msra.mxu0 %v4453_v60 }
 0x125   : > { %4102 = vmatmul.mubr.bf16.vlgmr.msra.gmra.mrb[0].mxu0 %v5239_v57  ;;  %v1088_v57 = vld [vmem:[#allocation2 + $0x50] sm:$0xff] }
 0x126   : > { %4105 = vmatprep.mubr.bf16.mxu0 %v5259_v6 }
 0x128   : > { %4114 = vmatmul.mubr.bf16.gmra.mrb[20].mxu1 %v3670_v44 }
 0x12d   : > { %4106 = vmatmul.mubr.bf16.gmra.mrb[4].mxu0 %v5269_v59  ;;  %v1089_v59 = vld [vmem:[#allocation2 + $0x58] sm:$0xff] }
 0x1d3   : > { %v3943_v2 = vpop.f32.mrb[0].mxu1 }
 0x1d4   : > { %v5394_v3 = vpop.f32.mrb[1].mxu1  ;;  %v4133_v45 = vadd.f32 %v3943_v2, %v1080_v9 }
 0x1d5   : > { %v5396_v40 = vpop.f32.mrb[2].mxu1  ;;  %v4135_v27 = vadd.f32 %v5394_v3, %v1078_v21 }
 0x1d6   : > { %v5398_v22 = vpop.f32.mrb[3].mxu1  ;;  %v4137_v44 = vadd.f32 %v5396_v40, %v1081_v25 }
 0x1db   : > { %v5400_v53 = vpop.f32.mrb[4].mxu1 }
 0x1dc   : > { %v5402_v10 = vpop.f32.mrb[5].mxu1 }
 0x1dd   : > { %v5404_v15 = vpop.f32.mrb[6].mxu1 }
 0x1de   : > { %v5406_v32 = vpop.f32.mrb[7].mxu1 }
 0x1e3   : > { %v3951_v6 = vpop.f32.mrb[8].mxu1 }
 0x1e4   : > { %v2138_v48 = vpop.f32.mrb[9].mxu1  ;;  %v4149_v4 = vadd.f32 %v3951_v6, %v1088_v57 }
 0x1e5   : > { %v3952_v8 = vpop.f32.mrb[10].mxu1  ;;  %v4152_v20 = vadd.f32 %v2138_v48, %v1086_v0  ;;  %v4139_v0 = vadd.f32 %v5398_v22, %v1079_v50 }
 0x1e6   : > { %v2141_v19 = vpop.f32.mrb[11].mxu1  ;;  %v4155_v42 = vadd.f32 %v3952_v8, %v1089_v59 }
 0x1e7   : > { %v4158_v52 = vadd.f32 %v2141_v19, %v1087_v11 }
 0x1e8   : > { %v4079_v49 = vpop.f32.mrb[8].mxu0 }
 0x1e9   : > { %v4150_v58 = vadd.f32 %v4149_v4, %v4079_v49  ;;  %v2924_v16 = vpop.f32.mrb[9].mxu0 }
 0x1ea   : > { %v4153_v28 = vadd.f32 %v4152_v20, %v2924_v16  ;;  %v4080_v61 = vpop.f32.mrb[10].mxu0  ;;  %v1084_v20 = vld [vmem:[#allocation2 + $0x30] sm:$0xff]  ;;  %v1085_v16 = vld [vmem:[#allocation2 + $0x38] sm:$0xff] }
 0x1eb   : > { %v3955_v56 = vpop.f32.mrb[12].mxu1  ;;  %v4156_v18 = vadd.f32 %v4155_v42, %v4080_v61  ;;  %v2927_v24 = vpop.f32.mrb[11].mxu0  ;;  %v1083_v61 = vld [vmem:[#allocation2 + $0x28] sm:$0xff] }
 0x1ec   : > { %v2154_v37 = vpop.f32.mrb[13].mxu1  ;;  %v4159_v38 = vadd.f32 %v4158_v52, %v2927_v24  ;;  %v4161_v13 = vadd.f32 %v3955_v56, %v1092_v33  ;;  %v1082_v52 = vld [vmem:[#allocation2 + $0x20] sm:$0xff] }
 0x1ed   : > { %v3956_v30 = vpop.f32.mrb[14].mxu1  ;;  %v4164_v29 = vadd.f32 %v2154_v37, %v1090_v31  ;;  %v4143_v33 = vadd.f32 %v5402_v10, %v1082_v52  ;;  %v4147_v37 = vadd.f32 %v5406_v32, %v1083_v61  ;;  %v5419_v10 = vld [vmem:[%s5510_s2] ss:$0 sm:$0xff] (!%p3679_p3) }
 0x1ee   : > { %v2157_v12 = vpop.f32.mrb[15].mxu1  ;;  %v4167_v5 = vadd.f32 %v3956_v30, %v1093_v23 }
 0x1ef   : > { %v4170_v36 = vadd.f32 %v2157_v12, %v1091_v51 }
 0x1f0   : > { %v4083_v62 = vpop.f32.mrb[12].mxu0 }
 0x1f1   : > { %v4162_v17 = vadd.f32 %v4161_v13, %v4083_v62  ;;  %v2940_v14 = vpop.f32.mrb[13].mxu0 }
 0x1f2   : > { %v4165_v55 = vadd.f32 %v4164_v29, %v2940_v14  ;;  %v4084_v39 = vpop.f32.mrb[14].mxu0 }
 0x1f3   : > { %v4111_v34 = vpop.f32.mrb[16].mxu1  ;;  %v4168_v43 = vadd.f32 %v4167_v5, %v4084_v39  ;;  %v2943_v7 = vpop.f32.mrb[15].mxu0 }
 0x1f4   : > { %v4151_v46 = vadd.f32 %v4150_v58, %v4111_v34  ;;  %v3114_v47 = vpop.f32.mrb[17].mxu1  ;;  %v4171_v35 = vadd.f32 %v4170_v36, %v2943_v7 }
 0x1f5   : > { %v4154_v41 = vadd.f32 %v4153_v28, %v3114_v47  ;;  %v4112_v60 = vpop.f32.mrb[18].mxu1  ;;  %v4141_v28 = vadd.f32 %v5400_v53, %v1084_v20 }
 0x1f6   : > { %3171 = vst [vmem:[#allocation2 + $0x50] sm:$0xff] %v4151_v46  ;;  %v4157_v63 = vadd.f32 %v4156_v18, %v4112_v60  ;;  %v3117_v1 = vpop.f32.mrb[19].mxu1  ;;  %v4145_v18 = vadd.f32 %v5404_v15, %v1085_v16  ;;  %v5424_v15 = vld [vmem:[%s5511_s3] ss:$0 sm:$0xff] (!%p3679_p3) }
 0x1f7   : > { %3169 = vst [vmem:[#allocation2 + $0x40] sm:$0xff] %v4154_v41  ;;  %v4160_v54 = vadd.f32 %v4159_v38, %v3117_v1 }
 0x1f8   : > { %3172 = vst [vmem:[#allocation2 + $0x58] sm:$0xff] %v4157_v63  ;;  %v4103_v26 = vpop.f32.mrb[0].mxu0 }
 0x1f9   : > { %3170 = vst [vmem:[#allocation2 + $0x48] sm:$0xff] %v4160_v54  ;;  %v4134_v57 = vadd.f32 %v4133_v45, %v4103_v26  ;;  %v3082_v6 = vpop.f32.mrb[1].mxu0 }
 0x1fa   : > { %v4136_v48 = vadd.f32 %v4135_v27, %v3082_v6  ;;  %v4104_v59 = vpop.f32.mrb[2].mxu0 }
 0x1fb   : > { %v4115_v8 = vpop.f32.mrb[20].mxu1  ;;  %3163 = vst [vmem:[#allocation2 + $0x10] sm:$0xff] %v4134_v57  ;;  %v4138_v4 = vadd.f32 %v4137_v44, %v4104_v59  ;;  %v3085_v11 = vpop.f32.mrb[3].mxu0 }
 0x1fc   : > { %v4163_v19 = vadd.f32 %v4162_v17, %v4115_v8  ;;  %v3130_v2 = vpop.f32.mrb[21].mxu1  ;;  %3161 = vst [vmem:[#allocation2] sm:$0xff] %v4136_v48  ;;  %v4140_v42 = vadd.f32 %v4139_v0, %v3085_v11 }
 0x1fd   : > { %v4166_v3 = vadd.f32 %v4165_v55, %v3130_v2  ;;  %v4116_v49 = vpop.f32.mrb[22].mxu1  ;;  %3164 = vst [vmem:[#allocation2 + $0x18] sm:$0xff] %v4138_v4  ;;  %v3191_v44 = vld [vmem:[#allocation2 + $0x50] sm:$0xff] (!%p3679_p3) }
 0x1fe   : > { %3175 = vst [vmem:[#allocation2 + $0x70] sm:$0xff] %v4163_v19  ;;  %v4169_v40 = vadd.f32 %v4168_v43, %v4116_v49  ;;  %v3133_v58 = vpop.f32.mrb[23].mxu1  ;;  %3162 = vst [vmem:[#allocation2 + $0x8] sm:$0xff] %v4140_v42  ;;  %v3189_v25 = vld [vmem:[#allocation2 + $0x40] sm:$0xff] (!%p3679_p3)  ;;  %v3214_v20 = vmul.f32 (!%p3679_p3), %v5419_v10, %v3191_v44 }
 0x1ff   : > { %3173 = vst [vmem:[#allocation2 + $0x60] sm:$0xff] %v4166_v3  ;;  %v4172_v22 = vadd.f32 %v4171_v35, %v3133_v58  ;;  %v3212_v19 = vmul.f32 (!%p3679_p3), %v5419_v10, %v3189_v25  ;;  %v3192_v42 = vld [vmem:[#allocation2 + $0x58] sm:$0xff] (!%p3679_p3) }
 0x200   : > { %3176 = vst [vmem:[#allocation2 + $0x78] sm:$0xff] %v4169_v40  ;;  %v4107_v56 = vpop.f32.mrb[4].mxu0  ;;  %3180 = sbr.rel (%p3679_p3) target bundleno = 539 (0x21b), region = 126  ;;  %v3190_v26 = vld [vmem:[#allocation2 + $0x48] sm:$0xff] (!%p3679_p3) }
 0x201   : > { %3174 = vst [vmem:[#allocation2 + $0x68] sm:$0xff] %v4172_v22  ;;  %v4142_v24 = vadd.f32 %v4141_v28, %v4107_v56  ;;  %v3098_v31 = vpop.f32.mrb[5].mxu0  ;;  %v3213_v2 = vmul.f32 (!%p3679_p3), %v5419_v10, %v3190_v26  ;;  %v3235_v16 = vadd.f32 (!%p3679_p3), %v5424_v15, %v3212_v19  ;;  %v3237_v28 = vadd.f32 (!%p3679_p3), %v5424_v15, %v3214_v20 }
 0x202   : > { %v4144_v38 = vadd.f32 %v4143_v33, %v3098_v31  ;;  %v4108_v23 = vpop.f32.mrb[6].mxu0  ;;  %v3183_v29 = vld [vmem:[#allocation2 + $0x10] sm:$0xff] (!%p3679_p3)  ;;  %v3215_v33 = vmul.f32 (!%p3679_p3), %v5419_v10, %v3192_v42 }
 0x203   : > { %3167 = vst [vmem:[#allocation2 + $0x30] sm:$0xff] %v4142_v24  ;;  %v4146_v30 = vadd.f32 %v4145_v18, %v4108_v23  ;;  %v3101_v13 = vpop.f32.mrb[7].mxu0  ;;  %v3181_v53 = vld [vmem:[#allocation2] sm:$0xff] (!%p3679_p3)  ;;  %v3206_v36 = vmul.f32 (!%p3679_p3), %v5419_v10, %v3183_v29  ;;  %v3236_v22 = vadd.f32 (!%p3679_p3), %v5424_v15, %v3213_v2  ;;  %vm3251_vm14 = vcmp.gt.f32.partialorder (!%p3679_p3), %v3235_v16, 0.0 }
 0x204   : > { %3165 = vst [vmem:[#allocation2 + $0x20] sm:$0xff] %v4144_v38  ;;  %v4148_v51 = vadd.f32 %v4147_v37, %v3101_v13  ;;  %v3204_v32 = vmul.f32 (!%p3679_p3), %v5419_v10, %v3181_v53  ;;  %v3184_v5 = vld [vmem:[#allocation2 + $0x18] sm:$0xff] (!%p3679_p3)  ;;  %v3267_v37 = vmul.f32 (!%p3679_p3), 0.01, %v3235_v16  ;;  %vm3253_vm0 = vcmp.gt.f32.partialorder (!%p3679_p3), %v3237_v28, 0.0 }
 0x205   : > { %3168 = vst [vmem:[#allocation2 + $0x38] sm:$0xff] %v4146_v30  ;;  %v3182_v12 = vld [vmem:[#allocation2 + $0x8] sm:$0xff] (!%p3679_p3)  ;;  %v3207_v17 = vmul.f32 (!%p3679_p3), %v5419_v10, %v3184_v5  ;;  %v3229_v35 = vadd.f32 (!%p3679_p3), %v5424_v15, %v3206_v36  ;;  %v3195_v24 = vld [vmem:[#allocation2 + $0x70] sm:$0xff] (!%p3679_p3)  ;;  %vm3252_vm15 = vcmp.gt.f32.partialorder (!%p3679_p3), %v3236_v22, 0.0  ;;  %v3268_v38 = vmul.f32 (!%p3679_p3), 0.01, %v3236_v22 }
 0x206   : > { %3166 = vst [vmem:[#allocation2 + $0x28] sm:$0xff] %v4148_v51  ;;  %v3205_v62 = vmul.f32 (!%p3679_p3), %v5419_v10, %v3182_v12  ;;  %v3227_v34 = vadd.f32 (!%p3679_p3), %v5424_v15, %v3204_v32  ;;  %v3193_v3 = vld [vmem:[#allocation2 + $0x60] sm:$0xff] (!%p3679_p3)  ;;  %v3269_v23 = vmul.f32 (!%p3679_p3), 0.01, %v3237_v28  ;;  %v3238_v30 = vadd.f32 (!%p3679_p3), %v5424_v15, %v3215_v33 }
 0x207   : > { %v3230_v41 = vadd.f32 %v5424_v15, %v3207_v17  ;;  %vm3245_vm8 = vcmp.gt.f32.partialorder %v3229_v35, 0.0  ;;  %v3261_v45 = vmul.f32 0.01, %v3229_v35  ;;  %v3216_v56 = vmul.f32 %v5419_v10, %v3193_v3  ;;  %v3196_v12 = vld [vmem:[#allocation2 + $0x78] sm:$0xff] }
 0x208   : > { %v3228_v9 = vadd.f32 %v5424_v15, %v3205_v62  ;;  %vm3243_vm6 = vcmp.gt.f32.partialorder %v3227_v34, 0.0  ;;  %v3259_v21 = vmul.f32 0.01, %v3227_v34  ;;  %v3194_v49 = vld [vmem:[#allocation2 + $0x68] sm:$0xff]  ;;  %v3283_v13 = vsel %vm3251_vm14, %v3235_v16, %v3267_v37 }
 0x209   : > { %vm3246_vm9 = vcmp.gt.f32.partialorder %v3230_v41, 0.0  ;;  %v3262_v27 = vmul.f32 0.01, %v3230_v41  ;;  %v3277_v6 = vsel %vm3245_vm8, %v3229_v35, %v3261_v45  ;;  %v3217_v18 = vmul.f32 %v5419_v10, %v3194_v49  ;;  %3299 = vst [vmem:[%s4901_s29 + $0x40] sm:$0xff] %v3283_v13 }
 0x20a   : > { %v3187_v39 = vld [vmem:[#allocation2 + $0x30] sm:$0xff]  ;;  %vm3244_vm7 = vcmp.gt.f32.partialorder %v3228_v9, 0.0  ;;  %v3260_v54 = vmul.f32 0.01, %v3228_v9  ;;  %v3275_v50 = vsel %vm3243_vm6, %v3227_v34, %v3259_v21  ;;  %3293 = vst [vmem:[%s4901_s29 + $0x10] sm:$0xff] %v3277_v6  ;;  %v3239_v51 = vadd.f32 %v5424_v15, %v3216_v56 }
 0x20b   : > { %v3185_v14 = vld [vmem:[#allocation2 + $0x20] sm:$0xff]  ;;  %v3210_v46 = vmul.f32 %v5419_v10, %v3187_v39  ;;  %3291 = vst [vmem:[%s4901_s29] sm:$0xff] %v3275_v50  ;;  %v3278_v48 = vsel %vm3246_vm9, %v3230_v41, %v3262_v27  ;;  %v3240_v53 = vadd.f32 %v5424_v15, %v3217_v18  ;;  %v3218_v32 = vmul.f32 %v5419_v10, %v3195_v24 }
 0x20c   : > { %v3208_v43 = vmul.f32 %v5419_v10, %v3185_v14  ;;  %v3188_v47 = vld [vmem:[#allocation2 + $0x38] sm:$0xff]  ;;  %v3276_v57 = vsel %vm3244_vm7, %v3228_v9, %v3260_v54  ;;  %3294 = vst [vmem:[%s4901_s29 + $0x18] sm:$0xff] %v3278_v48  ;;  %v3284_v29 = vsel %vm3252_vm15, %v3236_v22, %v3268_v38  ;;  %v3285_v5 = vsel %vm3253_vm0, %v3237_v28, %v3269_v23 }
 0x20d   : > { %v3186_v55 = vld [vmem:[#allocation2 + $0x28] sm:$0xff]  ;;  %v3211_v60 = vmul.f32 %v5419_v10, %v3188_v47  ;;  %3292 = vst [vmem:[%s4901_s29 + $0x8] sm:$0xff] %v3276_v57  ;;  %v3233_v8 = vadd.f32 %v5424_v15, %v3210_v46  ;;  %vm3254_vm1 = vcmp.gt.f32.partialorder %v3238_v30, 0.0  ;;  %v3270_v62 = vmul.f32 0.01, %v3238_v30  ;;  %3300 = vst [vmem:[%s4901_s29 + $0x48] sm:$0xff] %v3284_v29 }
 0x20e   : > { %v3209_v7 = vmul.f32 %v5419_v10, %v3186_v55  ;;  %v3231_v63 = vadd.f32 %v5424_v15, %v3208_v43  ;;  %3301 = vst [vmem:[%s4901_s29 + $0x50] sm:$0xff] %v3285_v5  ;;  %vm3255_vm2 = vcmp.gt.f32.partialorder %v3239_v51, 0.0  ;;  %v3271_v36 = vmul.f32 0.01, %v3239_v51 }
 0x20f   : > { %v3234_v4 = vadd.f32 %v5424_v15, %v3211_v60  ;;  %vm3249_vm12 = vcmp.gt.f32.partialorder %v3233_v8, 0.0  ;;  %v3265_v40 = vmul.f32 0.01, %v3233_v8  ;;  %vm3256_vm3 = vcmp.gt.f32.partialorder %v3240_v53, 0.0 }
 0x210   : > { %v3232_v1 = vadd.f32 %v5424_v15, %v3209_v7  ;;  %vm3247_vm10 = vcmp.gt.f32.partialorder %v3231_v63, 0.0  ;;  %v3263_v0 = vmul.f32 0.01, %v3231_v63  ;;  %v3272_v17 = vmul.f32 0.01, %v3240_v53 }
 0x211   : > { %vm3250_vm13 = vcmp.gt.f32.partialorder %v3234_v4, 0.0  ;;  %v3266_v58 = vmul.f32 0.01, %v3234_v4  ;;  %v3281_v61 = vsel %vm3249_vm12, %v3233_v8, %v3265_v40  ;;  %v3286_v14 = vsel %vm3254_vm1, %v3238_v30, %v3270_v62 }
 0x212   : > { %vm3248_vm11 = vcmp.gt.f32.partialorder %v3232_v1, 0.0  ;;  %v3264_v59 = vmul.f32 0.01, %v3232_v1  ;;  %v3279_v11 = vsel %vm3247_vm10, %v3231_v63, %v3263_v0  ;;  %3297 = vst [vmem:[%s4901_s29 + $0x30] sm:$0xff] %v3281_v61  ;;  %v3241_v55 = vadd.f32 %v5424_v15, %v3218_v32  ;;  %3302 = vst [vmem:[%s4901_s29 + $0x58] sm:$0xff] %v3286_v14 }
 0x213   : > { %3295 = vst [vmem:[%s4901_s29 + $0x20] sm:$0xff] %v3279_v11  ;;  %v3282_v31 = vsel %vm3250_vm13, %v3234_v4, %v3266_v58  ;;  %v3219_v39 = vmul.f32 %v5419_v10, %v3196_v12  ;;  %v3287_v34 = vsel %vm3255_vm2, %v3239_v51, %v3271_v36  ;;  %v3288_v43 = vsel %vm3256_vm3, %v3240_v53, %v3272_v17 }
 0x214   : > { %v3280_v52 = vsel %vm3248_vm11, %v3232_v1, %v3264_v59  ;;  %3298 = vst [vmem:[%s4901_s29 + $0x38] sm:$0xff] %v3282_v31  ;;  %3303 = vst [vmem:[%s4901_s29 + $0x60] sm:$0xff] %v3287_v34  ;;  %vm3257_vm4 = vcmp.gt.f32.partialorder %v3241_v55, 0.0  ;;  %v3273_v7 = vmul.f32 0.01, %v3241_v55 }
 0x215   : > { %3296 = vst [vmem:[%s4901_s29 + $0x28] sm:$0xff] %v3280_v52  ;;  %3304 = vst [vmem:[%s4901_s29 + $0x68] sm:$0xff] %v3288_v43  ;;  %v3242_v46 = vadd.f32 %v5424_v15, %v3219_v39 }
 0x216   : > { %v3289_v47 = vsel %vm3257_vm4, %v3241_v55, %v3273_v7 }
 0x217   : > { %vm3258_vm5 = vcmp.gt.f32.partialorder %v3242_v46, 0.0  ;;  %v3274_v9 = vmul.f32 0.01, %v3242_v46  ;;  %3305 = vst [vmem:[%s4901_s29 + $0x70] sm:$0xff] %v3289_v47 }
 0x219   : > { %v3290_v35 = vsel %vm3258_vm5, %v3242_v46, %v3274_v9 }
 0x21a   : > { %3306 = vst [vmem:[%s4901_s29 + $0x78] sm:$0xff] %v3290_v35 }
 0x21b PF: > { %s14_s25 = sadd.s32 1, %s4540_s25   ;;  %s5549_s9 = sld [smem:[#allocation5_spill]] }
 0x21c   : > { %p11_p4 = scmp.ge.s32.totalorder %s14_s25, 10   ;;  %s5550_s10 = sld [smem:[#allocation6_spill]] }
 0x21d   : > { %s5551_s15 = smov %s4504_s16  ;;  %s5552_s16 = smov %s4647_s7 }
 0x21e   : > { %s5553_s17 = smov %s4512_s18  ;;  %s5554_s18 = smov %s4659_s13 }
 0x21f   : > { %s5555_s19 = smov %s4528_s22  ;;  %s5556_s20 = smov %s4532_s23 }
 0x220   : > { %s5557_s21 = smov %s4536_s24  ;;  %s5558_s22 = smov %s5562_s26 }
 0x221   : > { %s5559_s23 = smov %s5549_s9  ;;  %13 = sbr.rel (!%p11_p4) target bundleno = 8 (0x8), region = 177 }
 0x222   : > { %s5560_s24 = smov %s5550_s10 }

// kernel: _lambda_.7
= control target key start
LH: loop header
LB: loop body
LE: loop exit
PB: predicated region body
PF: predicated region fallthrough
CT: control target
= control target key end

     0   :  { %9 = vsyncpa [#allocation4], 0  ;;  %s4646_s0 = inlined_call_operand.vmem [shape: bf16[2,2,10,18,128], index: 0, kind: input, shape index: {}]   ;;  %s4647_s1 = inlined_call_operand.vmem [shape: bf16[3,3,128,128], index: 1, kind: input, shape index: {}]   ;;  %s4648_s2 = inlined_call_operand.vmem [shape: f32[1,128], index: 2, kind: input, shape index: {}]   ;;  %s4649_s3 = inlined_call_operand.vmem [shape: f32[1,128], index: 3, kind: input, shape index: {}]   ;;  %s4650_s4 = inlined_call_operand.hbm [shape: f32[2,2,128,128], index: 4, kind: output, shape index: {}]  }
   0x1   :  { %11 = vsyncpa [#allocation4 + $0x1], 0  ;;  %s3778_s15 = smov 0   ;;  %s3780_s16 = smov 0  }
   0x2   :  { %s3782_s17 = smov 0   ;;  %s3784_s18 = smov 0  }
   0x3   :  { %s3786_s19 = smov 0   ;;  %s3788_s20 = smov 0  }
   0x4   :  { %s3790_s21 = smov 0   ;;  %s3792_s22 = smov 0  }
   0x5 LB: > { %s2665_s23 = sadd.s32 4294967295, %s3748_s22   ;;  %s2666_s24 = sadd.s32 4294967294, %s3748_s22   ;;  %s3748_s22 = sphi %s3792_s22, %s17_s22   ;;  %s3744_s21 = sphi %s3790_s21, %s4679_s21   ;;  %s3740_s20 = sphi %s3788_s20, %s4678_s20   ;;  %s3736_s19 = sphi %s3786_s19, %s4677_s19   ;;  %s3732_s18 = sphi %s3784_s18, %s4676_s18   ;;  %s3728_s17 = sphi %s3782_s17, %s4675_s17   ;;  %s3724_s16 = sphi %s3780_s16, %s4674_s16   ;;  %s3720_s15 = sphi %s3778_s15, %s4673_s15  }
   0x6   : > { %s32_s25 = sadd.s32 1, %s3740_s20  ;;  %s36_s26 = sadd.s32 1, %s3744_s21 }
   0x7   : > { %p34_p0 = scmp.ge.s32.totalorder %s32_s25, 2  ;;  %p153_p1 = scmp.ne.s32.totalorder %s3728_s17, %s3724_s16 }
   0x8   : > { %p154_p2 = scmp.eq.s32.totalorder %s2665_s23, 3  ;;  %p159_p5 = scmp.ne.s32.totalorder %s3724_s16, %s3720_s15 }
   0x9   : > { %s4681_s25 = smov (%p34_p0, %s32_s25), 0  ;;  %s4683_s26 = smov (!%p34_p0, %s36_s26), %s3744_s21 }
   0xa   : > { %s139_s27 = ssub.s32 %s3740_s20, %s4681_s25  ;;  %p3829_p3 = por %p154_p2, %p153_p1 }
   0xb   : > { %p38_p4 = scmp.ge.s32.totalorder %s4683_s26, 2  ;;  %p160_p6 = scmp.eq.s32.totalorder %s2666_s24, 3 }
   0xc   : > { %p2670_p7 = scmp.ge.s32.totalorder %s3748_s22, 1  ;;  %p208_p9 = scmp.lt.s32.totalorder %s3748_s22, 5 }
   0xd   : > { %s4685_s26 = smov (%p38_p4, %s4683_s26), 0  ;;  %p3838_p8 = por %p160_p6, %p159_p5 }
   0xe   : > { %s138_s30 = ssub.s32 %s3744_s21, %s4685_s26  ;;  %s143_s5 = sadd.s32 1, %s3728_s17 }
   0xf   : > { %s140_s6 = sor.u32 %s139_s27, %s138_s30  ;;  %p209_p10 = pnand %p2670_p7, %p208_p9 }
  0x10   : > { %p141_p11 = scmp.eq.s32.totalorder %s140_s6, 0 }
  0x11   : > { %212 = sbr.rel (%p209_p10) target bundleno = 441 (0x1b9), region = 36 }
  0x12   : > { %s3847_s7 = scalar_select %p141_p11, %s3728_s17, %s143_s5  }
  0x18   : > { %v3572_v0 = vld [vmem:[%s4647_s1] sm:$0xff]   ;;  %p246_p12 = scmp.lt.s32.totalorder %s3736_s19, 1  ;;  %p248_p13 = scmp.lt.s32.totalorder %s3732_s18, 1  ;;  %v3574_v2 = vld [vmem:[%s4647_s1 + $0x8] sm:$0xff]   ;;  %v3576_v4 = vld [vmem:[%s4647_s1 + $0x10] sm:$0xff]   ;;  %vm969_vm0 = vcmask 1042432  }
  0x19   : > { %v3573_v1 = vld [vmem:[%s4647_s1 + $0x100] sm:$0xff]   ;;  %3065 = vmatprep.subr.bf16.mxu1 %v3572_v0  ;;  %v3575_v3 = vld [vmem:[%s4647_s1 + $0x108] sm:$0xff]   ;;  %v3577_v5 = vld [vmem:[%s4647_s1 + $0x110] sm:$0xff]   ;;  %vm970_vm1 = vcmask 1046532   ;;  %vm556_vm2 = vsmask.f32 3328 }
  0x1a   : > { %s247_s14 = scalar_select %p246_p12, %s3736_s19, 1  ;;  %3193 = vmatprep.subr.bf16.mxu0 %v3573_v1  ;;  %3066 = vmatpush3.bf16.msra.mxu1 %v3572_v0  ;;  %v3578_v6 = vld [vmem:[%s4647_s1 + $0x18] sm:$0xff]   ;;  %v3580_v8 = vld [vmem:[%s4647_s1 + $0x20] sm:$0xff]   ;;  %v3582_v10 = vld [vmem:[%s4647_s1 + $0x28] sm:$0xff]   ;;  %vm557_vm3 = vsmask.f32 7440 }
  0x1b   : > { %s249_s27 = scalar_select %p248_p13, %s3732_s18, 1  ;;  %3194 = vmatpush3.bf16.msra.mxu0 %v3573_v1  ;;  %3067 = vmatprep.subr.bf16.mxu1 %v3574_v2  ;;  %v3579_v7 = vld [vmem:[%s4647_s1 + $0x118] sm:$0xff]   ;;  %v3581_v9 = vld [vmem:[%s4647_s1 + $0x120] sm:$0xff]   ;;  %v3583_v14 = vld [vmem:[%s4647_s1 + $0x128] sm:$0xff]  }
  0x1c   : > { %s3498_s6 = smul.u32 60, %s247_s14  ;;  %3195 = vmatprep.subr.bf16.mxu0 %v3575_v3  ;;  %v3584_v24 = vld [vmem:[%s4647_s1 + $0x30] sm:$0xff]   ;;  %vm3930_vm4 = vmor %vm969_vm0, %vm970_vm1  ;;  %v3586_v45 = vld [vmem:[%s4647_s1 + $0x38] sm:$0xff]   ;;  %s2916_s8 = sshll.u32 %s3732_s18, 4 }
  0x1d   : > { %s3497_s10 = smul.u32 30, %s249_s27  ;;  %v3585_v25 = vld [vmem:[%s4647_s1 + $0x130] sm:$0xff]   ;;  %v3587_v51 = vld [vmem:[%s4647_s1 + $0x138] sm:$0xff]   ;;  %vm3963_vm5 = vmor %vm556_vm2, %vm557_vm3  ;;  %s2917_s9 = sshll.u32 %s3736_s19, 5 }
  0x1e   : > { %3068 = vmatpush3.bf16.msra.mxu1 %v3574_v2  ;;  %v3590_v62 = vld [vmem:[%s4647_s1 + $0x40] sm:$0xff]   ;;  %v3609_v56 = vld [vmem:[%s4647_s1 + $0x170] sm:$0xff]   ;;  %s4564_s18 = sadd.s32 %s2917_s9, %s2916_s8  ;;  %s3750_s30 = smov [#allocation3]  }
  0x1f   : > { %s255_s11 = sadd.s32 %s3498_s6, %s3497_s10  ;;  %3196 = vmatpush3.bf16.msra.mxu0 %v3575_v3  ;;  %3069 = vmatprep.subr.bf16.mxu1 %v3576_v4  ;;  %v3591_v0 = vld [vmem:[%s4647_s1 + $0x140] sm:$0xff]   ;;  %s2918_s19 = sshll.u32 %s4564_s18, 7 }
  0x20   : > { %3197 = vmatprep.subr.bf16.mxu0 %v3577_v5  ;;  %s2672_s14 = sshll.u32 %s255_s11, 2  ;;  %s4585_s13 = scalar_lea.hbm %s4650_s4, %s2918_s19 }
  0x21   : > { %s3886_s10 = scalar_lea.vmem %s4646_s0, %s2672_s14  ;;  %s243_s14 = sand.u32 1, %s3724_s16  }
  0x22   : > { %3070 = vmatpush3.bf16.msra.mxu1 %v3576_v4  ;;  %v285_v11 = vld [vmem:[%s3886_s10] sm:$0xf]  ;;  %v3893_v12 = vld [vmem:[%s3886_s10 + $0x4] sm:$0xf]  ;;  %v3896_v13 = vld [vmem:[%s3886_s10 + $0xc] sm:$0xf] }
  0x23   : > { %3198 = vmatpush3.bf16.msra.mxu0 %v3577_v5  ;;  %3071 = vmatprep.subr.bf16.mxu1 %v3578_v6  ;;  %v2673_v15 = vcombine.low %v285_v11, %v3893_v12  ;;  %v560_v16 = vshrl.u32 %v285_v11, 16  ;;  %v563_v17 = vshll.u32 %v285_v11, 16  ;;  %v569_v18 = vshll.u32 %v3893_v12, 16  ;;  %v3904_v19 = vld [vmem:[%s3886_s10 + $0x10] sm:$0xf]  ;;  %s2671_s27 = sshll.u32 %s243_s14, 7 }
  0x24   : > { %3199 = vmatprep.subr.bf16.mxu0 %v3579_v7  ;;  %v573_v20 = vshrl.u32 %v3893_v12, 16  ;;  %v2721_v21 = vrot.slane %v285_v11, 9  ;;  %v3908_v22 = vld [vmem:[%s3886_s10 + $0x14] sm:$0x1]  ;;  %v584_v23 = vshrl.u32 %v3896_v13, 16  ;;  %v4651_v28 = vrot.slane %v3893_v12, 5 }
  0x25   : > { %3081 = vmatprep.mubr.bf16.mxu1 %v2673_v15  ;;  %v3917_v26 = vrot.slane %v560_v16, 4  ;;  %v3919_v27 = vrot.slane %v563_v17, 5  ;;  %v587_v30 = vshll.u32 %v3896_v13, 16  ;;  %v3923_v31 = vrot.slane %v569_v18, 5  ;;  %v3937_v38 = vld [vmem:[%s3886_s10 + $0x18] sm:$0xf] }
  0x26   : > { %3072 = vmatpush3.bf16.msra.mxu1 %v3578_v6  ;;  %v586_v29 = vrot.slane %v584_v23, 4  ;;  %v593_v32 = vshll.u32 %v3904_v19, 16  ;;  %v597_v33 = vshrl.u32 %v3904_v19, 16  ;;  %v603_v34 = vshll.u32 %v3908_v22, 16  ;;  %v3946_v43 = vld [vmem:[%s3886_s10 + $0x1c] sm:$0xf] }
  0x27   : > { %3200 = vmatpush3.bf16.msra.mxu0 %v3579_v7  ;;  %3073 = vmatprep.subr.bf16.mxu1 %v3580_v8  ;;  %v3934_v36 = vrot.slane %v573_v20, 4  ;;  %v589_v37 = vrot.slane %v587_v30, 5  ;;  %v3943_v39 = vsel %vm3930_vm4, %v2721_v21, %v4651_v28  ;;  %v608_v44 = vshrl.u32 %v3937_v38, 16  ;;  %v3953_v47 = vld [vmem:[%s3886_s10 + $0x20] sm:$0x1]  ;;  %v3592_v16 = vld [vmem:[%s4647_s1 + $0x48] sm:$0xff]  }
  0x28   : > { %3201 = vmatprep.subr.bf16.mxu0 %v3581_v9  ;;  %v595_v40 = vrot.slane %v593_v32, 5  ;;  %v599_v41 = vrot.slane %v597_v33, 4  ;;  %v605_v42 = vrot.slane %v603_v34, 5  ;;  %v611_v48 = vshll.u32 %v3937_v38, 16  ;;  %v3978_v4 = vld [vmem:[%s3886_s10 + $0x24] sm:$0xf] }
  0x29   : > { %v590_v46 = vor.u32 %v589_v37, %v586_v29  ;;  %v617_v49 = vshll.u32 %v3946_v43, 16  ;;  %v621_v50 = vshrl.u32 %v3946_v43, 16  ;;  %v610_v54 = vrot.slane %v608_v44, 4  ;;  %v3987_v7 = vld [vmem:[%s3886_s10 + $0x28] sm:$0xf]  ;;  %s4529_s6 = scalar_lea.vmem [#allocation3], %s2671_s27 }
  0x2a   : > { %3074 = vmatpush3.bf16.msra.mxu1 %v3580_v8  ;;  %v600_v53 = vor.u32 %v599_v41, %v595_v40  ;;  %v627_v55 = vshll.u32 %v3953_v47, 16  ;;  %v613_v58 = vrot.slane %v611_v48, 5  ;;  %v3984_v6 = vcombine.low %v3896_v13, %v3904_v19  ;;  %v3990_v8 = vld [vmem:[%s3886_s10 + $0x2c] sm:$0x1]  ;;  %v4015_v33 = vld [vmem:[%s3886_s10 + $0x30] sm:$0xf] }
  0x2b   : > { %3202 = vmatpush3.bf16.msra.mxu0 %v3581_v9  ;;  %3075 = vmatprep.subr.bf16.mxu1 %v3582_v10  ;;  %v591_v57 = vrot.slane %v590_v46, 4  ;;  %v619_v59 = vrot.slane %v617_v49, 5  ;;  %v623_v60 = vrot.slane %v621_v50, 4  ;;  %v632_v9 = vshrl.u32 %v3978_v4, 16  ;;  %v3593_v29 = vld [vmem:[%s4647_s1 + $0x148] sm:$0xff]   ;;  %s4594_s23 = scalar_lea.sflag [#allocation4], %s243_s14 }
  0x2c   : > { %3203 = vmatprep.subr.bf16.mxu0 %v3583_v14  ;;  %v601_v61 = vrot.slane %v600_v53, 4  ;;  %v629_v63 = vrot.slane %v627_v55, 5  ;;  %v614_v2 = vor.u32 %v613_v58, %v610_v54  ;;  %4663 = vst [vmem:[#allocation6_spill] sm:$0xff] %v3984_v6  ;;  %v641_v17 = vshll.u32 %v3987_v7, 16  ;;  %v4018_v34 = vld [vmem:[%s3886_s10 + $0x34] sm:$0xf] }
  0x2d   : > { %v596_v1 = vsel %vm3963_vm5, %v591_v57, %v595_v40  ;;  %v624_v3 = vor.u32 %v623_v60, %v619_v59  ;;  %v634_v18 = vrot.slane %v632_v9, 4  ;;  %v645_v21 = vshrl.u32 %v3987_v7, 16  ;;  %v4023_v44 = vld [vmem:[%s3886_s10 + $0x38] sm:$0x1]  ;;  %v3597_v57 = vld [vmem:[%s4647_s1 + $0x150] sm:$0xff]   ;;  %s3658_s5 = sshll.u32 %s3750_s30, 4  ;;  %s3659_s5 = int_to_ptr.vmem [resolvable:$false] %s3658_s5 }
  0x2e   : > { %3076 = vmatpush3.bf16.msra.mxu1 %v3582_v10  ;;  %v606_v5 = vsel %vm3963_vm5, %v601_v61, %v605_v42  ;;  %v635_v10 = vshll.u32 %v3978_v4, 16  ;;  %v651_v23 = vshll.u32 %v3990_v8, 16  ;;  %v4012_v30 = vcombine.low %v3937_v38, %v3946_v43  ;;  %v4053_v9 = vld [vmem:[%s3886_s10 + $0x40] sm:$0xf]  ;;  %v4157_v28 = vld [vmem:[%s3886_s10 + $0x64] sm:$0xf] }
  0x2f   : > { %3204 = vmatpush3.bf16.msra.mxu0 %v3583_v14  ;;  %3077 = vmatprep.subr.bf16.mxu1 %v3584_v24  ;;  %v3994_v11 = vcombine.low %v596_v1, %v606_v5  ;;  %v615_v14 = vrot.slane %v614_v2, 4  ;;  %v625_v15 = vrot.slane %v624_v3, 4  ;;  %v643_v32 = vrot.slane %v641_v17, 5  ;;  %v4050_v3 = vld [vmem:[%s3886_s10 + $0x3c] sm:$0xf]  ;;  %s3660_s27 = scalar_lea.vmem %s3659_s5, 4096 }
  0x30   : > { %3205 = vmatprep.subr.bf16.mxu0 %v3585_v25  ;;  %v637_v20 = vrot.slane %v635_v10, 5  ;;  %v647_v41 = vrot.slane %v645_v21, 4  ;;  %v653_v42 = vrot.slane %v651_v23, 5  ;;  %v656_v46 = vshrl.u32 %v4015_v33, 16  ;;  %v4056_v10 = vld [vmem:[%s3886_s10 + $0x44] sm:$0x1] }
  0x31   : > { %3209 = vmatprep.mubr.bf16.mxu0 %v3994_v11  ;;  %v659_v48 = vshll.u32 %v4015_v33, 16  ;;  %v665_v49 = vshll.u32 %v4018_v34, 16  ;;  %v669_v50 = vshrl.u32 %v4018_v34, 16  ;;  %v4036_v54 = vcombine.low %v3978_v4, %v3987_v7 }
  0x32   : > { %3078 = vmatpush3.bf16.msra.mxu1 %v3584_v24  ;;  %v620_v24 = vsel %vm3963_vm5, %v615_v14, %v619_v59  ;;  %v638_v40 = vor.u32 %v637_v20, %v634_v18  ;;  %v648_v53 = vor.u32 %v647_v41, %v643_v32  ;;  %v675_v55 = vshll.u32 %v4023_v44, 16 }
  0x33   : > { %3206 = vmatpush3.bf16.msra.mxu0 %v3585_v25  ;;  %3079 = vmatprep.subr.bf16.mxu1 %v3586_v45  ;;  %v630_v25 = vsel %vm3963_vm5, %v625_v15, %v629_v63  ;;  %v658_v58 = vrot.slane %v656_v46, 4  ;;  %v661_v59 = vrot.slane %v659_v48, 5  ;;  %v667_v60 = vrot.slane %v665_v49, 5  ;;  %v4074_v46 = vld [vmem:[%s3886_s10 + $0x48] sm:$0xf] }
  0x34   : > { %3207 = vmatprep.subr.bf16.mxu0 %v3587_v51  ;;  %v4020_v37 = vcombine.low %v620_v24, %v630_v25  ;;  %v671_v61 = vrot.slane %v669_v50, 4  ;;  %v649_v63 = vrot.slane %v648_v53, 4  ;;  %v677_v1 = vrot.slane %v675_v55, 5  ;;  %v4085_v53 = vld [vmem:[%s3886_s10 + $0x4c] sm:$0xf] }
  0x35   : > { %v4047_v2 = vcombine.low %v4015_v33, %v4018_v34  ;;  %v680_v14 = vshrl.u32 %v4050_v3, 16  ;;  %v683_v15 = vshll.u32 %v4050_v3, 16  ;;  %v689_v18 = vshll.u32 %v4053_v9, 16  ;;  %v4088_v55 = vld [vmem:[%s3886_s10 + $0x50] sm:$0x1] }
  0x36   : > { %3080 = vmatpush3.bf16.msra.mxu1 %v3586_v45  ;;  %v3596_v45 = vld [vmem:[%s4647_s1 + $0x50] sm:$0xff]   ;;  %v672_v5 = vor.u32 %v671_v61, %v667_v60  ;;  %v654_v17 = vsel %vm3963_vm5, %v649_v63, %v653_v42  ;;  %v693_v20 = vshrl.u32 %v4053_v9, 16  ;;  %v699_v21 = vshll.u32 %v4056_v10, 16 }
  0x37   : > { %3208 = vmatpush3.bf16.msra.mxu0 %v3587_v51  ;;  %3097 = vmatprep.subr.bf16.mxu1 %v3590_v62  ;;  %v639_v51 = vrot.slane %v638_v40, 4  ;;  %v3599_v40 = vld [vmem:[%s4647_s1 + $0x158] sm:$0xff]   ;;  %v685_v41 = vrot.slane %v683_v15, 5  ;;  %v691_v42 = vrot.slane %v689_v18, 5  ;;  %v707_v63 = vshll.u32 %v4074_v46, 16 }
  0x38   : > { %3225 = vmatprep.subr.bf16.mxu0 %v3591_v0  ;;  %v673_v25 = vrot.slane %v672_v5, 4  ;;  %v717_v5 = vshrl.u32 %v4085_v53, 16 }
  0x39   : > { %3082 = vmatmul.mubr.bf16.vlgmr.msra.gmra.mrb[0].mxu1 %v3984_v6  ;;  %v4165_v6 = vld [vmem:[%s3886_s10 + $0x68] sm:$0x1] }
  0x3a   : > { %3210 = vmatmul.mubr.bf16.vlgmr.msra.gmra.mrb[0].mxu0 %v4020_v37  ;;  %3098 = vmatpush3.bf16.msra.mxu1 %v3590_v62  ;;  %v644_v62 = vsel %vm3963_vm5, %v639_v51, %v643_v32  ;;  %v682_v32 = vrot.slane %v680_v14, 4  ;;  %v678_v50 = vsel %vm3963_vm5, %v673_v25, %v677_v1  ;;  %v701_v51 = vrot.slane %v699_v21, 5 }
  0x3b   : > { %3226 = vmatpush3.bf16.msra.mxu0 %v3591_v0  ;;  %3099 = vmatprep.subr.bf16.mxu1 %v3592_v16  ;;  %v662_v0 = vor.u32 %v661_v59, %v658_v58  ;;  %v4065_v23 = vcombine.low %v644_v62, %v654_v17  ;;  %v704_v58 = vshrl.u32 %v4074_v46, 16  ;;  %v723_v14 = vshll.u32 %v4088_v55, 16 }
  0x3c   : > { %3227 = vmatprep.subr.bf16.mxu0 %v3593_v29  ;;  %3085 = vmatprep.mubr.bf16.mxu1 %v4012_v30  ;;  %v686_v61 = vor.u32 %v685_v41, %v682_v32  ;;  %v709_v17 = vrot.slane %v707_v63, 5  ;;  %v3604_v32 = vld [vmem:[%s4647_s1 + $0x68] sm:$0xff]  }
  0x3d   : > { %v663_v24 = vrot.slane %v662_v0, 4  ;;  %3213 = vmatprep.mubr.bf16.mxu0 %v4065_v23  ;;  %v706_v1 = vrot.slane %v704_v58, 4  ;;  %v713_v0 = vshll.u32 %v4085_v53, 16  ;;  %v725_v25 = vrot.slane %v723_v14, 5 }
  0x3e   : > { %3100 = vmatpush3.bf16.msra.mxu1 %v3592_v16  ;;  %v3598_v16 = vld [vmem:[%s4647_s1 + $0x58] sm:$0xff]   ;;  %v4123_v58 = vcombine.low %v4074_v46, %v4085_v53 }
  0x3f   : > { %3228 = vmatpush3.bf16.msra.mxu0 %v3593_v29  ;;  %3101 = vmatprep.subr.bf16.mxu1 %v3596_v45  ;;  %v695_v29 = vrot.slane %v693_v20, 4  ;;  %v668_v49 = vsel %vm3963_vm5, %v663_v24, %v667_v60  ;;  %v3602_v60 = vld [vmem:[%s4647_s1 + $0x60] sm:$0xff]   ;;  %v4109_v20 = vcombine.low %v4050_v3, %v4053_v9  ;;  %v715_v21 = vrot.slane %v713_v0, 5 }
  0x40   : > { %3229 = vmatprep.subr.bf16.mxu0 %v3597_v57  ;;  %v4091_v59 = vcombine.low %v668_v49, %v678_v50  ;;  %v719_v24 = vrot.slane %v717_v5, 4  ;;  %v710_v49 = vor.u32 %v709_v17, %v706_v1  ;;  %v3605_v50 = vld [vmem:[%s4647_s1 + $0x168] sm:$0xff]   ;;  %4665 = vst [vmem:[#allocation8_spill] sm:$0xff] %v4123_v58 }
  0x41   : > { %3086 = vmatmul.mubr.bf16.gmra.mrb[4].mxu1 %v4036_v54  ;;  %v696_v62 = vor.u32 %v695_v29, %v691_v42  ;;  %4664 = vst [vmem:[#allocation7_spill] sm:$0xff] %v4109_v20 }
  0x42   : > { %3102 = vmatpush3.bf16.msra.mxu1 %v3596_v45  ;;  %3089 = vmatprep.mubr.bf16.mxu1 %v4047_v2  ;;  %v687_v45 = vrot.slane %v686_v61, 4  ;;  %v4126_v61 = vld [vmem:[%s3886_s10 + $0x54] sm:$0xf]  ;;  %v711_v0 = vrot.slane %v710_v49, 4 }
  0x43   : > { %3230 = vmatpush3.bf16.msra.mxu0 %v3597_v57  ;;  %3103 = vmatprep.subr.bf16.mxu1 %v3598_v16  ;;  %v697_v15 = vrot.slane %v696_v62, 4  ;;  %v3603_v57 = vld [vmem:[%s4647_s1 + $0x160] sm:$0xff]   ;;  %v4129_v62 = vld [vmem:[%s3886_s10 + $0x58] sm:$0xf]  ;;  %v728_v63 = vshrl.u32 %v4126_v61, 16  ;;  %v731_v1 = vshll.u32 %v4126_v61, 16 }
  0x44   : > { %3214 = vmatmul.mubr.bf16.gmra.mrb[4].mxu0 %v4091_v59  ;;  %3231 = vmatprep.subr.bf16.mxu0 %v3599_v40  ;;  %v692_v41 = vsel %vm3963_vm5, %v687_v45, %v691_v42  ;;  %v720_v42 = vor.u32 %v719_v24, %v715_v21  ;;  %v737_v5 = vshll.u32 %v4129_v62, 16  ;;  %v741_v14 = vshrl.u32 %v4129_v62, 16 }
  0x45   : > { %v702_v29 = vsel %vm3963_vm5, %v697_v15, %v701_v51  ;;  %v4134_v51 = vld [vmem:[%s3886_s10 + $0x5c] sm:$0x1]  ;;  %v730_v15 = vrot.slane %v728_v63, 4  ;;  %v733_v17 = vrot.slane %v731_v1, 5  ;;  %v4145_v24 = vcombine.low %v4126_v61, %v4129_v62 }
  0x46   : > { %3104 = vmatpush3.bf16.msra.mxu1 %v3598_v16  ;;  %v4131_v16 = vcombine.low %v692_v41, %v702_v29  ;;  %v721_v45 = vrot.slane %v720_v42, 4  ;;  %v3608_v41 = vld [vmem:[%s4647_s1 + $0x70] sm:$0xff]   ;;  %v4151_v29 = vld [vmem:[%s3886_s10 + $0x60] sm:$0xf]  ;;  %v716_v49 = vsel %vm3963_vm5, %v711_v0, %v715_v21  ;;  %v739_v42 = vrot.slane %v737_v5, 5 }
  0x47   : > { %3232 = vmatpush3.bf16.msra.mxu0 %v3599_v40  ;;  %3105 = vmatprep.subr.bf16.mxu1 %v3602_v60  ;;  %v747_v40 = vshll.u32 %v4134_v51, 16  ;;  %v743_v63 = vrot.slane %v741_v14, 4  ;;  %v734_v48 = vor.u32 %v733_v17, %v730_v15  ;;  %v1426_v21 = vshll.u32 %v4151_v29, 16 }
  0x48   : > { %3233 = vmatprep.subr.bf16.mxu0 %v3603_v57  ;;  %3217 = vmatprep.mubr.bf16.mxu0 %v4131_v16  ;;  %v726_v18 = vsel %vm3963_vm5, %v721_v45, %v725_v25  ;;  %v1432_v14 = vshll.u32 %v4157_v28, 16  ;;  %v1442_v25 = vshll.u32 %v4165_v6, 16 }
  0x49   : > { %3090 = vmatmul.mubr.bf16.gmra.mrb[8].mxu1 %v4109_v20  ;;  %v749_v1 = vrot.slane %v747_v40, 5  ;;  %v4169_v0 = vcombine.low %v716_v49, %v726_v18  ;;  %v744_v5 = vor.u32 %v743_v63, %v739_v42  ;;  %v1436_v40 = vshrl.u32 %v4157_v28, 16  ;;  %v3610_v18 = vld [vmem:[%s4647_s1 + $0x78] sm:$0xff]  }
  0x4a   : > { %3106 = vmatpush3.bf16.msra.mxu1 %v3602_v60  ;;  %3093 = vmatprep.mubr.bf16.mxu1 %v4123_v58  ;;  %v1423_v60 = vshrl.u32 %v4151_v29, 16  ;;  %v735_v58 = vrot.slane %v734_v48, 4  ;;  %v1434_v15 = vrot.slane %v1432_v14, 5  ;;  %v4666_v49 = vor.u32 %v3919_v27, %v3917_v26 }
  0x4b   : > { %3234 = vmatpush3.bf16.msra.mxu0 %v3603_v57  ;;  %3107 = vmatprep.subr.bf16.mxu1 %v3604_v32  ;;  %v1428_v57 = vrot.slane %v1426_v21, 5  ;;  %v745_v45 = vrot.slane %v744_v5, 4  ;;  %v1438_v17 = vrot.slane %v1436_v40, 4  ;;  %v1444_v21 = vrot.slane %v1442_v25, 5  ;;  %v4187_v5 = vld [vmem:[%s3886_s10 + $0x8] sm:$0x1] }
  0x4c   : > { %3235 = vmatprep.subr.bf16.mxu0 %v3605_v50  ;;  %v1425_v20 = vrot.slane %v1423_v60, 4  ;;  %3218 = vmatmul.mubr.bf16.gmra.mrb[8].mxu0 %v4169_v0  ;;  %v567_v63 = vrot.slane %v4666_v49, 4  ;;  %v740_v48 = vsel %vm3963_vm5, %v735_v58, %v739_v42  ;;  %v4667_v26 = vor.u32 %v3934_v36, %v3923_v31 }
  0x4d   : > { %v750_v14 = vsel %vm3963_vm5, %v745_v45, %v749_v1  ;;  %v1439_v40 = vor.u32 %v1438_v17, %v1434_v15  ;;  %v2722_v42 = vrot.slane %v3896_v13, 9  ;;  %v984_v36 = vrot.slane %v3908_v22, 5 }
  0x4e   : > { %3108 = vmatpush3.bf16.msra.mxu1 %v3604_v32  ;;  %v1429_v60 = vor.u32 %v1428_v57, %v1425_v20  ;;  %v3611_v32 = vld [vmem:[%s4647_s1 + $0x178] sm:$0xff]   ;;  %v577_v27 = vrot.slane %v4667_v26, 4  ;;  %v4195_v58 = vcombine.low %v740_v48, %v750_v14  ;;  %v981_v57 = vrot.slane %v3904_v19, 5  ;;  %v3612_v48 = vld [vmem:[%s4647_s1 + $0x80] sm:$0xff]  }
  0x4f   : > { %3236 = vmatpush3.bf16.msra.mxu0 %v3605_v50  ;;  %3109 = vmatprep.subr.bf16.mxu1 %v3608_v41  ;;  %v579_v50 = vshll.u32 %v4187_v5, 16  ;;  %v1440_v25 = vrot.slane %v1439_v40, 4  ;;  %v572_v1 = vsel %vm3963_vm5, %v567_v63, %v3923_v31  ;;  %v988_v19 = vrot.slane %v3946_v43, 5  ;;  %v3613_v14 = vld [vmem:[%s4647_s1 + $0x180] sm:$0xff]  }
  0x50   : > { %3237 = vmatprep.subr.bf16.mxu0 %v3609_v56  ;;  %v1430_v20 = vrot.slane %v1429_v60, 4  ;;  %3221 = vmatprep.mubr.bf16.mxu0 %v4195_v58  ;;  %v982_v13 = vsel %vm3930_vm4, %v2722_v42, %v981_v57  ;;  %v983_v49 = vrot.slane %v981_v57, 4  ;;  %v2723_v31 = vrot.slane %v3937_v38, 9 }
  0x51   : > { %3094 = vmatmul.mubr.bf16.gmra.mrb[12].mxu1 %v4145_v24  ;;  %v581_v45 = vrot.slane %v579_v50, 5  ;;  %v2724_v60 = vrot.slane %v3978_v4, 9  ;;  %v990_v38 = vrot.slane %v988_v19, 4  ;;  %v995_v40 = vrot.slane %v3987_v7, 5 }
  0x52   : > { %3110 = vmatpush3.bf16.msra.mxu1 %v3608_v41  ;;  %v1435_v17 = vsel %vm3963_vm5, %v1430_v20, %v1434_v15  ;;  %v1445_v41 = vsel %vm3963_vm5, %v1440_v25, %v1444_v21  ;;  %v4217_v15 = vcombine.low %v4151_v29, %v4157_v28  ;;  %v985_v43 = vsel %vm3930_vm4, %v983_v49, %v984_v36 }
  0x53   : > { %3238 = vmatpush3.bf16.msra.mxu0 %v3609_v56  ;;  %3111 = vmatprep.subr.bf16.mxu1 %v3610_v18  ;;  %v582_v22 = vsel %vm3963_vm5, %v577_v27, %v581_v45  ;;  %v4219_v56 = vcombine.low %v1435_v17, %v1445_v41  ;;  %v4227_v21 = vcombine.low %v982_v13, %v985_v43  ;;  %v998_v26 = vrot.slane %v3990_v8, 5  ;;  %v3614_v27 = vld [vmem:[%s4647_s1 + $0x88] sm:$0xff]   ;;  %v3618_v13 = vld [vmem:[%s4647_s1 + $0x98] sm:$0xff]  }
  0x54   : > { %3239 = vmatprep.subr.bf16.mxu0 %v3611_v32  ;;  %v2705_v63 = vcombine.low %v572_v1, %v582_v22  ;;  %v1002_v4 = vrot.slane %v4018_v34, 5  ;;  %v4668_v50 = vrot.slane %v3953_v47, 5  ;;  %v997_v8 = vrot.slane %v995_v40, 4  ;;  %v3616_v47 = vld [vmem:[%s4647_s1 + $0x90] sm:$0xff]   ;;  %v3615_v1 = vld [vmem:[%s4647_s1 + $0x188] sm:$0xff]   ;;  %v3619_v43 = vld [vmem:[%s4647_s1 + $0x198] sm:$0xff]  }
  0x55   : > { %3222 = vmatmul.mubr.bf16.gmra.mrb[12].mxu0 %v4219_v56  ;;  %v996_v20 = vsel %vm3930_vm4, %v2724_v60, %v995_v40  ;;  %v1005_v25 = vrot.slane %v4023_v44, 5  ;;  %v1012_v17 = vrot.slane %v4056_v10, 5  ;;  %v1016_v49 = vrot.slane %v4085_v53, 5  ;;  %v3620_v53 = vld [vmem:[%s4647_s1 + $0xa0] sm:$0xff]  }
  0x56   : > { %3112 = vmatpush3.bf16.msra.mxu1 %v3610_v18  ;;  %3113 = vmatprep.mubr.bf16.mxu1 %v2705_v63  ;;  %v989_v18 = vsel %vm3930_vm4, %v2723_v31, %v988_v19  ;;  %v992_v7 = vsel %vm3930_vm4, %v990_v38, %v4668_v50  ;;  %v999_v34 = vsel %vm3930_vm4, %v997_v8, %v998_v26  ;;  %v1004_v57 = vrot.slane %v1002_v4, 4 }
  0x57   : > { %3240 = vmatpush3.bf16.msra.mxu0 %v3611_v32  ;;  %3241 = vmatprep.mubr.bf16.mxu0 %v4227_v21  ;;  %v1009_v32 = vrot.slane %v4053_v9, 5  ;;  %v4252_v42 = vcombine.low %v989_v18, %v992_v7  ;;  %v4263_v45 = vcombine.low %v996_v20, %v999_v34  ;;  %v2726_v9 = vrot.slane %v4050_v3, 9  ;;  %v3617_v3 = vld [vmem:[%s4647_s1 + $0x190] sm:$0xff]  }
  0x58   : > { %3129 = vmatprep.subr.bf16.mxu1 %v3612_v48  ;;  %3257 = vmatprep.subr.bf16.mxu0 %v3613_v14  ;;  %v1006_v44 = vsel %vm3930_vm4, %v1004_v57, %v1005_v25  ;;  %v1023_v41 = vrot.slane %v4129_v62, 5  ;;  %v2727_v31 = vrot.slane %v4074_v46, 9  ;;  %v1019_v63 = vrot.slane %v4088_v55, 5  ;;  %v3628_v25 = vld [vmem:[%s4647_s1 + $0xc0] sm:$0xff]  }
  0x59   : > { %3114 = vmatmul.mubr.bf16.vlgmr.msra.gmra.mrb[0].mxu1 %v3994_v11  ;;  %v2725_v11 = vrot.slane %v4015_v33, 9  ;;  %v1011_v36 = vrot.slane %v1009_v32, 4  ;;  %v1010_v10 = vsel %vm3930_vm4, %v2726_v9, %v1009_v32  ;;  %v2728_v60 = vrot.slane %v4126_v61, 9  ;;  %v3623_v32 = vld [vmem:[%s4647_s1 + $0x1a8] sm:$0xff]  }
  0x5a   : > { %3130 = vmatpush3.bf16.msra.mxu1 %v3612_v48  ;;  %3117 = vmatprep.mubr.bf16.mxu1 %v4020_v37  ;;  %v1018_v48 = vrot.slane %v1016_v49, 4  ;;  %v4669_v38 = vrot.slane %v3893_v12, 5  ;;  %v1025_v46 = vrot.slane %v1023_v41, 4  ;;  %v1026_v55 = vrot.slane %v4134_v51, 5  ;;  %v3622_v12 = vld [vmem:[%s4647_s1 + $0xa8] sm:$0xff]  }
  0x5b   : > { %3131 = vmatprep.subr.bf16.mxu1 %v3614_v27  ;;  %v1003_v33 = vsel %vm3930_vm4, %v2725_v11, %v1002_v4  ;;  %v1013_v19 = vsel %vm3930_vm4, %v1011_v36, %v1012_v17  ;;  %v1017_v61 = vsel %vm3930_vm4, %v2727_v31, %v1016_v49  ;;  %v1024_v4 = vsel %vm3930_vm4, %v2728_v60, %v1023_v41  ;;  %v3625_v11 = vld [vmem:[%s4647_s1 + $0x1b0] sm:$0xff]   ;;  %v3630_v9 = vld [vmem:[%s4647_s1 + $0xc8] sm:$0xff]   ;;  %v3629_v36 = vld [vmem:[%s4647_s1 + $0x1c0] sm:$0xff]  }
  0x5c   : > { %v4289_v22 = vcombine.low %v1003_v33, %v1006_v44  ;;  %v976_v62 = vrot.slane %v4669_v38, 4  ;;  %v4301_v40 = vcombine.low %v1010_v10, %v1013_v19  ;;  %v1020_v51 = vsel %vm3930_vm4, %v1018_v48, %v1019_v63  ;;  %v3632_v17 = vld [vmem:[%s4647_s1 + $0xd0] sm:$0xff]   ;;  %v3631_v33 = vld [vmem:[%s4647_s1 + $0x1c8] sm:$0xff]   ;;  %v3635_v49 = vld [vmem:[%s4647_s1 + $0x1d8] sm:$0xff]  }
  0x5d   : > { %3242 = vmatmul.mubr.bf16.vlgmr.msra.gmra.mrb[0].mxu0 %v4252_v42  ;;  %v1027_v18 = vsel %vm3930_vm4, %v1025_v46, %v1026_v55  ;;  %v4326_v50 = vcombine.low %v1017_v61, %v1020_v51  ;;  %v2811_v7 = vrot.slane %v4151_v29, 9  ;;  %v1634_v34 = vrot.slane %v4165_v6, 5  ;;  %v3633_v44 = vld [vmem:[%s4647_s1 + $0x1d0] sm:$0xff]   ;;  %v3638_v10 = vld [vmem:[%s4647_s1 + $0xe8] sm:$0xff]   ;;  %v3644_v63 = vld [vmem:[%s4647_s1 + $0xf8] sm:$0xff]  }
  0x5e   : > { %3132 = vmatpush3.bf16.msra.mxu1 %v3614_v27  ;;  %3258 = vmatpush3.bf16.msra.mxu0 %v3613_v14  ;;  %v977_v14 = vrot.slane %v4187_v5, 5  ;;  %v1631_v5 = vrot.slane %v4157_v28, 5  ;;  %v3624_v28 = vld [vmem:[%s4647_s1 + $0xb0] sm:$0xff]   ;;  %v4332_v8 = vcombine.low %v1024_v4, %v1027_v18  ;;  %v3639_v31 = vld [vmem:[%s4647_s1 + $0x1e8] sm:$0xff]   ;;  %v4672_v38 = vld [vmem:[#allocation6_spill] sm:$0xff] }
  0x5f   : > { %3133 = vmatprep.subr.bf16.mxu1 %v3616_v47  ;;  %3245 = vmatprep.mubr.bf16.mxu0 %v4263_v45  ;;  %v4671_v19 = vld [vmem:[#allocation8_spill] sm:$0xff]  ;;  %v3645_v46 = vld [vmem:[%s4647_s1 + $0x1f8] sm:$0xff]   ;;  %v3647_v55 = vld [vmem:[%s4647_s1 + $0x208] sm:$0xff]  }
  0x60   : > { %3259 = vmatprep.subr.bf16.mxu0 %v3615_v1  ;;  %v978_v26 = vsel %vm3930_vm4, %v976_v62, %v977_v14  ;;  %v1633_v20 = vrot.slane %v1631_v5, 4  ;;  %v1632_v29 = vsel %vm3930_vm4, %v2811_v7, %v1631_v5  ;;  %v3641_v41 = vld [vmem:[%s4647_s1 + $0xf0] sm:$0xff]   ;;  %v3646_v14 = vld [vmem:[%s4647_s1 + $0x200] sm:$0xff]  }
  0x61   : > { %3118 = vmatmul.mubr.bf16.gmra.mrb[4].mxu1 %v4065_v23  ;;  %v2745_v27 = vcombine.low %v3943_v39, %v978_v26  ;;  %v3621_v39 = vld [vmem:[%s4647_s1 + $0x1a0] sm:$0xff]   ;;  %v4416_v48 = vld [vmem:[%s3886_s10 + $0x70] sm:$0xf] }
  0x62   : > { %3134 = vmatpush3.bf16.msra.mxu1 %v3616_v47  ;;  %3121 = vmatprep.mubr.bf16.mxu1 %v4091_v59  ;;  %v3626_v47 = vld [vmem:[%s4647_s1 + $0xb8] sm:$0xff]   ;;  %v1635_v6 = vsel %vm3930_vm4, %v1633_v20, %v1634_v34  ;;  %v3643_v60 = vld [vmem:[%s4647_s1 + $0x1f0] sm:$0xff]  }
  0x63   : > { %3135 = vmatprep.subr.bf16.mxu1 %v3618_v13  ;;  %3260 = vmatpush3.bf16.msra.mxu0 %v3615_v1  ;;  %v4351_v57 = vcombine.low %v1632_v29, %v1635_v6  ;;  %v3627_v1 = vld [vmem:[%s4647_s1 + $0x1b8] sm:$0xff]   ;;  %v3648_v26 = vld [vmem:[%s4647_s1 + $0x210] sm:$0xff]  }
  0x64   : > { %3261 = vmatprep.subr.bf16.mxu0 %v3617_v3 }
  0x65   : > { %3246 = vmatmul.mubr.bf16.gmra.mrb[4].mxu0 %v4289_v22 }
  0x66   : > { %3136 = vmatpush3.bf16.msra.mxu1 %v3618_v13  ;;  %3249 = vmatprep.mubr.bf16.mxu0 %v4301_v40  ;;  %v3636_v13 = vld [vmem:[%s4647_s1 + $0xe0] sm:$0xff]  }
  0x67   : > { %3137 = vmatprep.subr.bf16.mxu1 %v3620_v53  ;;  %3262 = vmatpush3.bf16.msra.mxu0 %v3617_v3  ;;  %v4670_v3 = vld [vmem:[#allocation7_spill] sm:$0xff] }
  0x68   : > { %3263 = vmatprep.subr.bf16.mxu0 %v3619_v43 }
  0x69   : > { %3122 = vmatmul.mubr.bf16.gmra.mrb[8].mxu1 %v4131_v16 }
  0x6a   : > { %3138 = vmatpush3.bf16.msra.mxu1 %v3620_v53  ;;  %3125 = vmatprep.mubr.bf16.mxu1 %v4169_v0  ;;  %v3637_v53 = vld [vmem:[%s4647_s1 + $0x1e0] sm:$0xff]  }
  0x6b   : > { %3139 = vmatprep.subr.bf16.mxu1 %v3622_v12  ;;  %3264 = vmatpush3.bf16.msra.mxu0 %v3619_v43  ;;  %v4413_v43 = vld [vmem:[%s3886_s10 + $0x6c] sm:$0xf] }
  0x6c   : > { %3265 = vmatprep.subr.bf16.mxu0 %v3621_v39  ;;  %v2853_v62 = vcombine.low %v4413_v43, %v4416_v48 }
  0x6d   : > { %3250 = vmatmul.mubr.bf16.gmra.mrb[8].mxu0 %v4326_v50 }
  0x6e   : > { %3140 = vmatpush3.bf16.msra.mxu1 %v3622_v12  ;;  %3253 = vmatprep.mubr.bf16.mxu0 %v4332_v8  ;;  %v2012_v12 = vshll.u32 %v4416_v48, 16 }
  0x6f   : > { %3141 = vmatprep.subr.bf16.mxu1 %v3624_v28  ;;  %3266 = vmatpush3.bf16.msra.mxu0 %v3621_v39 }
  0x70   : > { %3267 = vmatprep.subr.bf16.mxu0 %v3623_v32  ;;  %v2014_v5 = vrot.slane %v2012_v12, 5 }
  0x71   : > { %3126 = vmatmul.mubr.bf16.gmra.mrb[12].mxu1 %v4195_v58 }
  0x72   : > { %3142 = vmatpush3.bf16.msra.mxu1 %v3624_v28  ;;  %3145 = vmatprep.mubr.bf16.mxu1 %v2745_v27  ;;  %v2006_v27 = vshll.u32 %v4413_v43, 16 }
  0x73   : > { %3143 = vmatprep.subr.bf16.mxu1 %v3626_v47  ;;  %3268 = vmatpush3.bf16.msra.mxu0 %v3623_v32 }
  0x74   : > { %3269 = vmatprep.subr.bf16.mxu0 %v3625_v11  ;;  %v2008_v51 = vrot.slane %v2006_v27, 5  ;;  %v4515_v27 = vld [vmem:[%s4649_s3] ss:$0 sm:$0xff] }
  0x75   : > { %3254 = vmatmul.mubr.bf16.gmra.mrb[12].mxu0 %v4351_v57 }
  0x76   : > { %3144 = vmatpush3.bf16.msra.mxu1 %v3626_v47  ;;  %3273 = vmatprep.mubr.bf16.mxu0 %v4012_v30 }
  0x77   : > { %3161 = vmatprep.subr.bf16.mxu1 %v3628_v25  ;;  %3270 = vmatpush3.bf16.msra.mxu0 %v3625_v11 }
  0x78   : > { %3271 = vmatprep.subr.bf16.mxu0 %v3627_v1 }
  0x79   : > { %3146 = vmatmul.mubr.bf16.vlgmr.msra.gmra.mrb[0].mxu1 %v4227_v21  ;;  %v3634_v21 = vld [vmem:[%s4647_s1 + $0xd8] sm:$0xff]  }
  0x7a   : > { %3162 = vmatpush3.bf16.msra.mxu1 %v3628_v25  ;;  %3149 = vmatprep.mubr.bf16.mxu1 %v4252_v42 }
  0x7b   : > { %3163 = vmatprep.subr.bf16.mxu1 %v3630_v9  ;;  %3272 = vmatpush3.bf16.msra.mxu0 %v3627_v1 }
  0x7c   : > { %3289 = vmatprep.subr.bf16.mxu0 %v3629_v36 }
  0x7e   : > { %3164 = vmatpush3.bf16.msra.mxu1 %v3630_v9  ;;  %3274 = vmatmul.mubr.bf16.vlgmr.msra.gmra.mrb[0].mxu0 %v4036_v54 }
  0x7f   : > { %3165 = vmatprep.subr.bf16.mxu1 %v3632_v17  ;;  %3290 = vmatpush3.bf16.msra.mxu0 %v3629_v36 }
  0x80   : > { %3277 = vmatprep.mubr.bf16.mxu0 %v4047_v2  ;;  %3291 = vmatprep.subr.bf16.mxu0 %v3631_v33 }
  0x81   : > { %3150 = vmatmul.mubr.bf16.gmra.mrb[4].mxu1 %v4263_v45 }
  0x82   : > { %3166 = vmatpush3.bf16.msra.mxu1 %v3632_v17  ;;  %3153 = vmatprep.mubr.bf16.mxu1 %v4289_v22 }
  0x83   : > { %3167 = vmatprep.subr.bf16.mxu1 %v3634_v21  ;;  %3292 = vmatpush3.bf16.msra.mxu0 %v3631_v33 }
  0x84   : > { %3293 = vmatprep.subr.bf16.mxu0 %v3633_v44 }
  0x86   : > { %3168 = vmatpush3.bf16.msra.mxu1 %v3634_v21  ;;  %3278 = vmatmul.mubr.bf16.gmra.mrb[4].mxu0 %v4670_v3 }
  0x87   : > { %3169 = vmatprep.subr.bf16.mxu1 %v3636_v13  ;;  %3294 = vmatpush3.bf16.msra.mxu0 %v3633_v44 }
  0x88   : > { %3281 = vmatprep.mubr.bf16.mxu0 %v4671_v19  ;;  %3295 = vmatprep.subr.bf16.mxu0 %v3635_v49 }
  0x89   : > { %3154 = vmatmul.mubr.bf16.gmra.mrb[8].mxu1 %v4301_v40 }
  0x8a   : > { %3170 = vmatpush3.bf16.msra.mxu1 %v3636_v13  ;;  %3157 = vmatprep.mubr.bf16.mxu1 %v4326_v50 }
  0x8b   : > { %3171 = vmatprep.subr.bf16.mxu1 %v3638_v10  ;;  %3296 = vmatpush3.bf16.msra.mxu0 %v3635_v49 }
  0x8c   : > { %3297 = vmatprep.subr.bf16.mxu0 %v3637_v53 }
  0x8e   : > { %3172 = vmatpush3.bf16.msra.mxu1 %v3638_v10  ;;  %3282 = vmatmul.mubr.bf16.gmra.mrb[8].mxu0 %v4145_v24 }
  0x8f   : > { %3173 = vmatprep.subr.bf16.mxu1 %v3641_v41  ;;  %3298 = vmatpush3.bf16.msra.mxu0 %v3637_v53 }
  0x90   : > { %3285 = vmatprep.mubr.bf16.mxu0 %v4217_v15  ;;  %3299 = vmatprep.subr.bf16.mxu0 %v3639_v31 }
  0x91   : > { %3158 = vmatmul.mubr.bf16.gmra.mrb[12].mxu1 %v4332_v8 }
  0x92   : > { %3174 = vmatpush3.bf16.msra.mxu1 %v3641_v41  ;;  %3177 = vmatprep.mubr.bf16.mxu1 %v4672_v38 }
  0x93   : > { %3175 = vmatprep.subr.bf16.mxu1 %v3644_v63  ;;  %3300 = vmatpush3.bf16.msra.mxu0 %v3639_v31 }
  0x94   : > { %3301 = vmatprep.subr.bf16.mxu0 %v3643_v60 }
  0x96   : > { %3176 = vmatpush3.bf16.msra.mxu1 %v3644_v63  ;;  %3286 = vmatmul.mubr.bf16.gmra.mrb[12].mxu0 %v2853_v62  ;;  %v4505_v62 = vld [vmem:[%s4648_s2] ss:$0 sm:$0xff] }
  0x97   : > { %3353 = vmatprep.subr.bf16.mxu1 %v3646_v14  ;;  %3302 = vmatpush3.bf16.msra.mxu0 %v3643_v60 }
  0x98   : > { %3305 = vmatprep.mubr.bf16.mxu0 %v4020_v37  ;;  %3303 = vmatprep.subr.bf16.mxu0 %v3645_v46  ;;  %v3649_v37 = vld [vmem:[%s4647_s1 + $0x218] sm:$0xff]  }
  0x99   : > { %3178 = vmatmul.mubr.bf16.vlgmr.msra.gmra.mrb[0].mxu1 %v4012_v30  ;;  %v2003_v30 = vshrl.u32 %v4413_v43, 16 }
  0x9a   : > { %3361 = vmatpush3.bf16.msra.mxu1 %v3646_v14  ;;  %3181 = vmatprep.mubr.bf16.mxu1 %v4036_v54  ;;  %v2016_v54 = vshrl.u32 %v4416_v48, 16 }
  0x9b   : > { %3354 = vmatprep.subr.bf16.mxu1 %v3647_v55  ;;  %3304 = vmatpush3.bf16.msra.mxu0 %v3645_v46  ;;  %v2005_v61 = vrot.slane %v2003_v30, 4 }
  0x9c   : > { %3321 = vmatprep.subr.bf16.mxu0 %v3646_v14  ;;  %v2018_v39 = vrot.slane %v2016_v54, 4 }
  0x9d   : > { %v2009_v4 = vor.u32 %v2008_v51, %v2005_v61 }
  0x9e   : > { %3362 = vmatpush3.bf16.msra.mxu1 %v3647_v55  ;;  %3306 = vmatmul.mubr.bf16.vlgmr.msra.gmra.mrb[0].mxu0 %v4065_v23  ;;  %v3650_v23 = vld [vmem:[%s4647_s1 + $0x220] sm:$0xff]   ;;  %v2019_v18 = vor.u32 %v2018_v39, %v2014_v5 }
  0x9f   : > { %3355 = vmatprep.subr.bf16.mxu1 %v3648_v26  ;;  %3322 = vmatpush3.bf16.msra.mxu0 %v3646_v14  ;;  %v2010_v7 = vrot.slane %v2009_v4, 4 }
  0xa0   : > { %3309 = vmatprep.mubr.bf16.mxu0 %v4091_v59  ;;  %3323 = vmatprep.subr.bf16.mxu0 %v3647_v55  ;;  %v314_v59 = vld [vmem:[%s3886_s10 + $0x74] sm:$0x1]  ;;  %v2020_v20 = vrot.slane %v2019_v18, 4  ;;  %s2559_s10 = sshll.u32 %s4529_s6, 4  ;;  %s4587_s10 = int_to_ptr.vmem [resolvable:$true] %s2559_s10 }
  0xa1   : > { %3182 = vmatmul.mubr.bf16.gmra.mrb[4].mxu1 %v4047_v2  ;;  %v3651_v2 = vld [vmem:[%s4647_s1 + $0x228] sm:$0xff]   ;;  %v2022_v28 = vshll.u32 %v314_v59, 16  ;;  %v2214_v6 = vrot.slane %v314_v59, 5  ;;  %s3654_s24 = scalar_lea.vmem %s4587_s10, 2048  ;;  %p3661_p4 = scmp.lt.s32.totalorder %s4587_s10, %s3659_s5 }
  0xa2   : > { %3363 = vmatpush3.bf16.msra.mxu1 %v3648_v26  ;;  %3185 = vmatprep.mubr.bf16.mxu1 %v4670_v3  ;;  %p3655_p0 = scmp.ne.s32.totalorder %s4587_s10, %s3654_s24  ;;  %p3662_p5 = scmp.lt.s32.totalorder %s3660_s27, %s3654_s24 }
  0xa3   : > { %3356 = vmatprep.subr.bf16.mxu1 %v3649_v37  ;;  %3324 = vmatpush3.bf16.msra.mxu0 %v3647_v55  ;;  %v2024_v34 = vrot.slane %v2022_v28, 5 }
  0xa4   : > { %3325 = vmatprep.subr.bf16.mxu0 %v3648_v26  ;;  %p3656_p1 = pnand %p3655_p0, %p3829_p3  ;;  %p3663_p6 = por %p3662_p5, %p3661_p4 }
  0xa5   : > { %v2025_v32 = vsel %vm3963_vm5, %v2020_v20, %v2024_v34 }
  0xa6   : > { %3364 = vmatpush3.bf16.msra.mxu1 %v3649_v37  ;;  %3310 = vmatmul.mubr.bf16.gmra.mrb[4].mxu0 %v4131_v16  ;;  %v3652_v16 = vld [vmem:[%s4647_s1 + $0x230] sm:$0xff]   ;;  %p3657_p2 = pneg %p3656_p1 }
  0xa7   : > { %3357 = vmatprep.subr.bf16.mxu1 %v3650_v23  ;;  %3326 = vmatpush3.bf16.msra.mxu0 %v3648_v26 }
  0xa8   : > { %3313 = vmatprep.mubr.bf16.mxu0 %v4169_v0  ;;  %3327 = vmatprep.subr.bf16.mxu0 %v3649_v37  ;;  %v3653_v0 = vld [vmem:[%s4647_s1 + $0x238] sm:$0xff]   ;;  %p3664_p7 = pnand %p3663_p6, %p3657_p2 }
  0xa9   : > { %3186 = vmatmul.mubr.bf16.gmra.mrb[8].mxu1 %v4671_v19 }
  0xaa   : > { %3365 = vmatpush3.bf16.msra.mxu1 %v3650_v23  ;;  %3189 = vmatprep.mubr.bf16.mxu1 %v4145_v24  ;;  %v2015_v24 = vsel %vm3963_vm5, %v2010_v7, %v2014_v5 }
  0xab   : > { %3358 = vmatprep.subr.bf16.mxu1 %v3651_v2  ;;  %3328 = vmatpush3.bf16.msra.mxu0 %v3649_v37  ;;  %v2878_v47 = vcombine.low %v2015_v24, %v2025_v32 }
  0xac   : > { %3329 = vmatprep.subr.bf16.mxu0 %v3650_v23 }
  0xae   : > { %3366 = vmatpush3.bf16.msra.mxu1 %v3651_v2  ;;  %3314 = vmatmul.mubr.bf16.gmra.mrb[8].mxu0 %v4195_v58  ;;  %v2211_v58 = vrot.slane %v4416_v48, 5 }
  0xaf   : > { %3359 = vmatprep.subr.bf16.mxu1 %v3652_v16  ;;  %3330 = vmatpush3.bf16.msra.mxu0 %v3650_v23 }
  0xb0   : > { %3317 = vmatprep.mubr.bf16.mxu0 %v4219_v56  ;;  %3331 = vmatprep.subr.bf16.mxu0 %v3651_v2  ;;  %v2887_v56 = vrot.slane %v4413_v43, 9  ;;  %v2213_v29 = vrot.slane %v2211_v58, 4 }
  0xb1   : > { %3190 = vmatmul.mubr.bf16.gmra.mrb[12].mxu1 %v4217_v15 }
  0xb2   : > { %3367 = vmatpush3.bf16.msra.mxu1 %v3652_v16  ;;  %3345 = vmatprep.mubr.bf16.mxu1 %v4326_v50  ;;  %v2212_v52 = vsel %vm3930_vm4, %v2887_v56, %v2211_v58  ;;  %v2215_v15 = vsel %vm3930_vm4, %v2213_v29, %v2214_v6 }
  0xb3   : > { %3360 = vmatprep.subr.bf16.mxu1 %v3653_v0  ;;  %3332 = vmatpush3.bf16.msra.mxu0 %v3651_v2  ;;  %v2904_v50 = vcombine.low %v2212_v52, %v2215_v15 }
  0xb4   : > { %3333 = vmatprep.subr.bf16.mxu0 %v3652_v16 }
  0xb6   : > { %3368 = vmatpush3.bf16.msra.mxu1 %v3653_v0  ;;  %3318 = vmatmul.mubr.bf16.gmra.mrb[12].mxu0 %v2878_v47 }
  0xb7   : > { %3334 = vmatpush3.bf16.msra.mxu0 %v3652_v16  ;;  %3337 = vmatprep.mubr.bf16.mxu0 %v4252_v42 }
  0xb8   : > { %3335 = vmatprep.subr.bf16.mxu0 %v3653_v0 }
  0xb9   : > { %3346 = vmatmul.mubr.bf16.vlgmr.msra.gmra.mrb[16].mxu1 %v4332_v8 }
  0xba   : > { %3349 = vmatprep.mubr.bf16.mxu1 %v4351_v57 }
  0xbb   : > { %3336 = vmatpush3.bf16.msra.mxu0 %v3653_v0 }
  0xbe   : > { %3338 = vmatmul.mubr.bf16.vlgmr.msra.gmra.mrb[0].mxu0 %v4263_v45 }
  0xbf   : > { %3341 = vmatprep.mubr.bf16.mxu0 %v4289_v22 }
  0xc1   : > { %3350 = vmatmul.mubr.bf16.gmra.mrb[20].mxu1 %v2904_v50 }
  0xc6   : > { %3342 = vmatmul.mubr.bf16.gmra.mrb[4].mxu0 %v4301_v40 }
 0x16c   : > { %v3179_v42 = vpop.f32.mrb[0].mxu1 }
 0x16d   : > { %v1343_v11 = vpop.f32.mrb[1].mxu1 }
 0x16e   : > { %v4488_v8 = vpop.f32.mrb[2].mxu1 }
 0x16f   : > { %v4490_v57 = vpop.f32.mrb[3].mxu1 }
 0x174   : > { %v4492_v25 = vpop.f32.mrb[4].mxu1 }
 0x175   : > { %v4494_v1 = vpop.f32.mrb[5].mxu1 }
 0x176   : > { %v4496_v35 = vpop.f32.mrb[6].mxu1 }
 0x177   : > { %v4498_v9 = vpop.f32.mrb[7].mxu1 }
 0x17c   : > { %v3187_v45 = vpop.f32.mrb[8].mxu1 }
 0x17d   : > { %v1375_v36 = vpop.f32.mrb[9].mxu1 }
 0x17e   : > { %v3188_v22 = vpop.f32.mrb[10].mxu1 }
 0x17f   : > { %v1378_v17 = vpop.f32.mrb[11].mxu1 }
 0x181   : > { %v3315_v33 = vpop.f32.mrb[8].mxu0 }
 0x182   : > { %v3377_v40 = vadd.f32 %v3315_v33, %v3187_v45  ;;  %v2161_v21 = vpop.f32.mrb[9].mxu0 }
 0x183   : > { %v3379_v44 = vadd.f32 %v2161_v21, %v1375_v36  ;;  %v3316_v13 = vpop.f32.mrb[10].mxu0 }
 0x184   : > { %v3191_v49 = vpop.f32.mrb[12].mxu1  ;;  %v3381_v3 = vadd.f32 %v3316_v13, %v3188_v22  ;;  %v2164_v10 = vpop.f32.mrb[11].mxu0 }
 0x185   : > { %v1391_v19 = vpop.f32.mrb[13].mxu1  ;;  %v3383_v53 = vadd.f32 %v2164_v10, %v1378_v17 }
 0x186   : > { %v3192_v41 = vpop.f32.mrb[14].mxu1 }
 0x187   : > { %v1394_v31 = vpop.f32.mrb[15].mxu1 }
 0x189   : > { %v3319_v63 = vpop.f32.mrb[12].mxu0 }
 0x18a   : > { %v3385_v43 = vadd.f32 %v3319_v63, %v3191_v49  ;;  %v2177_v48 = vpop.f32.mrb[13].mxu0 }
 0x18b   : > { %v4500_v60 = vadd.f32 %v2177_v48, %v1391_v19  ;;  %v3320_v38 = vpop.f32.mrb[14].mxu0 }
 0x18c   : > { %v3347_v14 = vpop.f32.mrb[16].mxu1  ;;  %v4507_v46 = vadd.f32 %v3320_v38, %v3192_v41  ;;  %v2180_v55 = vpop.f32.mrb[15].mxu0 }
 0x18d   : > { %v3378_v26 = vadd.f32 %v3377_v40, %v3347_v14  ;;  %v2351_v37 = vpop.f32.mrb[17].mxu1  ;;  %v4510_v30 = vadd.f32 %v2180_v55, %v1394_v31 }
 0x18e   : > { %v3380_v54 = vadd.f32 %v3379_v44, %v2351_v37  ;;  %v3348_v12 = vpop.f32.mrb[18].mxu1 }
 0x18f   : > { %v2450_v23 = vmul.f32 %v3378_v26, %v4505_v62  ;;  %v3382_v61 = vadd.f32 %v3381_v3, %v3348_v12  ;;  %v2354_v51 = vpop.f32.mrb[19].mxu1 }
 0x190   : > { %v2448_v5 = vmul.f32 %v3380_v54, %v4505_v62  ;;  %v3384_v39 = vadd.f32 %v3383_v53, %v2354_v51 }
 0x191   : > { %v2473_v59 = vadd.f32 %v4515_v27, %v2450_v23  ;;  %v2451_v2 = vmul.f32 %v3382_v61, %v4505_v62  ;;  %v3339_v4 = vpop.f32.mrb[0].mxu0 }
 0x192   : > { %v2471_v18 = vadd.f32 %v4515_v27, %v2448_v5  ;;  %v2449_v28 = vmul.f32 %v3384_v39, %v4505_v62  ;;  %v3369_v16 = vadd.f32 %v3339_v4, %v3179_v42  ;;  %v2319_v20 = vpop.f32.mrb[1].mxu0 }
 0x193   : > { %vm2489_vm6 = vcmp.gt.f32.partialorder %v2473_v59, 0.0  ;;  %v2505_v7 = vmul.f32 0.01, %v2473_v59  ;;  %v2474_v34 = vadd.f32 %v4515_v27, %v2451_v2  ;;  %v3370_v0 = vadd.f32 %v2319_v20, %v1343_v11  ;;  %v3340_v32 = vpop.f32.mrb[2].mxu0 }
 0x194   : > { %vm2487_vm7 = vcmp.gt.f32.partialorder %v2471_v18, 0.0  ;;  %v2503_v24 = vmul.f32 0.01, %v2471_v18  ;;  %v2472_v58 = vadd.f32 %v4515_v27, %v2449_v28  ;;  %v3351_v47 = vpop.f32.mrb[20].mxu1  ;;  %v2442_v56 = vmul.f32 %v3369_v16, %v4505_v62  ;;  %v2322_v52 = vpop.f32.mrb[3].mxu0 }
 0x195   : > { %v2521_v29 = vsel %vm2489_vm6, %v2473_v59, %v2505_v7  ;;  %v3371_v6 = vadd.f32 %v3340_v32, %v4488_v8  ;;  %vm2490_vm8 = vcmp.gt.f32.partialorder %v2474_v34, 0.0  ;;  %v2367_v15 = vpop.f32.mrb[21].mxu1  ;;  %v2440_v50 = vmul.f32 %v3370_v0, %v4505_v62 }
 0x196   : > { %2537 = vst [vmem:[%s4529_s6 + $0x50] sm:$0xff] %v2521_v29  ;;  %v2519_v42 = vsel %vm2487_vm7, %v2471_v18, %v2503_v24  ;;  %v2506_v11 = vmul.f32 0.01, %v2474_v34  ;;  %v3372_v45 = vadd.f32 %v2322_v52, %v4490_v57  ;;  %v3352_v36 = vpop.f32.mrb[22].mxu1  ;;  %v2465_v22 = vadd.f32 %v4515_v27, %v2442_v56 }
 0x197   : > { %2535 = vst [vmem:[%s4529_s6 + $0x40] sm:$0xff] %v2519_v42  ;;  %v2443_v8 = vmul.f32 %v3371_v6, %v4505_v62  ;;  %vm2488_vm9 = vcmp.gt.f32.partialorder %v2472_v58, 0.0  ;;  %v2504_v17 = vmul.f32 0.01, %v2472_v58  ;;  %v2370_v33 = vpop.f32.mrb[23].mxu1  ;;  %v2463_v40 = vadd.f32 %v4515_v27, %v2440_v50 }
 0x198   : > { %v2522_v21 = vsel %vm2490_vm8, %v2474_v34, %v2506_v11  ;;  %v2441_v44 = vmul.f32 %v3372_v45, %v4505_v62  ;;  %v3386_v13 = vadd.f32 %v3385_v43, %v3351_v47  ;;  %vm2481_vm10 = vcmp.gt.f32.partialorder %v2465_v22, 0.0 }
 0x199   : > { %v2497_v57 = vmul.f32 0.01, %v2465_v22  ;;  %v2466_v49 = vadd.f32 %v4515_v27, %v2443_v8  ;;  %2538 = vst [vmem:[%s4529_s6 + $0x58] sm:$0xff] %v2522_v21  ;;  %v2520_v3 = vsel %vm2488_vm9, %v2472_v58, %v2504_v17  ;;  %vm2479_vm11 = vcmp.gt.f32.partialorder %v2463_v40, 0.0  ;;  %v3343_v53 = vpop.f32.mrb[4].mxu0 }
 0x19a   : > { %v2495_v10 = vmul.f32 0.01, %v2463_v40  ;;  %v2464_v19 = vadd.f32 %v4515_v27, %v2441_v44  ;;  %2536 = vst [vmem:[%s4529_s6 + $0x48] sm:$0xff] %v2520_v3  ;;  %v2454_v41 = vmul.f32 %v3386_v13, %v4505_v62  ;;  %v3373_v43 = vadd.f32 %v3343_v53, %v4492_v25  ;;  %v2335_v48 = vpop.f32.mrb[5].mxu0 }
 0x19b   : > { %v2513_v31 = vsel %vm2481_vm10, %v2465_v22, %v2497_v57  ;;  %vm2482_vm12 = vcmp.gt.f32.partialorder %v2466_v49, 0.0  ;;  %v2498_v63 = vmul.f32 0.01, %v2466_v49  ;;  %v3344_v26 = vpop.f32.mrb[6].mxu0  ;;  %v3374_v12 = vadd.f32 %v2335_v48, %v4494_v1 }
 0x19c   : > { %2529 = vst [vmem:[%s4529_s6 + $0x10] sm:$0xff] %v2513_v31  ;;  %v2511_v38 = vsel %vm2479_vm11, %v2463_v40, %v2495_v10  ;;  %vm2480_vm13 = vcmp.gt.f32.partialorder %v2464_v19, 0.0  ;;  %v2496_v14 = vmul.f32 0.01, %v2464_v19  ;;  %v2477_v55 = vadd.f32 %v4515_v27, %v2454_v41  ;;  %v2338_v61 = vpop.f32.mrb[7].mxu0 }
 0x19d   : > { %2527 = vst [vmem:[%s4529_s6] sm:$0xff] %v2511_v38  ;;  %v2514_v37 = vsel %vm2482_vm12, %v2466_v49, %v2498_v63  ;;  %v2446_v54 = vmul.f32 %v3373_v43, %v4505_v62  ;;  %v3388_v23 = vadd.f32 %v4500_v60, %v2367_v15  ;;  %v3375_v5 = vadd.f32 %v3344_v26, %v4496_v35 }
 0x19e   : > { %2530 = vst [vmem:[%s4529_s6 + $0x18] sm:$0xff] %v2514_v37  ;;  %v2512_v25 = vsel %vm2480_vm13, %v2464_v19, %v2496_v14  ;;  %vm2493_vm14 = vcmp.gt.f32.partialorder %v2477_v55, 0.0  ;;  %v2509_v51 = vmul.f32 0.01, %v2477_v55  ;;  %v2444_v59 = vmul.f32 %v3374_v12, %v4505_v62 }
 0x19f   : > { %2528 = vst [vmem:[%s4529_s6 + $0x8] sm:$0xff] %v2512_v25  ;;  %v2469_v39 = vadd.f32 %v4515_v27, %v2446_v54  ;;  %v2452_v2 = vmul.f32 %v3388_v23, %v4505_v62  ;;  %v3390_v1 = vadd.f32 %v4507_v46, %v3352_v36  ;;  %v2447_v4 = vmul.f32 %v3375_v5, %v4505_v62 }
 0x1a0   : > { %v2525_v60 = vsel %vm2493_vm14, %v2477_v55, %v2509_v51  ;;  %v3376_v18 = vadd.f32 %v2338_v61, %v4498_v9  ;;  %v3392_v28 = vadd.f32 %v4510_v30, %v2370_v33  ;;  %v2467_v16 = vadd.f32 %v4515_v27, %v2444_v59 }
 0x1a1   : > { %vm2485_vm15 = vcmp.gt.f32.partialorder %v2469_v39, 0.0  ;;  %v2501_v35 = vmul.f32 0.01, %v2469_v39  ;;  %2541 = vst [vmem:[%s4529_s6 + $0x70] sm:$0xff] %v2525_v60  ;;  %v2475_v7 = vadd.f32 %v4515_v27, %v2452_v2  ;;  %v2470_v46 = vadd.f32 %v4515_v27, %v2447_v4 }
 0x1a2   : > { %v2455_v20 = vmul.f32 %v3390_v1, %v4505_v62  ;;  %v2445_v9 = vmul.f32 %v3376_v18, %v4505_v62  ;;  %v2453_v30 = vmul.f32 %v3392_v28, %v4505_v62  ;;  %vm2483_vm0 = vcmp.gt.f32.partialorder %v2467_v16, 0.0 }
 0x1a3   : > { %v2517_v34 = vsel %vm2485_vm15, %v2469_v39, %v2501_v35  ;;  %v2499_v0 = vmul.f32 0.01, %v2467_v16  ;;  %vm2491_vm1 = vcmp.gt.f32.partialorder %v2475_v7, 0.0  ;;  %v2507_v24 = vmul.f32 0.01, %v2475_v7 }
 0x1a4   : > { %2533 = vst [vmem:[%s4529_s6 + $0x30] sm:$0xff] %v2517_v34  ;;  %vm2486_vm2 = vcmp.gt.f32.partialorder %v2470_v46, 0.0  ;;  %v2502_v32 = vmul.f32 0.01, %v2470_v46  ;;  %v2478_v58 = vadd.f32 %v4515_v27, %v2455_v20  ;;  %v2468_v56 = vadd.f32 %v4515_v27, %v2445_v9 }
 0x1a5   : > { %v2515_v47 = vsel %vm2483_vm0, %v2467_v16, %v2499_v0  ;;  %v2476_v62 = vadd.f32 %v4515_v27, %v2453_v30  ;;  %v2523_v29 = vsel %vm2491_vm1, %v2475_v7, %v2507_v24 }
 0x1a6   : > { %2531 = vst [vmem:[%s4529_s6 + $0x20] sm:$0xff] %v2515_v47  ;;  %v2518_v6 = vsel %vm2486_vm2, %v2470_v46, %v2502_v32  ;;  %vm2494_vm3 = vcmp.gt.f32.partialorder %v2478_v58, 0.0  ;;  %v2510_v52 = vmul.f32 0.01, %v2478_v58  ;;  %2539 = vst [vmem:[%s4529_s6 + $0x60] sm:$0xff] %v2523_v29  ;;  %vm2484_vm4 = vcmp.gt.f32.partialorder %v2468_v56, 0.0 }
 0x1a7   : > { %2534 = vst [vmem:[%s4529_s6 + $0x38] sm:$0xff] %v2518_v6  ;;  %v2500_v15 = vmul.f32 0.01, %v2468_v56  ;;  %vm2492_vm5 = vcmp.gt.f32.partialorder %v2476_v62, 0.0  ;;  %v2508_v50 = vmul.f32 0.01, %v2476_v62 }
 0x1a8   : > { %v2526_v27 = vsel %vm2494_vm3, %v2478_v58, %v2510_v52 }
 0x1a9   : > { %2542 = vst [vmem:[%s4529_s6 + $0x78] sm:$0xff] %v2526_v27  ;;  %v2516_v42 = vsel %vm2484_vm4, %v2468_v56, %v2500_v15  ;;  %v2524_v11 = vsel %vm2492_vm5, %v2476_v62, %v2508_v50 }
 0x1aa   : > { %2532 = vst [vmem:[%s4529_s6 + $0x28] sm:$0xff] %v2516_v42  ;;  %2540 = vst [vmem:[%s4529_s6 + $0x68] sm:$0xff] %v2524_v11 }
 0x1ab   : > { %3667 = shalt.err (!%p3664_p7)
}
 0x1ac   : > { %s3668_s14 = scalar_lea.hbm %s4585_s13, 2048  ;;  %s3672_s9 = scalar_lea.hbm %s4650_s4, 8192 }
 0x1ad   : > { %p3669_p9 = scmp.ne.s32.totalorder %s4585_s13, %s3668_s14  ;;  %p3673_p12 = scmp.lt.u32.totalorder %s4585_s13, %s4650_s4 }
 0x1ae   : > { %p3674_p13 = scmp.lt.u32.totalorder %s3672_s9, %s3668_s14  ;;  %p3676_p1 = scmp.lt.u32.totalorder %s3668_s14, %s4585_s13 }
 0x1af   : > { %p3670_p10 = pnand %p3669_p9, %p3829_p3 }
 0x1b0   : > { %p3675_p0 = por %p3674_p13, %p3673_p12 }
 0x1b1   : > { %p3671_p11 = pneg %p3670_p10 }
 0x1b2   : > { %p3677_p2 = por %p3676_p1, %p3675_p0 }
 0x1b4   : > { %p3678_p4 = pnand %p3677_p2, %p3671_p11 }
 0x1b6   : > { %3681 = shalt.err (!%p3678_p4)
}
 0x1b7   : > { %s3751_s11 = smov 128   ;;  %s3752_s12 = smov 8  }
 0x1b8   : > { %3499 = dma.vmem_to_hbm [thread:$0]  (%p3829_p3), %s4587_s10, 2048, %s4585_s13, %s4594_s23, %s3751_s11, %s3751_s11, %s3752_s12  }
 0x1b9 PF: > { %p3505_p5 = scmp.ge.s32.totalorder %s3748_s22, 2  ;;  %s2574_s24 = sand.u32 1, %s3720_s15  }
 0x1ba   : > { %s2575_s30 = scalar_lea.sflag [#allocation4], %s2574_s24 }
 0x1bb   : > { %p3502_p6 = pnand %p3505_p5, %p3838_p8 }
 0x1bd   : > { %3715 = dma.done.wait (!%p3502_p6), %s2575_s30, 2048  }
 0x1be   : > { %3717 = vsyncadd (!%p3502_p6), %s2575_s30, 4294965248  ;;  %s17_s22 = sadd.s32 1, %s3748_s22   ;;  %s4673_s15 = smov %s3724_s16 }
 0x1bf   : > { %p14_p7 = scmp.ge.s32.totalorder %s17_s22, 6   ;;  %s4674_s16 = smov %s3728_s17 }
 0x1c0   : > { %s4675_s17 = smov %s3847_s7  ;;  %s4676_s18 = smov %s3740_s20 }
 0x1c1   : > { %s4677_s19 = smov %s3744_s21  ;;  %s4678_s20 = smov %s4681_s25 }
 0x1c2   : > { %s4679_s21 = smov %s4685_s26  ;;  %16 = sbr.rel (!%p14_p7) target bundleno = 5 (0x5), region = 90 }
 0x1c9   :  { %2580 = vsyncpa [#allocation4], 1 }
 0x1ca   :  { %2582 = vsyncpa [#allocation4 + $0x1], 1 }

</bundles_post_ra>
